<compile_context>
chip_gen: v7x
topology: tpu7x:2x2x1
jax: 0.10.0
libtpu: 0.0.40
codegen_flags: <defaults>
</compile_context>

<pallas_src>
import jax
import jax.numpy as jnp
from jax.experimental import pallas as pl
from jax.experimental.pallas import tpu as pltpu

RESNET_OUT = 2048   # self.resnet_output_size for size == 256
H1 = 1000
H2 = 100


def _detector_kernel(x_ref, w1q_ref, s1_ref, b1_ref, w2_ref, b2_ref,
                     w3_ref, b3_ref, out_ref):
    """Fused fc1+ReLU -> fc2+ReLU -> fc3(+bias). Single invocation, all VMEM."""
    # fc1: (B,2048) @ (2048,1000). x cast to bf16 in-kernel (VPU, hidden under
    # the w1 DMA); int8 weights cast to bf16 (exact, |q| <= 127); f32 MXU acc.
    x_bf16 = x_ref[...].astype(jnp.bfloat16)
    w1_bf16 = w1q_ref[...].astype(jnp.bfloat16)
    h1 = jnp.dot(x_bf16, w1_bf16, preferred_element_type=jnp.float32)
    # Per-output-column dequant scale folded in after accumulation, then bias
    # + ReLU — all f32 elementwise (v5e has no bf16 VPU path).
    h1 = jnp.maximum(h1 * s1_ref[...] + b1_ref[...], 0.0)

    # fc2: (B,1000) @ (1000,100) kept fully in f32 for parity with the torch
    # reference (w2 is only ~0.4 MB, compute is negligible at this size).
    h2 = jnp.dot(h1, w2_ref[...], preferred_element_type=jnp.float32)
    h2 = jnp.maximum(h2 + b2_ref[...], 0.0)

    # fc3: 100 -> 1. N=1 MXU matmul is a degenerate push/pop; do it on the
    # VPU/XLU instead: broadcast-multiply by the weight row, reduce over lanes.
    out_ref[...] = (jnp.sum(h2 * w3_ref[...], axis=-1, keepdims=True)
                    + b3_ref[0])


def prepare_params(w1, b1, w2, b2, w3, b3):
    """One-time parameter prep (call once at load time, NOT per forward).

    Accepts torch nn.Linear layout: w* is (out_features, in_features).
    Returns kernel layout:
      w1  -> (2048, 1000) int8  (symmetric per-output-column quant)
      s1  -> (1, 1000)    f32   dequant scale (applied post-accumulation)
      b1  -> (1, 1000)    f32
      w2  -> (1000, 100)  f32   (kept f32 for accuracy; only 0.4 MB)
      b2  -> (1, 100)     f32
      w3  -> (1, 100)     f32   fc3 weight row (VPU multiply-reduce path)
      b3  -> (1,)         f32   fc3 scalar bias (SMEM)
    """
    w1t = jnp.asarray(w1, jnp.float32).T                       # (2048, 1000)
    s1 = jnp.max(jnp.abs(w1t), axis=0, keepdims=True) / 127.0  # (1, 1000)
    s1 = jnp.where(s1 == 0.0, 1.0, s1)
    w1q = jnp.clip(jnp.round(w1t / s1), -127.0, 127.0).astype(jnp.int8)
    return (
        w1q,                                                   # (2048, 1000) i8
        s1.astype(jnp.float32),                                # (1, 1000)
        jnp.asarray(b1).reshape(1, H1).astype(jnp.float32),    # (1, 1000)
        jnp.asarray(w2).T.astype(jnp.float32),                 # (1000, 100)
        jnp.asarray(b2).reshape(1, H2).astype(jnp.float32),    # (1, 100)
        jnp.asarray(w3).reshape(1, H2).astype(jnp.float32),    # (1, 100)
        jnp.asarray(b3).reshape(1).astype(jnp.float32),        # (1,)
    )


@jax.jit
def resnet_detector2_forward(x, params):
    """x: any shape flattening to (-1, 2048). Returns (B,) f32 like the module."""
    w1q, s1, b1, w2, b2, w3, b3 = params
    x2 = x.reshape(-1, RESNET_OUT)          # torch x.view(-1, 2048); no wrapper cast
    B = x2.shape[0]

    vmem = pl.BlockSpec(memory_space=pltpu.MemorySpace.VMEM)
    smem = pl.BlockSpec(memory_space=pltpu.MemorySpace.SMEM)

    flops = 2 * B * (RESNET_OUT * H1 + H1 * H2 + H2)
    bytes_accessed = (w1q.size                       # int8 w1 stream
                      + (s1.size + b1.size) * 4
                      + w2.size * 4 + b2.size * 4
                      + (w3.size + b3.size) * 4
                      + x2.size * 4 + B * 4)

    out = pl.pallas_call(
        _detector_kernel,
        out_shape=jax.ShapeDtypeStruct((B, 1), jnp.float32),
        in_specs=[vmem, vmem, vmem, vmem, vmem, vmem, vmem, smem],
        out_specs=vmem,
        cost_estimate=pl.CostEstimate(flops=flops, transcendentals=0,
                                      bytes_accessed=bytes_accessed),
    )(x2, w1q, s1, b1, w2, b2, w3, b3)

    return out.reshape(-1)   # torch .squeeze(1); folds into this same jit


if __name__ == "__main__":
    key = jax.random.PRNGKey(0)
    kx, k1, k2, k3, k4, k5, k6 = jax.random.split(key, 7)

    B = 2
    # Input shaped like pre-extracted resnet features (B, 2048).
    x = jax.random.normal(kx, (B, RESNET_OUT), dtype=jnp.float32)

    # Deterministic synthetic parameters in torch nn.Linear layout (out, in).
    w1 = jax.random.normal(k1, (H1, RESNET_OUT), dtype=jnp.float32) * 0.02
    b1 = jax.random.normal(k2, (H1,), dtype=jnp.float32) * 0.02
    w2 = jax.random.normal(k3, (H2, H1), dtype=jnp.float32) * 0.05
    b2 = jax.random.normal(k4, (H2,), dtype=jnp.float32) * 0.05
    w3 = jax.random.normal(k5, (1, H2), dtype=jnp.float32) * 0.1
    b3 = jax.random.normal(k6, (1,), dtype=jnp.float32) * 0.1

    params = prepare_params(w1, b1, w2, b2, w3, b3)   # hoisted one-time prep

    out = resnet_detector2_forward(x, params)
    out = jax.block_until_ready(out)

    # Pure-JAX f32 reference with torch semantics.  The kernel streams int8 w1
    # + bf16 x on fc1 (f32 elsewhere), so a loosened tolerance is used.
    h1 = jnp.maximum(x @ w1.T + b1, 0.0)
    h2 = jnp.maximum(h1 @ w2.T + b2, 0.0)
    ref = (h2 @ w3.T + b3)[:, 0]

    assert out.shape == (B,)
    assert jnp.allclose(out, ref, rtol=5e-2, atol=5e-2), (out, ref)

    print("KERNEL_OK")
</pallas_src>

<mosaic_0001>
module attributes {stable_mosaic.version = 11 : i64} {
  func.func @_detector_kernel(%arg0: memref<2x2048xf32, #tpu.memory_space<vmem>>, %arg1: memref<2048x1000xi8, #tpu.memory_space<vmem>>, %arg2: memref<1x1000xf32, #tpu.memory_space<vmem>>, %arg3: memref<1x1000xf32, #tpu.memory_space<vmem>>, %arg4: memref<1000x100xf32, #tpu.memory_space<vmem>>, %arg5: memref<1x100xf32, #tpu.memory_space<vmem>>, %arg6: memref<1x100xf32, #tpu.memory_space<vmem>>, %arg7: memref<1xf32, #tpu.memory_space<smem>>, %arg8: memref<2x1xf32, #tpu.memory_space<vmem>>) attributes {dimension_semantics = [], scalar_prefetch = 0 : i64, scratch_operands = 0 : i64, tpu.core_type = #tpu.core_type<tc>} {
    %c0 = arith.constant 0 : index
    %c0_0 = arith.constant 0 : index
    %0 = vector.load %arg0[%c0, %c0_0] : memref<2x2048xf32, #tpu.memory_space<vmem>>, vector<2x2048xf32>
    %1 = arith.truncf %0 : vector<2x2048xf32> to vector<2x2048xbf16>
    %c0_1 = arith.constant 0 : index
    %c0_2 = arith.constant 0 : index
    %2 = vector.load %arg1[%c0_1, %c0_2] : memref<2048x1000xi8, #tpu.memory_space<vmem>>, vector<2048x1000xi8>
    %3 = arith.sitofp %2 : vector<2048x1000xi8> to vector<2048x1000xbf16>
    %cst = arith.constant dense<0.000000e+00> : vector<2x1000xf32>
    %4 = tpu.matmul %1, %3, %cst {dimension_numbers = #tpu.dot_dimension_numbers<[1], [0], [0], [1], [0, 0, 1, 1], [], []>} : vector<2x2048xbf16>, vector<2048x1000xbf16>, vector<2x1000xf32> -> vector<2x1000xf32>
    %c0_3 = arith.constant 0 : index
    %c0_4 = arith.constant 0 : index
    %5 = vector.load %arg2[%c0_3, %c0_4] : memref<1x1000xf32, #tpu.memory_space<vmem>>, vector<1x1000xf32>
    %6 = vector.broadcast %5 : vector<1x1000xf32> to vector<2x1000xf32>
    %7 = arith.mulf %4, %6 : vector<2x1000xf32>
    %c0_5 = arith.constant 0 : index
    %c0_6 = arith.constant 0 : index
    %8 = vector.load %arg3[%c0_5, %c0_6] : memref<1x1000xf32, #tpu.memory_space<vmem>>, vector<1x1000xf32>
    %9 = vector.broadcast %8 : vector<1x1000xf32> to vector<2x1000xf32>
    %10 = arith.addf %7, %9 : vector<2x1000xf32>
    %cst_7 = arith.constant 0.000000e+00 : f32
    %11 = vector.broadcast %cst_7 : f32 to vector<2x1000xf32>
    %12 = arith.maximumf %10, %11 : vector<2x1000xf32>
    %c0_8 = arith.constant 0 : index
    %c0_9 = arith.constant 0 : index
    %13 = vector.load %arg4[%c0_8, %c0_9] : memref<1000x100xf32, #tpu.memory_space<vmem>>, vector<1000x100xf32>
    %cst_10 = arith.constant dense<0.000000e+00> : vector<2x100xf32>
    %14 = tpu.matmul %12, %13, %cst_10 {dimension_numbers = #tpu.dot_dimension_numbers<[1], [0], [0], [1], [0, 0, 1, 1], [], []>} : vector<2x1000xf32>, vector<1000x100xf32>, vector<2x100xf32> -> vector<2x100xf32>
    %c0_11 = arith.constant 0 : index
    %c0_12 = arith.constant 0 : index
    %15 = vector.load %arg5[%c0_11, %c0_12] : memref<1x100xf32, #tpu.memory_space<vmem>>, vector<1x100xf32>
    %16 = vector.broadcast %15 : vector<1x100xf32> to vector<2x100xf32>
    %17 = arith.addf %14, %16 : vector<2x100xf32>
    %cst_13 = arith.constant 0.000000e+00 : f32
    %18 = vector.broadcast %cst_13 : f32 to vector<2x100xf32>
    %19 = arith.maximumf %17, %18 : vector<2x100xf32>
    %c0_14 = arith.constant 0 : index
    %c0_15 = arith.constant 0 : index
    %20 = vector.load %arg6[%c0_14, %c0_15] : memref<1x100xf32, #tpu.memory_space<vmem>>, vector<1x100xf32>
    %21 = vector.broadcast %20 : vector<1x100xf32> to vector<2x100xf32>
    %22 = arith.mulf %19, %21 : vector<2x100xf32>
    %cst_16 = arith.constant dense<0.000000e+00> : vector<2xf32>
    %23 = vector.multi_reduction <add>, %22, %cst_16 [1] : vector<2x100xf32> to vector<2xf32>
    %24 = vector.shape_cast %23 : vector<2xf32> to vector<2x1xf32>
    %c0_17 = arith.constant 0 : index
    %25 = memref.load %arg7[%c0_17] : memref<1xf32, #tpu.memory_space<smem>>
    %26 = vector.broadcast %25 : f32 to vector<2x1xf32>
    %27 = arith.addf %24, %26 : vector<2x1xf32>
    %c0_18 = arith.constant 0 : index
    %c0_19 = arith.constant 0 : index
    %28 = vector.load %arg8[%c0_18, %c0_19] : memref<2x1xf32, #tpu.memory_space<vmem>>, vector<2x1xf32>
    tpu.vector_store %arg8[%c0_18, %c0_19], %27 {strides = array<i32>} : memref<2x1xf32, #tpu.memory_space<vmem>>, vector<2x1xf32>,
    return
  }
}

</mosaic_0001>

<bundles_post_ra>
// kernel: resnet_detector2_forward.1
= control target key start
LH: loop header
LB: loop body
LE: loop exit
PB: predicated region body
PF: predicated region fallthrough
CT: control target
= control target key end

     0   :  { %v3897_v30 = vmov 1983009808   ;;  %v42_v32 = vlaneseq  ;;  %vm3226_vm0 = vcmask 850944   ;;  %vm3519_vm1 = vcmask 812032   ;;  %s6117_s1 = inlined_call_operand.vmem [shape: s8[2048,1000], index: 1, kind: input, shape index: {}]   ;;  %s6118_s0 = inlined_call_operand.vmem [shape: f32[2,2048], index: 0, kind: input, shape index: {}]   ;;  %s6119_s2 = inlined_call_operand.vmem [shape: f32[1,1000], index: 2, kind: input, shape index: {}]   ;;  %s6120_s3 = inlined_call_operand.vmem [shape: f32[1,1000], index: 3, kind: input, shape index: {}]   ;;  %s6121_s4 = inlined_call_operand.vmem [shape: f32[1000,100], index: 4, kind: input, shape index: {}]   ;;  %s6122_s5 = inlined_call_operand.vmem [shape: f32[1,100], index: 5, kind: input, shape index: {}]   ;;  %s6123_s6 = inlined_call_operand.vmem [shape: f32[1,100], index: 6, kind: input, shape index: {}]   ;;  %s6124_s7 = inlined_call_operand.<no memory space> [shape: f32[1], index: 7, kind: input, shape index: {}]   ;;  %s6125_s8 = inlined_call_operand.vmem [shape: f32[2,1], index: 8, kind: output, shape index: {}]  }
   0x1   :  { %v139_v0 = vld [vmem:[%s6117_s1 + $0x8] sm:$0xff]  ;;  %v141_v1 = vld [vmem:[%s6117_s1 + $0x18] sm:$0xff]  ;;  %v138_v2 = vld [vmem:[%s6117_s1] sm:$0xff]  ;;  %v40_v31 = vunpack.c.l.s4 %v3897_v30  ;;  %vm3526_vm2 = vcmask 1024  }
   0x2   :  { %v651_v3 = vunpack.c.l.s8.bf16 %v139_v0  ;;  %v659_v4 = vunpack.c.h.s8.bf16 %v139_v0  ;;  %v653_v5 = vunpack.c.l.s8.bf16 %v141_v1  ;;  %v661_v6 = vunpack.c.h.s8.bf16 %v141_v1  ;;  %v140_v7 = vld [vmem:[%s6117_s1 + $0x10] sm:$0xff]  ;;  %v147_v10 = vld [vmem:[%s6117_s1 + $0x48] sm:$0xff]  ;;  %v149_v11 = vld [vmem:[%s6117_s1 + $0x58] sm:$0xff] }
   0x3   :  { %v650_v8 = vunpack.c.l.s8.bf16 %v138_v2  ;;  %v652_v9 = vunpack.c.l.s8.bf16 %v140_v7  ;;  %v658_v12 = vunpack.c.h.s8.bf16 %v138_v2  ;;  %v660_v13 = vunpack.c.h.s8.bf16 %v140_v7  ;;  %v146_v16 = vld [vmem:[%s6117_s1 + $0x40] sm:$0xff]  ;;  %v148_v17 = vld [vmem:[%s6117_s1 + $0x50] sm:$0xff]  ;;  %v155_v22 = vld [vmem:[%s6117_s1 + $0x88] sm:$0xff] }
   0x4   :  { %1674 = vmatprep.subr.bf16.mxu0 %v651_v3  ;;  %2002 = vmatprep.subr.bf16.mxu1 %v653_v5  ;;  %v667_v14 = vunpack.c.l.s8.bf16 %v147_v10  ;;  %v669_v15 = vunpack.c.l.s8.bf16 %v149_v11  ;;  %v666_v18 = vunpack.c.l.s8.bf16 %v146_v16  ;;  %v668_v19 = vunpack.c.l.s8.bf16 %v148_v17  ;;  %v157_v23 = vld [vmem:[%s6117_s1 + $0x98] sm:$0xff]  ;;  %v154_v28 = vld [vmem:[%s6117_s1 + $0x80] sm:$0xff]  ;;  %v156_v29 = vld [vmem:[%s6117_s1 + $0x90] sm:$0xff] }
   0x5   :  { %1675 = vmatpush1.bf16.msra.mxu0 %v650_v8  ;;  %2003 = vmatpush1.bf16.msra.mxu1 %v652_v9  ;;  %v675_v20 = vunpack.c.h.s8.bf16 %v147_v10  ;;  %v677_v21 = vunpack.c.h.s8.bf16 %v149_v11  ;;  %v674_v24 = vunpack.c.h.s8.bf16 %v146_v16  ;;  %v676_v25 = vunpack.c.h.s8.bf16 %v148_v17  ;;  %v163_v39 = vld [vmem:[%s6117_s1 + $0xc8] sm:$0xff]  ;;  %v165_v40 = vld [vmem:[%s6117_s1 + $0xd8] sm:$0xff]  ;;  %v3992_v41 = vld [vmem:[%s6118_s0] sm:$0xff] }
   0x6   :  { %1676 = vmatprep.subr.bf16.mxu0 %v659_v4  ;;  %2004 = vmatprep.subr.bf16.mxu1 %v661_v6  ;;  %v683_v26 = vunpack.c.l.s8.bf16 %v155_v22  ;;  %v685_v27 = vunpack.c.l.s8.bf16 %v157_v23  ;;  %v682_v33 = vunpack.c.l.s8.bf16 %v154_v28  ;;  %v684_v34 = vunpack.c.l.s8.bf16 %v156_v29  ;;  %v162_v47 = vld [vmem:[%s6117_s1 + $0xc0] sm:$0xff]  ;;  %v164_v48 = vld [vmem:[%s6117_s1 + $0xd0] sm:$0xff]  ;;  %v171_v56 = vld [vmem:[%s6117_s1 + $0x108] sm:$0xff] }
   0x7   :  { %v691_v35 = vunpack.c.h.s8.bf16 %v155_v22  ;;  %v693_v36 = vunpack.c.h.s8.bf16 %v157_v23  ;;  %v41_v37 = vunpack.c.0.s8 %v40_v31  ;;  %v3981_v38 = vshrl.u32 %v42_v32, 7  ;;  %v173_v57 = vld [vmem:[%s6117_s1 + $0x118] sm:$0xff]  ;;  %v170_v62 = vld [vmem:[%s6117_s1 + $0x100] sm:$0xff]  ;;  %v172_v63 = vld [vmem:[%s6117_s1 + $0x110] sm:$0xff] }
   0x8   :  { %v690_v43 = vunpack.c.h.s8.bf16 %v154_v28  ;;  %v692_v44 = vunpack.c.h.s8.bf16 %v156_v29  ;;  %v699_v45 = vunpack.c.l.s8.bf16 %v163_v39  ;;  %v701_v46 = vunpack.c.l.s8.bf16 %v165_v40  ;;  %v179_v4 = vld [vmem:[%s6117_s1 + $0x148] sm:$0xff]  ;;  %v181_v5 = vld [vmem:[%s6117_s1 + $0x158] sm:$0xff]  ;;  %v178_v10 = vld [vmem:[%s6117_s1 + $0x140] sm:$0xff] }
   0x9   :  { %1677 = vmatpush1.bf16.msra.mxu0 %v658_v12  ;;  %2005 = vmatpush1.bf16.msra.mxu1 %v660_v13  ;;  %v3995_v42 = vsub.s32 %v41_v37, %v3981_v38  ;;  %v698_v51 = vunpack.c.l.s8.bf16 %v162_v47  ;;  %v700_v52 = vunpack.c.l.s8.bf16 %v164_v48  ;;  %v707_v53 = vunpack.c.h.s8.bf16 %v163_v39  ;;  %v180_v11 = vld [vmem:[%s6117_s1 + $0x150] sm:$0xff]  ;;  %v187_v16 = vld [vmem:[%s6117_s1 + $0x188] sm:$0xff]  ;;  %v189_v17 = vld [vmem:[%s6117_s1 + $0x198] sm:$0xff] }
   0xa   :  { %1678 = vmatprep.subr.bf16.mxu0 %v667_v14  ;;  %2006 = vmatprep.subr.bf16.mxu1 %v669_v15  ;;  %v709_v54 = vunpack.c.h.s8.bf16 %v165_v40  ;;  %v706_v58 = vunpack.c.h.s8.bf16 %v162_v47  ;;  %v708_v59 = vunpack.c.h.s8.bf16 %v164_v48  ;;  %v715_v60 = vunpack.c.l.s8.bf16 %v171_v56  ;;  %v186_v22 = vld [vmem:[%s6117_s1 + $0x180] sm:$0xff]  ;;  %v188_v23 = vld [vmem:[%s6117_s1 + $0x190] sm:$0xff]  ;;  %v195_v28 = vld [vmem:[%s6117_s1 + $0x1c8] sm:$0xff] }
   0xb   :  { %v4005_v49 = vrot.slane %v3992_v41, %v3995_v42  ;;  %v717_v61 = vunpack.c.l.s8.bf16 %v173_v57  ;;  %v714_v0 = vunpack.c.l.s8.bf16 %v170_v62  ;;  %v716_v1 = vunpack.c.l.s8.bf16 %v172_v63  ;;  %v197_v29 = vld [vmem:[%s6117_s1 + $0x1d8] sm:$0xff] }
   0xc   :  { %v723_v2 = vunpack.c.h.s8.bf16 %v171_v56  ;;  %v725_v3 = vunpack.c.h.s8.bf16 %v173_v57  ;;  %v722_v6 = vunpack.c.h.s8.bf16 %v170_v62  ;;  %v724_v7 = vunpack.c.h.s8.bf16 %v172_v63 }
   0xd   :  { %1679 = vmatpush1.bf16.msra.mxu0 %v666_v18  ;;  %2007 = vmatpush1.bf16.msra.mxu1 %v668_v19  ;;  %v53_v50 = vcombine.high %v4005_v49, %v4005_v49  ;;  %v731_v8 = vunpack.c.l.s8.bf16 %v179_v4  ;;  %v733_v9 = vunpack.c.l.s8.bf16 %v181_v5  ;;  %v730_v12 = vunpack.c.l.s8.bf16 %v178_v10 }
   0xe   :  { %1680 = vmatprep.subr.bf16.mxu0 %v675_v20  ;;  %2008 = vmatprep.subr.bf16.mxu1 %v677_v21  ;;  %v732_v13 = vunpack.c.l.s8.bf16 %v180_v11  ;;  %v739_v14 = vunpack.c.h.s8.bf16 %v179_v4  ;;  %v741_v15 = vunpack.c.h.s8.bf16 %v181_v5  ;;  %v738_v18 = vunpack.c.h.s8.bf16 %v178_v10 }
   0xf   :  { %v4009_v55 = vpack.c.bf16 %v53_v50, %v53_v50  ;;  %v740_v19 = vunpack.c.h.s8.bf16 %v180_v11  ;;  %v747_v20 = vunpack.c.l.s8.bf16 %v187_v16  ;;  %v749_v21 = vunpack.c.l.s8.bf16 %v189_v17 }
  0x10   :  { %v754_v30 = vunpack.c.h.s8.bf16 %v186_v22  ;;  %v756_v31 = vunpack.c.h.s8.bf16 %v188_v23  ;;  %v763_v32 = vunpack.c.l.s8.bf16 %v195_v28  ;;  %v771_v40 = vunpack.c.h.s8.bf16 %v195_v28 }
  0x11   :  { %1681 = vmatpush1.bf16.msra.mxu0 %v674_v24  ;;  %2009 = vmatpush1.bf16.msra.mxu1 %v676_v25  ;;  %v746_v24 = vunpack.c.l.s8.bf16 %v186_v22  ;;  %v748_v25 = vunpack.c.l.s8.bf16 %v188_v23 }
  0x12   :  { %1682 = vmatprep.subr.bf16.mxu0 %v683_v26  ;;  %2010 = vmatprep.subr.bf16.mxu1 %v685_v27  ;;  %v755_v26 = vunpack.c.h.s8.bf16 %v187_v16  ;;  %v757_v27 = vunpack.c.h.s8.bf16 %v189_v17 }
  0x13   :  { %1706 = vmatprep.mubr.bf16.mxu0 %v4009_v55  ;;  %2034 = vmatprep.mubr.bf16.mxu1 %v4009_v55 }
  0x15   :  { %1683 = vmatpush1.bf16.msra.mxu0 %v682_v33  ;;  %2011 = vmatpush1.bf16.msra.mxu1 %v684_v34  ;;  %v765_v33 = vunpack.c.l.s8.bf16 %v197_v29  ;;  %v194_v34 = vld [vmem:[%s6117_s1 + $0x1c0] sm:$0xff] }
  0x16   :  { %1684 = vmatprep.subr.bf16.mxu0 %v691_v35  ;;  %2012 = vmatprep.subr.bf16.mxu1 %v693_v36  ;;  %v196_v35 = vld [vmem:[%s6117_s1 + $0x1d0] sm:$0xff]  ;;  %v38_v36 = vcombine.high %v3992_v41, %v3992_v41  ;;  %v762_v37 = vunpack.c.l.s8.bf16 %v194_v34  ;;  %v770_v41 = vunpack.c.h.s8.bf16 %v194_v34 }
  0x17   :  { %v764_v39 = vunpack.c.l.s8.bf16 %v196_v35  ;;  %v772_v47 = vunpack.c.h.s8.bf16 %v196_v35 }
  0x19   :  { %1685 = vmatpush1.bf16.msra.mxu0 %v690_v43  ;;  %2013 = vmatpush1.bf16.msra.mxu1 %v692_v44  ;;  %v773_v43 = vunpack.c.h.s8.bf16 %v197_v29  ;;  %v203_v44 = vld [vmem:[%s6117_s1 + $0x208] sm:$0xff] }
  0x1a   :  { %1686 = vmatprep.subr.bf16.mxu0 %v699_v45  ;;  %2014 = vmatprep.subr.bf16.mxu1 %v701_v46  ;;  %v205_v45 = vld [vmem:[%s6117_s1 + $0x218] sm:$0xff]  ;;  %v4070_v46 = vrot.slane %v38_v36, %v3995_v42  ;;  %v779_v48 = vunpack.c.l.s8.bf16 %v203_v44 }
  0x1b   :  { %v781_v50 = vunpack.c.l.s8.bf16 %v205_v45 }
  0x1d   :  { %1687 = vmatpush1.bf16.msra.mxu0 %v698_v51  ;;  %2015 = vmatpush1.bf16.msra.mxu1 %v700_v52  ;;  %v202_v51 = vld [vmem:[%s6117_s1 + $0x200] sm:$0xff]  ;;  %v204_v52 = vld [vmem:[%s6117_s1 + $0x210] sm:$0xff] }
  0x1e   :  { %1688 = vmatprep.subr.bf16.mxu0 %v707_v53  ;;  %2016 = vmatprep.subr.bf16.mxu1 %v709_v54  ;;  %v54_v53 = vcombine.high %v4070_v46, %v4070_v46  ;;  %v4082_v54 = vpack.c.bf16 %v4005_v49, %v4005_v49  ;;  %v778_v56 = vunpack.c.l.s8.bf16 %v202_v51  ;;  %v780_v57 = vunpack.c.l.s8.bf16 %v204_v52 }
  0x1f   :  { %v786_v49 = vunpack.c.h.s8.bf16 %v202_v51  ;;  %v788_v63 = vunpack.c.h.s8.bf16 %v204_v52 }
  0x20   :  { %v4090_v62 = vpack.c.bf16 %v54_v53, %v54_v53 }
  0x21   :  { %1689 = vmatpush1.bf16.msra.mxu0 %v706_v58  ;;  %2017 = vmatpush1.bf16.msra.mxu1 %v708_v59  ;;  %v787_v58 = vunpack.c.h.s8.bf16 %v203_v44  ;;  %v789_v59 = vunpack.c.h.s8.bf16 %v205_v45 }
  0x22   :  { %1690 = vmatprep.subr.bf16.mxu0 %v715_v60  ;;  %2018 = vmatprep.subr.bf16.mxu1 %v717_v61  ;;  %v211_v60 = vld [vmem:[%s6117_s1 + $0x248] sm:$0xff]  ;;  %v213_v61 = vld [vmem:[%s6117_s1 + $0x258] sm:$0xff] }
  0x25   :  { %1691 = vmatpush1.bf16.msra.mxu0 %v714_v0  ;;  %2019 = vmatpush1.bf16.msra.mxu1 %v716_v1  ;;  %v795_v0 = vunpack.c.l.s8.bf16 %v211_v60  ;;  %v797_v1 = vunpack.c.l.s8.bf16 %v213_v61 }
  0x26   :  { %1692 = vmatprep.subr.bf16.mxu0 %v723_v2  ;;  %2020 = vmatprep.subr.bf16.mxu1 %v725_v3  ;;  %v210_v2 = vld [vmem:[%s6117_s1 + $0x240] sm:$0xff]  ;;  %v212_v3 = vld [vmem:[%s6117_s1 + $0x250] sm:$0xff] }
  0x27   :  { %v794_v4 = vunpack.c.l.s8.bf16 %v210_v2  ;;  %v796_v5 = vunpack.c.l.s8.bf16 %v212_v3  ;;  %v802_v10 = vunpack.c.h.s8.bf16 %v210_v2  ;;  %v804_v11 = vunpack.c.h.s8.bf16 %v212_v3 }
  0x29   :  { %1693 = vmatpush1.bf16.msra.mxu0 %v722_v6  ;;  %2021 = vmatpush1.bf16.msra.mxu1 %v724_v7  ;;  %v803_v6 = vunpack.c.h.s8.bf16 %v211_v60  ;;  %v805_v7 = vunpack.c.h.s8.bf16 %v213_v61 }
  0x2a   :  { %1694 = vmatprep.subr.bf16.mxu0 %v731_v8  ;;  %2022 = vmatprep.subr.bf16.mxu1 %v733_v9  ;;  %v219_v8 = vld [vmem:[%s6117_s1 + $0x288] sm:$0xff]  ;;  %v221_v9 = vld [vmem:[%s6117_s1 + $0x298] sm:$0xff] }
  0x2d   :  { %1695 = vmatpush1.bf16.msra.mxu0 %v730_v12  ;;  %2023 = vmatpush1.bf16.msra.mxu1 %v732_v13  ;;  %v811_v12 = vunpack.c.l.s8.bf16 %v219_v8  ;;  %v813_v13 = vunpack.c.l.s8.bf16 %v221_v9 }
  0x2e   :  { %1696 = vmatprep.subr.bf16.mxu0 %v739_v14  ;;  %2024 = vmatprep.subr.bf16.mxu1 %v741_v15  ;;  %v218_v14 = vld [vmem:[%s6117_s1 + $0x280] sm:$0xff]  ;;  %v220_v15 = vld [vmem:[%s6117_s1 + $0x290] sm:$0xff] }
  0x2f   :  { %v810_v16 = vunpack.c.l.s8.bf16 %v218_v14  ;;  %v812_v17 = vunpack.c.l.s8.bf16 %v220_v15  ;;  %v818_v22 = vunpack.c.h.s8.bf16 %v218_v14  ;;  %v820_v23 = vunpack.c.h.s8.bf16 %v220_v15 }
  0x31   :  { %1697 = vmatpush1.bf16.msra.mxu0 %v738_v18  ;;  %2025 = vmatpush1.bf16.msra.mxu1 %v740_v19  ;;  %v819_v18 = vunpack.c.h.s8.bf16 %v219_v8  ;;  %v821_v19 = vunpack.c.h.s8.bf16 %v221_v9 }
  0x32   :  { %1698 = vmatprep.subr.bf16.mxu0 %v747_v20  ;;  %2026 = vmatprep.subr.bf16.mxu1 %v749_v21  ;;  %v227_v20 = vld [vmem:[%s6117_s1 + $0x2c8] sm:$0xff]  ;;  %v229_v21 = vld [vmem:[%s6117_s1 + $0x2d8] sm:$0xff] }
  0x35   :  { %1699 = vmatpush1.bf16.msra.mxu0 %v746_v24  ;;  %2027 = vmatpush1.bf16.msra.mxu1 %v748_v25  ;;  %v827_v24 = vunpack.c.l.s8.bf16 %v227_v20  ;;  %v829_v25 = vunpack.c.l.s8.bf16 %v229_v21 }
  0x36   :  { %1700 = vmatprep.subr.bf16.mxu0 %v755_v26  ;;  %2028 = vmatprep.subr.bf16.mxu1 %v757_v27  ;;  %v226_v26 = vld [vmem:[%s6117_s1 + $0x2c0] sm:$0xff]  ;;  %v228_v27 = vld [vmem:[%s6117_s1 + $0x2d0] sm:$0xff] }
  0x37   :  { %v826_v28 = vunpack.c.l.s8.bf16 %v226_v26  ;;  %v828_v29 = vunpack.c.l.s8.bf16 %v228_v27  ;;  %v834_v34 = vunpack.c.h.s8.bf16 %v226_v26  ;;  %v836_v35 = vunpack.c.h.s8.bf16 %v228_v27 }
  0x39   :  { %1701 = vmatpush1.bf16.msra.mxu0 %v754_v30  ;;  %2029 = vmatpush1.bf16.msra.mxu1 %v756_v31  ;;  %v835_v30 = vunpack.c.h.s8.bf16 %v227_v20  ;;  %v837_v31 = vunpack.c.h.s8.bf16 %v229_v21 }
  0x3a   :  { %1702 = vmatprep.subr.bf16.mxu0 %v763_v32  ;;  %2030 = vmatprep.subr.bf16.mxu1 %v765_v33  ;;  %v235_v32 = vld [vmem:[%s6117_s1 + $0x308] sm:$0xff]  ;;  %v237_v33 = vld [vmem:[%s6117_s1 + $0x318] sm:$0xff] }
  0x3b   :  { %v843_v36 = vunpack.c.l.s8.bf16 %v235_v32  ;;  %v851_v45 = vunpack.c.h.s8.bf16 %v235_v32 }
  0x3d   :  { %1703 = vmatpush1.bf16.msra.mxu0 %v762_v37  ;;  %2031 = vmatpush1.bf16.msra.mxu1 %v764_v39  ;;  %v845_v37 = vunpack.c.l.s8.bf16 %v237_v33  ;;  %v234_v39 = vld [vmem:[%s6117_s1 + $0x300] sm:$0xff] }
  0x3e   :  { %1704 = vmatprep.subr.bf16.mxu0 %v771_v40  ;;  %2032 = vmatprep.subr.bf16.mxu1 %v773_v43  ;;  %v236_v40 = vld [vmem:[%s6117_s1 + $0x310] sm:$0xff]  ;;  %v842_v43 = vunpack.c.l.s8.bf16 %v234_v39 }
  0x3f   :  { %v844_v44 = vunpack.c.l.s8.bf16 %v236_v40  ;;  %v852_v51 = vunpack.c.h.s8.bf16 %v236_v40  ;;  %v277_v40 = vld [vmem:[%s6117_s1 + $0x458] sm:$0xff] }
  0x41   :  { %1705 = vmatpush1.bf16.msra.mxu0 %v770_v41  ;;  %2033 = vmatpush1.bf16.msra.mxu1 %v772_v47  ;;  %v853_v41 = vunpack.c.h.s8.bf16 %v237_v33  ;;  %v243_v47 = vld [vmem:[%s6117_s1 + $0x348] sm:$0xff]  ;;  %v4199_v33 = vpack.c.bf16 %v4070_v46, %v4070_v46 }
  0x42   :  { %1715 = vmatprep.subr.bf16.mxu0 %v779_v48  ;;  %2043 = vmatprep.subr.bf16.mxu1 %v781_v50  ;;  %v245_v48 = vld [vmem:[%s6117_s1 + $0x358] sm:$0xff]  ;;  %v850_v50 = vunpack.c.h.s8.bf16 %v234_v39  ;;  %v859_v52 = vunpack.c.l.s8.bf16 %v243_v47  ;;  %v867_v60 = vunpack.c.h.s8.bf16 %v243_v47  ;;  %v275_v39 = vld [vmem:[%s6117_s1 + $0x448] sm:$0xff]  ;;  %v274_v47 = vld [vmem:[%s6117_s1 + $0x440] sm:$0xff] }
  0x43   :  { %v861_v53 = vunpack.c.l.s8.bf16 %v245_v48  ;;  %v869_v61 = vunpack.c.h.s8.bf16 %v245_v48  ;;  %v276_v48 = vld [vmem:[%s6117_s1 + $0x450] sm:$0xff] }
  0x44   :  { %1707 = vmatmul.mubr.bf16.vlgmr.msra.gmra.mrb[0].mxu0 %v4082_v54  ;;  %2035 = vmatmul.mubr.bf16.vlgmr.msra.gmra.mrb[0].mxu1 %v4082_v54 }
  0x45   :  { %1716 = vmatpush1.bf16.msra.mxu0 %v778_v56  ;;  %2044 = vmatpush1.bf16.msra.mxu1 %v780_v57  ;;  %v242_v56 = vld [vmem:[%s6117_s1 + $0x340] sm:$0xff]  ;;  %v244_v57 = vld [vmem:[%s6117_s1 + $0x350] sm:$0xff] }
  0x46   :  { %1717 = vmatprep.subr.bf16.mxu0 %v787_v58  ;;  %2045 = vmatprep.subr.bf16.mxu1 %v789_v59  ;;  %v858_v58 = vunpack.c.l.s8.bf16 %v242_v56  ;;  %v860_v59 = vunpack.c.l.s8.bf16 %v244_v57 }
  0x47   :  { %1747 = vmatprep.mubr.bf16.mxu0 %v4090_v62  ;;  %2075 = vmatprep.mubr.bf16.mxu1 %v4090_v62 }
  0x49   :  { %1718 = vmatpush1.bf16.msra.mxu0 %v786_v49  ;;  %2046 = vmatpush1.bf16.msra.mxu1 %v788_v63  ;;  %v251_v49 = vld [vmem:[%s6117_s1 + $0x388] sm:$0xff]  ;;  %v253_v63 = vld [vmem:[%s6117_s1 + $0x398] sm:$0xff] }
  0x4a   :  { %1719 = vmatprep.subr.bf16.mxu0 %v795_v0  ;;  %2047 = vmatprep.subr.bf16.mxu1 %v797_v1  ;;  %v866_v0 = vunpack.c.h.s8.bf16 %v242_v56  ;;  %v868_v1 = vunpack.c.h.s8.bf16 %v244_v57  ;;  %v875_v2 = vunpack.c.l.s8.bf16 %v251_v49  ;;  %v877_v3 = vunpack.c.l.s8.bf16 %v253_v63  ;;  %v283_v56 = vld [vmem:[%s6117_s1 + $0x488] sm:$0xff]  ;;  %v285_v57 = vld [vmem:[%s6117_s1 + $0x498] sm:$0xff] }
  0x4b   :  { %v883_v8 = vunpack.c.h.s8.bf16 %v251_v49  ;;  %v885_v9 = vunpack.c.h.s8.bf16 %v253_v63  ;;  %v282_v49 = vld [vmem:[%s6117_s1 + $0x480] sm:$0xff]  ;;  %v284_v63 = vld [vmem:[%s6117_s1 + $0x490] sm:$0xff] }
  0x4d   :  { %1720 = vmatpush1.bf16.msra.mxu0 %v794_v4  ;;  %2048 = vmatpush1.bf16.msra.mxu1 %v796_v5  ;;  %v250_v4 = vld [vmem:[%s6117_s1 + $0x380] sm:$0xff]  ;;  %v252_v5 = vld [vmem:[%s6117_s1 + $0x390] sm:$0xff] }
  0x4e   :  { %1721 = vmatprep.subr.bf16.mxu0 %v803_v6  ;;  %2049 = vmatprep.subr.bf16.mxu1 %v805_v7  ;;  %v874_v6 = vunpack.c.l.s8.bf16 %v250_v4  ;;  %v876_v7 = vunpack.c.l.s8.bf16 %v252_v5 }
  0x51   :  { %1722 = vmatpush1.bf16.msra.mxu0 %v802_v10  ;;  %2050 = vmatpush1.bf16.msra.mxu1 %v804_v11  ;;  %v259_v10 = vld [vmem:[%s6117_s1 + $0x3c8] sm:$0xff]  ;;  %v261_v11 = vld [vmem:[%s6117_s1 + $0x3d8] sm:$0xff] }
  0x52   :  { %1723 = vmatprep.subr.bf16.mxu0 %v811_v12  ;;  %2051 = vmatprep.subr.bf16.mxu1 %v813_v13  ;;  %v882_v12 = vunpack.c.h.s8.bf16 %v250_v4  ;;  %v884_v13 = vunpack.c.h.s8.bf16 %v252_v5  ;;  %v891_v14 = vunpack.c.l.s8.bf16 %v259_v10  ;;  %v893_v15 = vunpack.c.l.s8.bf16 %v261_v11  ;;  %v291_v4 = vld [vmem:[%s6117_s1 + $0x4c8] sm:$0xff]  ;;  %v293_v5 = vld [vmem:[%s6117_s1 + $0x4d8] sm:$0xff] }
  0x53   :  { %v899_v21 = vunpack.c.h.s8.bf16 %v259_v10  ;;  %v290_v10 = vld [vmem:[%s6117_s1 + $0x4c0] sm:$0xff] }
  0x55   :  { %1724 = vmatpush1.bf16.msra.mxu0 %v810_v16  ;;  %2052 = vmatpush1.bf16.msra.mxu1 %v812_v17  ;;  %v258_v16 = vld [vmem:[%s6117_s1 + $0x3c0] sm:$0xff]  ;;  %v260_v17 = vld [vmem:[%s6117_s1 + $0x3d0] sm:$0xff] }
  0x56   :  { %1725 = vmatprep.subr.bf16.mxu0 %v819_v18  ;;  %2053 = vmatprep.subr.bf16.mxu1 %v821_v19  ;;  %v4177_v18 = vld [vmem:[%s6118_s0 + $0x8] sm:$0xff]  ;;  %v890_v19 = vunpack.c.l.s8.bf16 %v258_v16  ;;  %v892_v20 = vunpack.c.l.s8.bf16 %v260_v17  ;;  %v898_v26 = vunpack.c.h.s8.bf16 %v258_v16  ;;  %v900_v27 = vunpack.c.h.s8.bf16 %v260_v17  ;;  %v301_v17 = vld [vmem:[%s6117_s1 + $0x518] sm:$0xff] }
  0x57   :  { %v299_v16 = vld [vmem:[%s6117_s1 + $0x508] sm:$0xff] }
  0x59   :  { %1726 = vmatpush1.bf16.msra.mxu0 %v818_v22  ;;  %2054 = vmatpush1.bf16.msra.mxu1 %v820_v23  ;;  %v901_v22 = vunpack.c.h.s8.bf16 %v261_v11  ;;  %v267_v23 = vld [vmem:[%s6117_s1 + $0x408] sm:$0xff]  ;;  %v292_v11 = vld [vmem:[%s6117_s1 + $0x4d0] sm:$0xff] }
  0x5a   :  { %1727 = vmatprep.subr.bf16.mxu0 %v827_v24  ;;  %2055 = vmatprep.subr.bf16.mxu1 %v829_v25  ;;  %v269_v24 = vld [vmem:[%s6117_s1 + $0x418] sm:$0xff]  ;;  %v4187_v25 = vrot.slane %v4177_v18, %v3995_v42 }
  0x5c   :  { %v70_v32 = vcombine.high %v4187_v25, %v4187_v25 }
  0x5d   :  { %1728 = vmatpush1.bf16.msra.mxu0 %v826_v28  ;;  %2056 = vmatpush1.bf16.msra.mxu1 %v828_v29  ;;  %v907_v28 = vunpack.c.l.s8.bf16 %v267_v23  ;;  %v909_v29 = vunpack.c.l.s8.bf16 %v269_v24 }
  0x5e   :  { %1729 = vmatprep.subr.bf16.mxu0 %v835_v30  ;;  %2057 = vmatprep.subr.bf16.mxu1 %v837_v31  ;;  %v266_v30 = vld [vmem:[%s6117_s1 + $0x400] sm:$0xff]  ;;  %v268_v31 = vld [vmem:[%s6117_s1 + $0x410] sm:$0xff] }
  0x5f   :  { %v914_v46 = vunpack.c.h.s8.bf16 %v266_v30 }
  0x61   :  { %1730 = vmatpush1.bf16.msra.mxu0 %v834_v34  ;;  %2058 = vmatpush1.bf16.msra.mxu1 %v836_v35  ;;  %v906_v34 = vunpack.c.l.s8.bf16 %v266_v30  ;;  %v908_v35 = vunpack.c.l.s8.bf16 %v268_v31  ;;  %v307_v30 = vld [vmem:[%s6117_s1 + $0x548] sm:$0xff] }
  0x62   :  { %1731 = vmatprep.subr.bf16.mxu0 %v843_v36  ;;  %2059 = vmatprep.subr.bf16.mxu1 %v845_v37  ;;  %v915_v36 = vunpack.c.h.s8.bf16 %v267_v23  ;;  %v917_v37 = vunpack.c.h.s8.bf16 %v269_v24  ;;  %v298_v23 = vld [vmem:[%s6117_s1 + $0x500] sm:$0xff]  ;;  %v300_v24 = vld [vmem:[%s6117_s1 + $0x510] sm:$0xff] }
  0x65   :  { %1732 = vmatpush1.bf16.msra.mxu0 %v842_v43  ;;  %2060 = vmatpush1.bf16.msra.mxu1 %v844_v44  ;;  %v4207_v43 = vpack.c.bf16 %v70_v32, %v70_v32  ;;  %v916_v44 = vunpack.c.h.s8.bf16 %v268_v31  ;;  %v309_v31 = vld [vmem:[%s6117_s1 + $0x558] sm:$0xff]  ;;  %v978_v32 = vunpack.c.h.s8.bf16 %v298_v23 }
  0x66   :  { %1733 = vmatprep.subr.bf16.mxu0 %v851_v45  ;;  %2061 = vmatprep.subr.bf16.mxu1 %v853_v41  ;;  %v923_v45 = vunpack.c.l.s8.bf16 %v275_v39  ;;  %v925_v41 = vunpack.c.l.s8.bf16 %v277_v40 }
  0x69   :  { %1734 = vmatpush1.bf16.msra.mxu0 %v850_v50  ;;  %2062 = vmatpush1.bf16.msra.mxu1 %v852_v51  ;;  %v922_v50 = vunpack.c.l.s8.bf16 %v274_v47  ;;  %v924_v51 = vunpack.c.l.s8.bf16 %v276_v48 }
  0x6a   :  { %1735 = vmatprep.subr.bf16.mxu0 %v859_v52  ;;  %2063 = vmatprep.subr.bf16.mxu1 %v861_v53  ;;  %v931_v52 = vunpack.c.h.s8.bf16 %v275_v39  ;;  %v933_v53 = vunpack.c.h.s8.bf16 %v277_v40  ;;  %v308_v39 = vld [vmem:[%s6117_s1 + $0x550] sm:$0xff] }
  0x6d   :  { %1736 = vmatpush1.bf16.msra.mxu0 %v858_v58  ;;  %2064 = vmatpush1.bf16.msra.mxu1 %v860_v59  ;;  %v930_v58 = vunpack.c.h.s8.bf16 %v274_v47  ;;  %v932_v59 = vunpack.c.h.s8.bf16 %v276_v48  ;;  %v317_v47 = vld [vmem:[%s6117_s1 + $0x598] sm:$0xff] }
  0x6e   :  { %1737 = vmatprep.subr.bf16.mxu0 %v867_v60  ;;  %2065 = vmatprep.subr.bf16.mxu1 %v869_v61  ;;  %v939_v60 = vunpack.c.l.s8.bf16 %v283_v56  ;;  %v941_v61 = vunpack.c.l.s8.bf16 %v285_v57 }
  0x71   :  { %1738 = vmatpush1.bf16.msra.mxu0 %v866_v0  ;;  %2066 = vmatpush1.bf16.msra.mxu1 %v868_v1  ;;  %v938_v0 = vunpack.c.l.s8.bf16 %v282_v49  ;;  %v940_v1 = vunpack.c.l.s8.bf16 %v284_v63 }
  0x72   :  { %1739 = vmatprep.subr.bf16.mxu0 %v875_v2  ;;  %2067 = vmatprep.subr.bf16.mxu1 %v877_v3  ;;  %v947_v2 = vunpack.c.h.s8.bf16 %v283_v56  ;;  %v949_v3 = vunpack.c.h.s8.bf16 %v285_v57  ;;  %v316_v56 = vld [vmem:[%s6117_s1 + $0x590] sm:$0xff] }
  0x75   :  { %1740 = vmatpush1.bf16.msra.mxu0 %v874_v6  ;;  %2068 = vmatpush1.bf16.msra.mxu1 %v876_v7  ;;  %v946_v6 = vunpack.c.h.s8.bf16 %v282_v49  ;;  %v948_v7 = vunpack.c.h.s8.bf16 %v284_v63  ;;  %v325_v49 = vld [vmem:[%s6117_s1 + $0x5d8] sm:$0xff] }
  0x76   :  { %1741 = vmatprep.subr.bf16.mxu0 %v883_v8  ;;  %2069 = vmatprep.subr.bf16.mxu1 %v885_v9  ;;  %v955_v8 = vunpack.c.l.s8.bf16 %v291_v4  ;;  %v957_v9 = vunpack.c.l.s8.bf16 %v293_v5 }
  0x79   :  { %1742 = vmatpush1.bf16.msra.mxu0 %v882_v12  ;;  %2070 = vmatpush1.bf16.msra.mxu1 %v884_v13  ;;  %v954_v12 = vunpack.c.l.s8.bf16 %v290_v10  ;;  %v956_v13 = vunpack.c.l.s8.bf16 %v292_v11 }
  0x7a   :  { %1743 = vmatprep.subr.bf16.mxu0 %v891_v14  ;;  %2071 = vmatprep.subr.bf16.mxu1 %v893_v15  ;;  %v963_v14 = vunpack.c.h.s8.bf16 %v291_v4  ;;  %v965_v15 = vunpack.c.h.s8.bf16 %v293_v5  ;;  %v324_v4 = vld [vmem:[%s6117_s1 + $0x5d0] sm:$0xff]  ;;  %v55_v5 = vcombine.high %v4177_v18, %v4177_v18 }
  0x7d   :  { %1744 = vmatpush1.bf16.msra.mxu0 %v890_v19  ;;  %2072 = vmatpush1.bf16.msra.mxu1 %v892_v20  ;;  %v962_v19 = vunpack.c.h.s8.bf16 %v290_v10  ;;  %v964_v20 = vunpack.c.h.s8.bf16 %v292_v11  ;;  %v331_v10 = vld [vmem:[%s6117_s1 + $0x608] sm:$0xff]  ;;  %v333_v11 = vld [vmem:[%s6117_s1 + $0x618] sm:$0xff] }
  0x7e   :  { %1745 = vmatprep.subr.bf16.mxu0 %v899_v21  ;;  %2073 = vmatprep.subr.bf16.mxu1 %v901_v22  ;;  %v971_v21 = vunpack.c.l.s8.bf16 %v299_v16  ;;  %v973_v22 = vunpack.c.l.s8.bf16 %v301_v17 }
  0x81   :  { %1746 = vmatpush1.bf16.msra.mxu0 %v898_v26  ;;  %2074 = vmatpush1.bf16.msra.mxu1 %v900_v27  ;;  %v970_v26 = vunpack.c.l.s8.bf16 %v298_v23  ;;  %v972_v27 = vunpack.c.l.s8.bf16 %v300_v24  ;;  %v1043_v23 = vunpack.c.h.s8.bf16 %v331_v10 }
  0x82   :  { %1756 = vmatprep.subr.bf16.mxu0 %v907_v28  ;;  %2084 = vmatprep.subr.bf16.mxu1 %v909_v29  ;;  %v979_v28 = vunpack.c.h.s8.bf16 %v299_v16  ;;  %v981_v29 = vunpack.c.h.s8.bf16 %v301_v17  ;;  %v330_v16 = vld [vmem:[%s6117_s1 + $0x600] sm:$0xff]  ;;  %v332_v17 = vld [vmem:[%s6117_s1 + $0x610] sm:$0xff] }
  0x84   :  { %1748 = vmatmul.mubr.bf16.vlgmr.msra.gmra.mrb[0].mxu0 %v4199_v33  ;;  %2076 = vmatmul.mubr.bf16.vlgmr.msra.gmra.mrb[0].mxu1 %v4199_v33 }
  0x85   :  { %1757 = vmatpush1.bf16.msra.mxu0 %v906_v34  ;;  %2085 = vmatpush1.bf16.msra.mxu1 %v908_v35  ;;  %v980_v34 = vunpack.c.h.s8.bf16 %v300_v24  ;;  %v987_v35 = vunpack.c.l.s8.bf16 %v307_v30  ;;  %v1045_v24 = vunpack.c.h.s8.bf16 %v333_v11 }
  0x86   :  { %1758 = vmatprep.subr.bf16.mxu0 %v915_v36  ;;  %2086 = vmatprep.subr.bf16.mxu1 %v917_v37  ;;  %v989_v36 = vunpack.c.l.s8.bf16 %v309_v31  ;;  %v306_v37 = vld [vmem:[%s6117_s1 + $0x540] sm:$0xff] }
  0x87   :  { %1788 = vmatprep.mubr.bf16.mxu0 %v4207_v43  ;;  %2116 = vmatprep.mubr.bf16.mxu1 %v4207_v43  ;;  %v986_v40 = vunpack.c.l.s8.bf16 %v306_v37  ;;  %v994_v48 = vunpack.c.h.s8.bf16 %v306_v37 }
  0x89   :  { %1759 = vmatpush1.bf16.msra.mxu0 %v914_v46  ;;  %2087 = vmatpush1.bf16.msra.mxu1 %v916_v44  ;;  %v988_v46 = vunpack.c.l.s8.bf16 %v308_v39  ;;  %v995_v44 = vunpack.c.h.s8.bf16 %v307_v30 }
  0x8a   :  { %1760 = vmatprep.subr.bf16.mxu0 %v923_v45  ;;  %2088 = vmatprep.subr.bf16.mxu1 %v925_v41  ;;  %v997_v45 = vunpack.c.h.s8.bf16 %v309_v31  ;;  %v315_v41 = vld [vmem:[%s6117_s1 + $0x588] sm:$0xff] }
  0x8d   :  { %1761 = vmatpush1.bf16.msra.mxu0 %v922_v50  ;;  %2089 = vmatpush1.bf16.msra.mxu1 %v924_v51  ;;  %v996_v50 = vunpack.c.h.s8.bf16 %v308_v39  ;;  %v1003_v51 = vunpack.c.l.s8.bf16 %v315_v41 }
  0x8e   :  { %1762 = vmatprep.subr.bf16.mxu0 %v931_v52  ;;  %2090 = vmatprep.subr.bf16.mxu1 %v933_v53  ;;  %v1005_v52 = vunpack.c.l.s8.bf16 %v317_v47  ;;  %v314_v53 = vld [vmem:[%s6117_s1 + $0x580] sm:$0xff] }
  0x8f   :  { %v1002_v57 = vunpack.c.l.s8.bf16 %v314_v53  ;;  %v1010_v63 = vunpack.c.h.s8.bf16 %v314_v53 }
  0x91   :  { %1763 = vmatpush1.bf16.msra.mxu0 %v930_v58  ;;  %2091 = vmatpush1.bf16.msra.mxu1 %v932_v59  ;;  %v1004_v58 = vunpack.c.l.s8.bf16 %v316_v56  ;;  %v1011_v59 = vunpack.c.h.s8.bf16 %v315_v41 }
  0x92   :  { %1764 = vmatprep.subr.bf16.mxu0 %v939_v60  ;;  %2092 = vmatprep.subr.bf16.mxu1 %v941_v61  ;;  %v1013_v60 = vunpack.c.h.s8.bf16 %v317_v47  ;;  %v323_v61 = vld [vmem:[%s6117_s1 + $0x5c8] sm:$0xff] }
  0x95   :  { %1765 = vmatpush1.bf16.msra.mxu0 %v938_v0  ;;  %2093 = vmatpush1.bf16.msra.mxu1 %v940_v1  ;;  %v1012_v0 = vunpack.c.h.s8.bf16 %v316_v56  ;;  %v1019_v1 = vunpack.c.l.s8.bf16 %v323_v61 }
  0x96   :  { %1766 = vmatprep.subr.bf16.mxu0 %v947_v2  ;;  %2094 = vmatprep.subr.bf16.mxu1 %v949_v3  ;;  %v1021_v2 = vunpack.c.l.s8.bf16 %v325_v49  ;;  %v322_v3 = vld [vmem:[%s6117_s1 + $0x5c0] sm:$0xff] }
  0x97   :  { %v1026_v18 = vunpack.c.h.s8.bf16 %v322_v3 }
  0x99   :  { %1767 = vmatpush1.bf16.msra.mxu0 %v946_v6  ;;  %2095 = vmatpush1.bf16.msra.mxu1 %v948_v7  ;;  %v1018_v6 = vunpack.c.l.s8.bf16 %v322_v3  ;;  %v1020_v7 = vunpack.c.l.s8.bf16 %v324_v4 }
  0x9a   :  { %1768 = vmatprep.subr.bf16.mxu0 %v955_v8  ;;  %2096 = vmatprep.subr.bf16.mxu1 %v957_v9  ;;  %v1027_v8 = vunpack.c.h.s8.bf16 %v323_v61  ;;  %v1029_v9 = vunpack.c.h.s8.bf16 %v325_v49 }
  0x9d   :  { %1769 = vmatpush1.bf16.msra.mxu0 %v954_v12  ;;  %2097 = vmatpush1.bf16.msra.mxu1 %v956_v13  ;;  %v4300_v12 = vrot.slane %v55_v5, %v3995_v42  ;;  %v1028_v13 = vunpack.c.h.s8.bf16 %v324_v4  ;;  %v363_v5 = vld [vmem:[%s6117_s1 + $0x708] sm:$0xff] }
  0x9e   :  { %1770 = vmatprep.subr.bf16.mxu0 %v963_v14  ;;  %2098 = vmatprep.subr.bf16.mxu1 %v965_v15  ;;  %v1035_v14 = vunpack.c.l.s8.bf16 %v331_v10  ;;  %v1037_v15 = vunpack.c.l.s8.bf16 %v333_v11  ;;  %v362_v11 = vld [vmem:[%s6117_s1 + $0x700] sm:$0xff] }
  0xa1   :  { %1771 = vmatpush1.bf16.msra.mxu0 %v962_v19  ;;  %2099 = vmatpush1.bf16.msra.mxu1 %v964_v20  ;;  %v71_v19 = vcombine.high %v4300_v12, %v4300_v12  ;;  %v4312_v20 = vpack.c.bf16 %v4187_v25, %v4187_v25  ;;  %v1042_v25 = vunpack.c.h.s8.bf16 %v330_v16 }
  0xa2   :  { %1772 = vmatprep.subr.bf16.mxu0 %v971_v21  ;;  %2100 = vmatprep.subr.bf16.mxu1 %v973_v22  ;;  %v1034_v21 = vunpack.c.l.s8.bf16 %v330_v16  ;;  %v1036_v22 = vunpack.c.l.s8.bf16 %v332_v17 }
  0xa5   :  { %1773 = vmatpush1.bf16.msra.mxu0 %v970_v26  ;;  %2101 = vmatpush1.bf16.msra.mxu1 %v972_v27  ;;  %v339_v26 = vld [vmem:[%s6117_s1 + $0x648] sm:$0xff]  ;;  %v341_v27 = vld [vmem:[%s6117_s1 + $0x658] sm:$0xff] }
  0xa6   :  { %1774 = vmatprep.subr.bf16.mxu0 %v979_v28  ;;  %2102 = vmatprep.subr.bf16.mxu1 %v981_v29  ;;  %v4320_v28 = vpack.c.bf16 %v71_v19, %v71_v19  ;;  %v1044_v29 = vunpack.c.h.s8.bf16 %v332_v17  ;;  %v1051_v30 = vunpack.c.l.s8.bf16 %v339_v26  ;;  %v1053_v31 = vunpack.c.l.s8.bf16 %v341_v27  ;;  %v371_v17 = vld [vmem:[%s6117_s1 + $0x748] sm:$0xff]  ;;  %v373_v19 = vld [vmem:[%s6117_s1 + $0x758] sm:$0xff] }
  0xa7   :  { %v1059_v37 = vunpack.c.h.s8.bf16 %v339_v26  ;;  %v1061_v39 = vunpack.c.h.s8.bf16 %v341_v27  ;;  %v370_v26 = vld [vmem:[%s6117_s1 + $0x740] sm:$0xff]  ;;  %v372_v27 = vld [vmem:[%s6117_s1 + $0x750] sm:$0xff] }
  0xa9   :  { %1775 = vmatpush1.bf16.msra.mxu0 %v978_v32  ;;  %2103 = vmatpush1.bf16.msra.mxu1 %v980_v34  ;;  %v338_v32 = vld [vmem:[%s6117_s1 + $0x640] sm:$0xff]  ;;  %v340_v34 = vld [vmem:[%s6117_s1 + $0x650] sm:$0xff] }
  0xaa   :  { %1776 = vmatprep.subr.bf16.mxu0 %v987_v35  ;;  %2104 = vmatprep.subr.bf16.mxu1 %v989_v36  ;;  %v1050_v35 = vunpack.c.l.s8.bf16 %v338_v32  ;;  %v1052_v36 = vunpack.c.l.s8.bf16 %v340_v34 }
  0xad   :  { %1777 = vmatpush1.bf16.msra.mxu0 %v986_v40  ;;  %2105 = vmatpush1.bf16.msra.mxu1 %v988_v46  ;;  %v347_v40 = vld [vmem:[%s6117_s1 + $0x688] sm:$0xff]  ;;  %v349_v46 = vld [vmem:[%s6117_s1 + $0x698] sm:$0xff] }
  0xae   :  { %1778 = vmatprep.subr.bf16.mxu0 %v995_v44  ;;  %2106 = vmatprep.subr.bf16.mxu1 %v997_v45  ;;  %v1058_v44 = vunpack.c.h.s8.bf16 %v338_v32  ;;  %v1060_v45 = vunpack.c.h.s8.bf16 %v340_v34  ;;  %v1067_v41 = vunpack.c.l.s8.bf16 %v347_v40  ;;  %v1069_v47 = vunpack.c.l.s8.bf16 %v349_v46  ;;  %v379_v32 = vld [vmem:[%s6117_s1 + $0x788] sm:$0xff]  ;;  %v381_v34 = vld [vmem:[%s6117_s1 + $0x798] sm:$0xff] }
  0xaf   :  { %v1075_v53 = vunpack.c.h.s8.bf16 %v347_v40  ;;  %v1077_v56 = vunpack.c.h.s8.bf16 %v349_v46  ;;  %v378_v40 = vld [vmem:[%s6117_s1 + $0x780] sm:$0xff]  ;;  %v380_v46 = vld [vmem:[%s6117_s1 + $0x790] sm:$0xff] }
  0xb1   :  { %1779 = vmatpush1.bf16.msra.mxu0 %v994_v48  ;;  %2107 = vmatpush1.bf16.msra.mxu1 %v996_v50  ;;  %v346_v48 = vld [vmem:[%s6117_s1 + $0x680] sm:$0xff]  ;;  %v348_v50 = vld [vmem:[%s6117_s1 + $0x690] sm:$0xff] }
  0xb2   :  { %1780 = vmatprep.subr.bf16.mxu0 %v1003_v51  ;;  %2108 = vmatprep.subr.bf16.mxu1 %v1005_v52  ;;  %v1066_v51 = vunpack.c.l.s8.bf16 %v346_v48  ;;  %v1068_v52 = vunpack.c.l.s8.bf16 %v348_v50 }
  0xb5   :  { %1781 = vmatpush1.bf16.msra.mxu0 %v1002_v57  ;;  %2109 = vmatpush1.bf16.msra.mxu1 %v1004_v58  ;;  %v355_v57 = vld [vmem:[%s6117_s1 + $0x6c8] sm:$0xff]  ;;  %v357_v58 = vld [vmem:[%s6117_s1 + $0x6d8] sm:$0xff] }
  0xb6   :  { %1782 = vmatprep.subr.bf16.mxu0 %v1011_v59  ;;  %2110 = vmatprep.subr.bf16.mxu1 %v1013_v60  ;;  %v1074_v59 = vunpack.c.h.s8.bf16 %v346_v48  ;;  %v1076_v60 = vunpack.c.h.s8.bf16 %v348_v50  ;;  %v1083_v61 = vunpack.c.l.s8.bf16 %v355_v57  ;;  %v1085_v49 = vunpack.c.l.s8.bf16 %v357_v58  ;;  %v387_v48 = vld [vmem:[%s6117_s1 + $0x7c8] sm:$0xff]  ;;  %v389_v50 = vld [vmem:[%s6117_s1 + $0x7d8] sm:$0xff] }
  0xb7   :  { %v1091_v3 = vunpack.c.h.s8.bf16 %v355_v57  ;;  %v1093_v4 = vunpack.c.h.s8.bf16 %v357_v58  ;;  %v386_v57 = vld [vmem:[%s6117_s1 + $0x7c0] sm:$0xff]  ;;  %v388_v58 = vld [vmem:[%s6117_s1 + $0x7d0] sm:$0xff] }
  0xb9   :  { %1783 = vmatpush1.bf16.msra.mxu0 %v1010_v63  ;;  %2111 = vmatpush1.bf16.msra.mxu1 %v1012_v0  ;;  %v354_v63 = vld [vmem:[%s6117_s1 + $0x6c0] sm:$0xff]  ;;  %v356_v0 = vld [vmem:[%s6117_s1 + $0x6d0] sm:$0xff] }
  0xba   :  { %1784 = vmatprep.subr.bf16.mxu0 %v1019_v1  ;;  %2112 = vmatprep.subr.bf16.mxu1 %v1021_v2  ;;  %v1082_v1 = vunpack.c.l.s8.bf16 %v354_v63  ;;  %v1084_v2 = vunpack.c.l.s8.bf16 %v356_v0 }
  0xbd   :  { %1785 = vmatpush1.bf16.msra.mxu0 %v1018_v6  ;;  %2113 = vmatpush1.bf16.msra.mxu1 %v1020_v7  ;;  %v365_v6 = vld [vmem:[%s6117_s1 + $0x718] sm:$0xff]  ;;  %v1090_v7 = vunpack.c.h.s8.bf16 %v354_v63  ;;  %v1157_v63 = vunpack.c.h.s8.bf16 %v389_v50 }
  0xbe   :  { %1786 = vmatprep.subr.bf16.mxu0 %v1027_v8  ;;  %2114 = vmatprep.subr.bf16.mxu1 %v1029_v9  ;;  %v1092_v8 = vunpack.c.h.s8.bf16 %v356_v0  ;;  %v1099_v9 = vunpack.c.l.s8.bf16 %v363_v5  ;;  %v1101_v10 = vunpack.c.l.s8.bf16 %v365_v6  ;;  %v1109_v16 = vunpack.c.h.s8.bf16 %v365_v6  ;;  %v395_v0 = vld [vmem:[%s6117_s1 + $0x808] sm:$0xff] }
  0xc1   :  { %1787 = vmatpush1.bf16.msra.mxu0 %v1026_v18  ;;  %2115 = vmatpush1.bf16.msra.mxu1 %v1028_v13  ;;  %v364_v18 = vld [vmem:[%s6117_s1 + $0x710] sm:$0xff]  ;;  %v1098_v13 = vunpack.c.l.s8.bf16 %v362_v11 }
  0xc2   :  { %1797 = vmatprep.subr.bf16.mxu0 %v1035_v14  ;;  %2125 = vmatprep.subr.bf16.mxu1 %v1037_v15  ;;  %v1100_v14 = vunpack.c.l.s8.bf16 %v364_v18  ;;  %v1107_v15 = vunpack.c.h.s8.bf16 %v363_v5  ;;  %v1163_v5 = vunpack.c.l.s8.bf16 %v395_v0 }
  0xc4   :  { %1789 = vmatmul.mubr.bf16.vlgmr.msra.gmra.mrb[0].mxu0 %v4312_v20  ;;  %2117 = vmatmul.mubr.bf16.vlgmr.msra.gmra.mrb[0].mxu1 %v4312_v20 }
  0xc5   :  { %1798 = vmatpush1.bf16.msra.mxu0 %v1034_v21  ;;  %2126 = vmatpush1.bf16.msra.mxu1 %v1036_v22  ;;  %v1106_v21 = vunpack.c.h.s8.bf16 %v362_v11  ;;  %v1108_v22 = vunpack.c.h.s8.bf16 %v364_v18 }
  0xc6   :  { %1799 = vmatprep.subr.bf16.mxu0 %v1043_v23  ;;  %2127 = vmatprep.subr.bf16.mxu1 %v1045_v24  ;;  %v1115_v23 = vunpack.c.l.s8.bf16 %v371_v17  ;;  %v1117_v24 = vunpack.c.l.s8.bf16 %v373_v19 }
  0xc7   :  { %1829 = vmatprep.mubr.bf16.mxu0 %v4320_v28  ;;  %2157 = vmatprep.mubr.bf16.mxu1 %v4320_v28 }
  0xc9   :  { %1800 = vmatpush1.bf16.msra.mxu0 %v1042_v25  ;;  %2128 = vmatpush1.bf16.msra.mxu1 %v1044_v29  ;;  %v1114_v25 = vunpack.c.l.s8.bf16 %v370_v26  ;;  %v1116_v29 = vunpack.c.l.s8.bf16 %v372_v27 }
  0xca   :  { %1801 = vmatprep.subr.bf16.mxu0 %v1051_v30  ;;  %2129 = vmatprep.subr.bf16.mxu1 %v1053_v31  ;;  %v1123_v30 = vunpack.c.h.s8.bf16 %v371_v17  ;;  %v1125_v31 = vunpack.c.h.s8.bf16 %v373_v19 }
  0xcd   :  { %1802 = vmatpush1.bf16.msra.mxu0 %v1050_v35  ;;  %2130 = vmatpush1.bf16.msra.mxu1 %v1052_v36  ;;  %v1122_v35 = vunpack.c.h.s8.bf16 %v370_v26  ;;  %v1124_v36 = vunpack.c.h.s8.bf16 %v372_v27 }
  0xce   :  { %1803 = vmatprep.subr.bf16.mxu0 %v1059_v37  ;;  %2131 = vmatprep.subr.bf16.mxu1 %v1061_v39  ;;  %v1131_v37 = vunpack.c.l.s8.bf16 %v379_v32  ;;  %v1133_v39 = vunpack.c.l.s8.bf16 %v381_v34 }
  0xd1   :  { %1804 = vmatpush1.bf16.msra.mxu0 %v1058_v44  ;;  %2132 = vmatpush1.bf16.msra.mxu1 %v1060_v45  ;;  %v1130_v44 = vunpack.c.l.s8.bf16 %v378_v40  ;;  %v1132_v45 = vunpack.c.l.s8.bf16 %v380_v46 }
  0xd2   :  { %1805 = vmatprep.subr.bf16.mxu0 %v1067_v41  ;;  %2133 = vmatprep.subr.bf16.mxu1 %v1069_v47  ;;  %v1139_v41 = vunpack.c.h.s8.bf16 %v379_v32  ;;  %v1141_v47 = vunpack.c.h.s8.bf16 %v381_v34 }
  0xd5   :  { %1806 = vmatpush1.bf16.msra.mxu0 %v1066_v51  ;;  %2134 = vmatpush1.bf16.msra.mxu1 %v1068_v52  ;;  %v1138_v51 = vunpack.c.h.s8.bf16 %v378_v40  ;;  %v1140_v52 = vunpack.c.h.s8.bf16 %v380_v46 }
  0xd6   :  { %1807 = vmatprep.subr.bf16.mxu0 %v1075_v53  ;;  %2135 = vmatprep.subr.bf16.mxu1 %v1077_v56  ;;  %v1147_v53 = vunpack.c.l.s8.bf16 %v387_v48  ;;  %v1149_v56 = vunpack.c.l.s8.bf16 %v389_v50 }
  0xd9   :  { %1808 = vmatpush1.bf16.msra.mxu0 %v1074_v59  ;;  %2136 = vmatpush1.bf16.msra.mxu1 %v1076_v60  ;;  %v4407_v59 = vld [vmem:[%s6118_s0 + $0x10] sm:$0xff]  ;;  %v1146_v60 = vunpack.c.l.s8.bf16 %v386_v57 }
  0xda   :  { %1809 = vmatprep.subr.bf16.mxu0 %v1083_v61  ;;  %2137 = vmatprep.subr.bf16.mxu1 %v1085_v49  ;;  %v1148_v61 = vunpack.c.l.s8.bf16 %v388_v58  ;;  %v1155_v49 = vunpack.c.h.s8.bf16 %v387_v48 }
  0xdd   :  { %1810 = vmatpush1.bf16.msra.mxu0 %v1082_v1  ;;  %2138 = vmatpush1.bf16.msra.mxu1 %v1084_v2  ;;  %v397_v1 = vld [vmem:[%s6117_s1 + $0x818] sm:$0xff]  ;;  %v4417_v2 = vrot.slane %v4407_v59, %v3995_v42 }
  0xde   :  { %1811 = vmatprep.subr.bf16.mxu0 %v1091_v3  ;;  %2139 = vmatprep.subr.bf16.mxu1 %v1093_v4  ;;  %v1154_v3 = vunpack.c.h.s8.bf16 %v386_v57  ;;  %v1156_v4 = vunpack.c.h.s8.bf16 %v388_v58  ;;  %v1165_v6 = vunpack.c.l.s8.bf16 %v397_v1 }
  0xe1   :  { %1812 = vmatpush1.bf16.msra.mxu0 %v1090_v7  ;;  %2140 = vmatpush1.bf16.msra.mxu1 %v1092_v8  ;;  %v394_v7 = vld [vmem:[%s6117_s1 + $0x800] sm:$0xff]  ;;  %v396_v8 = vld [vmem:[%s6117_s1 + $0x810] sm:$0xff] }
  0xe2   :  { %1813 = vmatprep.subr.bf16.mxu0 %v1099_v9  ;;  %2141 = vmatprep.subr.bf16.mxu1 %v1101_v10  ;;  %v87_v9 = vcombine.high %v4417_v2, %v4417_v2  ;;  %v4429_v10 = vpack.c.bf16 %v4300_v12, %v4300_v12  ;;  %v1162_v11 = vunpack.c.l.s8.bf16 %v394_v7  ;;  %v1164_v18 = vunpack.c.l.s8.bf16 %v396_v8 }
  0xe3   :  { %v1170_v12 = vunpack.c.h.s8.bf16 %v394_v7  ;;  %v1172_v19 = vunpack.c.h.s8.bf16 %v396_v8 }
  0xe4   :  { %v4437_v17 = vpack.c.bf16 %v87_v9, %v87_v9 }
  0xe5   :  { %1814 = vmatpush1.bf16.msra.mxu0 %v1098_v13  ;;  %2142 = vmatpush1.bf16.msra.mxu1 %v1100_v14  ;;  %v1171_v13 = vunpack.c.h.s8.bf16 %v395_v0  ;;  %v1173_v14 = vunpack.c.h.s8.bf16 %v397_v1 }
  0xe6   :  { %1815 = vmatprep.subr.bf16.mxu0 %v1107_v15  ;;  %2143 = vmatprep.subr.bf16.mxu1 %v1109_v16  ;;  %v403_v15 = vld [vmem:[%s6117_s1 + $0x848] sm:$0xff]  ;;  %v405_v16 = vld [vmem:[%s6117_s1 + $0x858] sm:$0xff] }
  0xe9   :  { %1816 = vmatpush1.bf16.msra.mxu0 %v1106_v21  ;;  %2144 = vmatpush1.bf16.msra.mxu1 %v1108_v22  ;;  %v1179_v21 = vunpack.c.l.s8.bf16 %v403_v15  ;;  %v1181_v22 = vunpack.c.l.s8.bf16 %v405_v16 }
  0xea   :  { %1817 = vmatprep.subr.bf16.mxu0 %v1115_v23  ;;  %2145 = vmatprep.subr.bf16.mxu1 %v1117_v24  ;;  %v402_v23 = vld [vmem:[%s6117_s1 + $0x840] sm:$0xff]  ;;  %v404_v24 = vld [vmem:[%s6117_s1 + $0x850] sm:$0xff] }
  0xeb   :  { %v1178_v26 = vunpack.c.l.s8.bf16 %v402_v23  ;;  %v1180_v27 = vunpack.c.l.s8.bf16 %v404_v24  ;;  %v1186_v32 = vunpack.c.h.s8.bf16 %v402_v23  ;;  %v1188_v34 = vunpack.c.h.s8.bf16 %v404_v24 }
  0xed   :  { %1818 = vmatpush1.bf16.msra.mxu0 %v1114_v25  ;;  %2146 = vmatpush1.bf16.msra.mxu1 %v1116_v29  ;;  %v1187_v25 = vunpack.c.h.s8.bf16 %v403_v15  ;;  %v1189_v29 = vunpack.c.h.s8.bf16 %v405_v16 }
  0xee   :  { %1819 = vmatprep.subr.bf16.mxu0 %v1123_v30  ;;  %2147 = vmatprep.subr.bf16.mxu1 %v1125_v31  ;;  %v411_v30 = vld [vmem:[%s6117_s1 + $0x888] sm:$0xff]  ;;  %v413_v31 = vld [vmem:[%s6117_s1 + $0x898] sm:$0xff] }
  0xf1   :  { %1820 = vmatpush1.bf16.msra.mxu0 %v1122_v35  ;;  %2148 = vmatpush1.bf16.msra.mxu1 %v1124_v36  ;;  %v1195_v35 = vunpack.c.l.s8.bf16 %v411_v30  ;;  %v1197_v36 = vunpack.c.l.s8.bf16 %v413_v31 }
  0xf2   :  { %1821 = vmatprep.subr.bf16.mxu0 %v1131_v37  ;;  %2149 = vmatprep.subr.bf16.mxu1 %v1133_v39  ;;  %v410_v37 = vld [vmem:[%s6117_s1 + $0x880] sm:$0xff]  ;;  %v412_v39 = vld [vmem:[%s6117_s1 + $0x890] sm:$0xff] }
  0xf3   :  { %v1194_v40 = vunpack.c.l.s8.bf16 %v410_v37  ;;  %v1196_v46 = vunpack.c.l.s8.bf16 %v412_v39  ;;  %v1202_v48 = vunpack.c.h.s8.bf16 %v410_v37  ;;  %v1204_v50 = vunpack.c.h.s8.bf16 %v412_v39 }
  0xf5   :  { %1822 = vmatpush1.bf16.msra.mxu0 %v1130_v44  ;;  %2150 = vmatpush1.bf16.msra.mxu1 %v1132_v45  ;;  %v1203_v44 = vunpack.c.h.s8.bf16 %v411_v30  ;;  %v1205_v45 = vunpack.c.h.s8.bf16 %v413_v31 }
  0xf6   :  { %1823 = vmatprep.subr.bf16.mxu0 %v1139_v41  ;;  %2151 = vmatprep.subr.bf16.mxu1 %v1141_v47  ;;  %v419_v41 = vld [vmem:[%s6117_s1 + $0x8c8] sm:$0xff]  ;;  %v421_v47 = vld [vmem:[%s6117_s1 + $0x8d8] sm:$0xff] }
  0xf9   :  { %1824 = vmatpush1.bf16.msra.mxu0 %v1138_v51  ;;  %2152 = vmatpush1.bf16.msra.mxu1 %v1140_v52  ;;  %v1211_v51 = vunpack.c.l.s8.bf16 %v419_v41  ;;  %v1213_v52 = vunpack.c.l.s8.bf16 %v421_v47 }
  0xfa   :  { %1825 = vmatprep.subr.bf16.mxu0 %v1147_v53  ;;  %2153 = vmatprep.subr.bf16.mxu1 %v1149_v56  ;;  %v418_v53 = vld [vmem:[%s6117_s1 + $0x8c0] sm:$0xff]  ;;  %v420_v56 = vld [vmem:[%s6117_s1 + $0x8d0] sm:$0xff] }
  0xfb   :  { %v1210_v57 = vunpack.c.l.s8.bf16 %v418_v53  ;;  %v1212_v58 = vunpack.c.l.s8.bf16 %v420_v56  ;;  %v1218_v0 = vunpack.c.h.s8.bf16 %v418_v53  ;;  %v1220_v1 = vunpack.c.h.s8.bf16 %v420_v56 }
  0xfd   :  { %1826 = vmatpush1.bf16.msra.mxu0 %v1146_v60  ;;  %2154 = vmatpush1.bf16.msra.mxu1 %v1148_v61  ;;  %v1219_v60 = vunpack.c.h.s8.bf16 %v419_v41  ;;  %v1221_v61 = vunpack.c.h.s8.bf16 %v421_v47 }
  0xfe   :  { %1827 = vmatprep.subr.bf16.mxu0 %v1155_v49  ;;  %2155 = vmatprep.subr.bf16.mxu1 %v1157_v63  ;;  %v427_v49 = vld [vmem:[%s6117_s1 + $0x908] sm:$0xff]  ;;  %v429_v63 = vld [vmem:[%s6117_s1 + $0x918] sm:$0xff] }
  0xff   :  { %v1235_v9 = vunpack.c.h.s8.bf16 %v427_v49 }
 0x101   :  { %1828 = vmatpush1.bf16.msra.mxu0 %v1154_v3  ;;  %2156 = vmatpush1.bf16.msra.mxu1 %v1156_v4  ;;  %v1227_v3 = vunpack.c.l.s8.bf16 %v427_v49  ;;  %v1229_v4 = vunpack.c.l.s8.bf16 %v429_v63 }
 0x102   :  { %1838 = vmatprep.subr.bf16.mxu0 %v1163_v5  ;;  %2166 = vmatprep.subr.bf16.mxu1 %v1165_v6  ;;  %v426_v5 = vld [vmem:[%s6117_s1 + $0x900] sm:$0xff]  ;;  %v428_v6 = vld [vmem:[%s6117_s1 + $0x910] sm:$0xff] }
 0x103   :  { %v1226_v7 = vunpack.c.l.s8.bf16 %v426_v5  ;;  %v1228_v8 = vunpack.c.l.s8.bf16 %v428_v6  ;;  %v1236_v15 = vunpack.c.h.s8.bf16 %v428_v6  ;;  %v4542_v6 = vpack.c.bf16 %v4417_v2, %v4417_v2 }
 0x104   :  { %1830 = vmatmul.mubr.bf16.vlgmr.msra.gmra.mrb[0].mxu0 %v4429_v10  ;;  %2158 = vmatmul.mubr.bf16.vlgmr.msra.gmra.mrb[0].mxu1 %v4429_v10 }
 0x105   :  { %1839 = vmatpush1.bf16.msra.mxu0 %v1162_v11  ;;  %2167 = vmatpush1.bf16.msra.mxu1 %v1164_v18  ;;  %v1237_v11 = vunpack.c.h.s8.bf16 %v429_v63  ;;  %v435_v18 = vld [vmem:[%s6117_s1 + $0x948] sm:$0xff] }
 0x106   :  { %1840 = vmatprep.subr.bf16.mxu0 %v1171_v13  ;;  %2168 = vmatprep.subr.bf16.mxu1 %v1173_v14  ;;  %v437_v13 = vld [vmem:[%s6117_s1 + $0x958] sm:$0xff]  ;;  %v1234_v14 = vunpack.c.h.s8.bf16 %v426_v5  ;;  %v1243_v16 = vunpack.c.l.s8.bf16 %v435_v18  ;;  %v1251_v24 = vunpack.c.h.s8.bf16 %v435_v18  ;;  %v467_v18 = vld [vmem:[%s6117_s1 + $0xa48] sm:$0xff] }
 0x107   :  { %1870 = vmatprep.mubr.bf16.mxu0 %v4437_v17  ;;  %2198 = vmatprep.mubr.bf16.mxu1 %v4437_v17 }
 0x109   :  { %1841 = vmatpush1.bf16.msra.mxu0 %v1170_v12  ;;  %2169 = vmatpush1.bf16.msra.mxu1 %v1172_v19  ;;  %v1245_v12 = vunpack.c.l.s8.bf16 %v437_v13  ;;  %v434_v19 = vld [vmem:[%s6117_s1 + $0x940] sm:$0xff] }
 0x10a   :  { %1842 = vmatprep.subr.bf16.mxu0 %v1179_v21  ;;  %2170 = vmatprep.subr.bf16.mxu1 %v1181_v22  ;;  %v436_v21 = vld [vmem:[%s6117_s1 + $0x950] sm:$0xff]  ;;  %v1242_v22 = vunpack.c.l.s8.bf16 %v434_v19 }
 0x10b   :  { %v1244_v23 = vunpack.c.l.s8.bf16 %v436_v21  ;;  %v1252_v30 = vunpack.c.h.s8.bf16 %v436_v21  ;;  %v468_v21 = vld [vmem:[%s6117_s1 + $0xa50] sm:$0xff] }
 0x10d   :  { %1843 = vmatpush1.bf16.msra.mxu0 %v1178_v26  ;;  %2171 = vmatpush1.bf16.msra.mxu1 %v1180_v27  ;;  %v1253_v26 = vunpack.c.h.s8.bf16 %v437_v13  ;;  %v443_v27 = vld [vmem:[%s6117_s1 + $0x988] sm:$0xff]  ;;  %v469_v13 = vld [vmem:[%s6117_s1 + $0xa58] sm:$0xff] }
 0x10e   :  { %1844 = vmatprep.subr.bf16.mxu0 %v1187_v25  ;;  %2172 = vmatprep.subr.bf16.mxu1 %v1189_v29  ;;  %v445_v25 = vld [vmem:[%s6117_s1 + $0x998] sm:$0xff]  ;;  %v1250_v29 = vunpack.c.h.s8.bf16 %v434_v19  ;;  %v1259_v31 = vunpack.c.l.s8.bf16 %v443_v27  ;;  %v1267_v39 = vunpack.c.h.s8.bf16 %v443_v27  ;;  %v466_v19 = vld [vmem:[%s6117_s1 + $0xa40] sm:$0xff]  ;;  %v475_v27 = vld [vmem:[%s6117_s1 + $0xa88] sm:$0xff] }
 0x111   :  { %1845 = vmatpush1.bf16.msra.mxu0 %v1186_v32  ;;  %2173 = vmatpush1.bf16.msra.mxu1 %v1188_v34  ;;  %v1261_v32 = vunpack.c.l.s8.bf16 %v445_v25  ;;  %v442_v34 = vld [vmem:[%s6117_s1 + $0x980] sm:$0xff] }
 0x112   :  { %1846 = vmatprep.subr.bf16.mxu0 %v1195_v35  ;;  %2174 = vmatprep.subr.bf16.mxu1 %v1197_v36  ;;  %v444_v35 = vld [vmem:[%s6117_s1 + $0x990] sm:$0xff]  ;;  %v1258_v36 = vunpack.c.l.s8.bf16 %v442_v34 }
 0x113   :  { %v1260_v37 = vunpack.c.l.s8.bf16 %v444_v35  ;;  %v1268_v41 = vunpack.c.h.s8.bf16 %v444_v35  ;;  %v476_v35 = vld [vmem:[%s6117_s1 + $0xa90] sm:$0xff] }
 0x115   :  { %1847 = vmatpush1.bf16.msra.mxu0 %v1194_v40  ;;  %2175 = vmatpush1.bf16.msra.mxu1 %v1196_v46  ;;  %v1269_v40 = vunpack.c.h.s8.bf16 %v445_v25  ;;  %v451_v46 = vld [vmem:[%s6117_s1 + $0x9c8] sm:$0xff]  ;;  %v477_v25 = vld [vmem:[%s6117_s1 + $0xa98] sm:$0xff] }
 0x116   :  { %1848 = vmatprep.subr.bf16.mxu0 %v1203_v44  ;;  %2176 = vmatprep.subr.bf16.mxu1 %v1205_v45  ;;  %v453_v44 = vld [vmem:[%s6117_s1 + $0x9d8] sm:$0xff]  ;;  %v1266_v45 = vunpack.c.h.s8.bf16 %v442_v34  ;;  %v1275_v47 = vunpack.c.l.s8.bf16 %v451_v46  ;;  %v474_v34 = vld [vmem:[%s6117_s1 + $0xa80] sm:$0xff] }
 0x119   :  { %1849 = vmatpush1.bf16.msra.mxu0 %v1202_v48  ;;  %2177 = vmatpush1.bf16.msra.mxu1 %v1204_v50  ;;  %v1277_v48 = vunpack.c.l.s8.bf16 %v453_v44  ;;  %v450_v50 = vld [vmem:[%s6117_s1 + $0x9c0] sm:$0xff] }
 0x11a   :  { %1850 = vmatprep.subr.bf16.mxu0 %v1211_v51  ;;  %2178 = vmatprep.subr.bf16.mxu1 %v1213_v52  ;;  %v452_v51 = vld [vmem:[%s6117_s1 + $0x9d0] sm:$0xff]  ;;  %v72_v52 = vcombine.high %v4407_v59, %v4407_v59  ;;  %v1274_v53 = vunpack.c.l.s8.bf16 %v450_v50  ;;  %v1282_v59 = vunpack.c.h.s8.bf16 %v450_v50  ;;  %v482_v50 = vld [vmem:[%s6117_s1 + $0xac0] sm:$0xff] }
 0x11b   :  { %v1276_v56 = vunpack.c.l.s8.bf16 %v452_v51  ;;  %v1284_v63 = vunpack.c.h.s8.bf16 %v452_v51  ;;  %v484_v51 = vld [vmem:[%s6117_s1 + $0xad0] sm:$0xff] }
 0x11c   :  { %v4530_v49 = vrot.slane %v72_v52, %v3995_v42  ;;  %v1338_v52 = vunpack.c.l.s8.bf16 %v482_v50 }
 0x11d   :  { %1851 = vmatpush1.bf16.msra.mxu0 %v1210_v57  ;;  %2179 = vmatpush1.bf16.msra.mxu1 %v1212_v58  ;;  %v1283_v57 = vunpack.c.h.s8.bf16 %v451_v46  ;;  %v1285_v58 = vunpack.c.h.s8.bf16 %v453_v44  ;;  %v483_v46 = vld [vmem:[%s6117_s1 + $0xac8] sm:$0xff]  ;;  %v485_v44 = vld [vmem:[%s6117_s1 + $0xad8] sm:$0xff] }
 0x11e   :  { %1852 = vmatprep.subr.bf16.mxu0 %v1219_v60  ;;  %2180 = vmatprep.subr.bf16.mxu1 %v1221_v61  ;;  %v459_v60 = vld [vmem:[%s6117_s1 + $0xa08] sm:$0xff]  ;;  %v461_v61 = vld [vmem:[%s6117_s1 + $0xa18] sm:$0xff]  ;;  %v88_v5 = vcombine.high %v4530_v49, %v4530_v49 }
 0x121   :  { %1853 = vmatpush1.bf16.msra.mxu0 %v1218_v0  ;;  %2181 = vmatpush1.bf16.msra.mxu1 %v1220_v1  ;;  %v1291_v0 = vunpack.c.l.s8.bf16 %v459_v60  ;;  %v1293_v1 = vunpack.c.l.s8.bf16 %v461_v61 }
 0x122   :  { %1854 = vmatprep.subr.bf16.mxu0 %v1227_v3  ;;  %2182 = vmatprep.subr.bf16.mxu1 %v1229_v4  ;;  %v458_v3 = vld [vmem:[%s6117_s1 + $0xa00] sm:$0xff]  ;;  %v460_v4 = vld [vmem:[%s6117_s1 + $0xa10] sm:$0xff] }
 0x123   :  { %v1298_v2 = vunpack.c.h.s8.bf16 %v458_v3 }
 0x125   :  { %1855 = vmatpush1.bf16.msra.mxu0 %v1226_v7  ;;  %2183 = vmatpush1.bf16.msra.mxu1 %v1228_v8  ;;  %v1290_v7 = vunpack.c.l.s8.bf16 %v458_v3  ;;  %v1292_v8 = vunpack.c.l.s8.bf16 %v460_v4  ;;  %v492_v3 = vld [vmem:[%s6117_s1 + $0xb10] sm:$0xff] }
 0x126   :  { %1856 = vmatprep.subr.bf16.mxu0 %v1235_v9  ;;  %2184 = vmatprep.subr.bf16.mxu1 %v1237_v11  ;;  %v1299_v9 = vunpack.c.h.s8.bf16 %v459_v60  ;;  %v1301_v11 = vunpack.c.h.s8.bf16 %v461_v61  ;;  %v493_v60 = vld [vmem:[%s6117_s1 + $0xb18] sm:$0xff]  ;;  %v1346_v61 = vunpack.c.h.s8.bf16 %v482_v50 }
 0x127   :  { %v4637_v50 = vld [vmem:[%s6118_s0 + $0x18] sm:$0xff] }
 0x129   :  { %1857 = vmatpush1.bf16.msra.mxu0 %v1234_v14  ;;  %2185 = vmatpush1.bf16.msra.mxu1 %v1236_v15  ;;  %v4550_v14 = vpack.c.bf16 %v88_v5, %v88_v5  ;;  %v1300_v15 = vunpack.c.h.s8.bf16 %v460_v4  ;;  %v1356_v5 = vunpack.c.l.s8.bf16 %v492_v3 }
 0x12a   :  { %1858 = vmatprep.subr.bf16.mxu0 %v1243_v16  ;;  %2186 = vmatprep.subr.bf16.mxu1 %v1245_v12  ;;  %v1307_v16 = vunpack.c.l.s8.bf16 %v467_v18  ;;  %v1309_v12 = vunpack.c.l.s8.bf16 %v469_v13 }
 0x12d   :  { %1859 = vmatpush1.bf16.msra.mxu0 %v1242_v22  ;;  %2187 = vmatpush1.bf16.msra.mxu1 %v1244_v23  ;;  %v1306_v22 = vunpack.c.l.s8.bf16 %v466_v19  ;;  %v1308_v23 = vunpack.c.l.s8.bf16 %v468_v21 }
 0x12e   :  { %1860 = vmatprep.subr.bf16.mxu0 %v1251_v24  ;;  %2188 = vmatprep.subr.bf16.mxu1 %v1253_v26  ;;  %v1315_v24 = vunpack.c.h.s8.bf16 %v467_v18  ;;  %v1317_v26 = vunpack.c.h.s8.bf16 %v469_v13  ;;  %v1364_v13 = vunpack.c.h.s8.bf16 %v492_v3  ;;  %v524_v3 = vld [vmem:[%s6117_s1 + $0xc10] sm:$0xff] }
 0x131   :  { %1861 = vmatpush1.bf16.msra.mxu0 %v1250_v29  ;;  %2189 = vmatpush1.bf16.msra.mxu1 %v1252_v30  ;;  %v1314_v29 = vunpack.c.h.s8.bf16 %v466_v19  ;;  %v1316_v30 = vunpack.c.h.s8.bf16 %v468_v21 }
 0x132   :  { %1862 = vmatprep.subr.bf16.mxu0 %v1259_v31  ;;  %2190 = vmatprep.subr.bf16.mxu1 %v1261_v32  ;;  %v1323_v31 = vunpack.c.l.s8.bf16 %v475_v27  ;;  %v1325_v32 = vunpack.c.l.s8.bf16 %v477_v25 }
 0x135   :  { %1863 = vmatpush1.bf16.msra.mxu0 %v1258_v36  ;;  %2191 = vmatpush1.bf16.msra.mxu1 %v1260_v37  ;;  %v1322_v36 = vunpack.c.l.s8.bf16 %v474_v34  ;;  %v1324_v37 = vunpack.c.l.s8.bf16 %v476_v35 }
 0x136   :  { %1864 = vmatprep.subr.bf16.mxu0 %v1267_v39  ;;  %2192 = vmatprep.subr.bf16.mxu1 %v1269_v40  ;;  %v1331_v39 = vunpack.c.h.s8.bf16 %v475_v27  ;;  %v1333_v40 = vunpack.c.h.s8.bf16 %v477_v25 }
 0x139   :  { %1865 = vmatpush1.bf16.msra.mxu0 %v1266_v45  ;;  %2193 = vmatpush1.bf16.msra.mxu1 %v1268_v41  ;;  %v1330_v45 = vunpack.c.h.s8.bf16 %v474_v34  ;;  %v1332_v41 = vunpack.c.h.s8.bf16 %v476_v35 }
 0x13a   :  { %1866 = vmatprep.subr.bf16.mxu0 %v1275_v47  ;;  %2194 = vmatprep.subr.bf16.mxu1 %v1277_v48  ;;  %v1339_v47 = vunpack.c.l.s8.bf16 %v483_v46  ;;  %v1341_v48 = vunpack.c.l.s8.bf16 %v485_v44 }
 0x13d   :  { %1867 = vmatpush1.bf16.msra.mxu0 %v1274_v53  ;;  %2195 = vmatpush1.bf16.msra.mxu1 %v1276_v56  ;;  %v1340_v53 = vunpack.c.l.s8.bf16 %v484_v51  ;;  %v1347_v56 = vunpack.c.h.s8.bf16 %v483_v46 }
 0x13e   :  { %1868 = vmatprep.subr.bf16.mxu0 %v1283_v57  ;;  %2196 = vmatprep.subr.bf16.mxu1 %v1285_v58  ;;  %v1349_v57 = vunpack.c.h.s8.bf16 %v485_v44  ;;  %v491_v58 = vld [vmem:[%s6117_s1 + $0xb08] sm:$0xff] }
 0x141   :  { %1869 = vmatpush1.bf16.msra.mxu0 %v1282_v59  ;;  %2197 = vmatpush1.bf16.msra.mxu1 %v1284_v63  ;;  %v1348_v59 = vunpack.c.h.s8.bf16 %v484_v51  ;;  %v1355_v63 = vunpack.c.l.s8.bf16 %v491_v58 }
 0x142   :  { %1879 = vmatprep.subr.bf16.mxu0 %v1291_v0  ;;  %2207 = vmatprep.subr.bf16.mxu1 %v1293_v1  ;;  %v1357_v0 = vunpack.c.l.s8.bf16 %v493_v60  ;;  %v490_v1 = vld [vmem:[%s6117_s1 + $0xb00] sm:$0xff] }
 0x143   :  { %v1354_v4 = vunpack.c.l.s8.bf16 %v490_v1  ;;  %v1362_v18 = vunpack.c.h.s8.bf16 %v490_v1  ;;  %v522_v1 = vld [vmem:[%s6117_s1 + $0xc00] sm:$0xff] }
 0x144   :  { %1871 = vmatmul.mubr.bf16.vlgmr.msra.gmra.mrb[0].mxu0 %v4542_v6  ;;  %2199 = vmatmul.mubr.bf16.vlgmr.msra.gmra.mrb[0].mxu1 %v4542_v6 }
 0x145   :  { %1880 = vmatpush1.bf16.msra.mxu0 %v1290_v7  ;;  %2208 = vmatpush1.bf16.msra.mxu1 %v1292_v8  ;;  %v1363_v7 = vunpack.c.h.s8.bf16 %v491_v58  ;;  %v1365_v8 = vunpack.c.h.s8.bf16 %v493_v60  ;;  %v525_v58 = vld [vmem:[%s6117_s1 + $0xc18] sm:$0xff]  ;;  %v4647_v60 = vrot.slane %v4637_v50, %v3995_v42 }
 0x146   :  { %1881 = vmatprep.subr.bf16.mxu0 %v1299_v9  ;;  %2209 = vmatprep.subr.bf16.mxu1 %v1301_v11  ;;  %v499_v9 = vld [vmem:[%s6117_s1 + $0xb48] sm:$0xff]  ;;  %v501_v11 = vld [vmem:[%s6117_s1 + $0xb58] sm:$0xff] }
 0x147   :  { %1911 = vmatprep.mubr.bf16.mxu0 %v4550_v14  ;;  %2239 = vmatprep.mubr.bf16.mxu1 %v4550_v14 }
 0x149   :  { %1882 = vmatpush1.bf16.msra.mxu0 %v1298_v2  ;;  %2210 = vmatpush1.bf16.msra.mxu1 %v1300_v15  ;;  %v1371_v2 = vunpack.c.l.s8.bf16 %v499_v9  ;;  %v1373_v15 = vunpack.c.l.s8.bf16 %v501_v11 }
 0x14a   :  { %1883 = vmatprep.subr.bf16.mxu0 %v1307_v16  ;;  %2211 = vmatprep.subr.bf16.mxu1 %v1309_v12  ;;  %v498_v16 = vld [vmem:[%s6117_s1 + $0xb40] sm:$0xff]  ;;  %v500_v12 = vld [vmem:[%s6117_s1 + $0xb50] sm:$0xff] }
 0x14b   :  { %v1370_v19 = vunpack.c.l.s8.bf16 %v498_v16  ;;  %v1372_v21 = vunpack.c.l.s8.bf16 %v500_v12  ;;  %v1378_v27 = vunpack.c.h.s8.bf16 %v498_v16  ;;  %v1380_v25 = vunpack.c.h.s8.bf16 %v500_v12 }
 0x14d   :  { %1884 = vmatpush1.bf16.msra.mxu0 %v1306_v22  ;;  %2212 = vmatpush1.bf16.msra.mxu1 %v1308_v23  ;;  %v1379_v22 = vunpack.c.h.s8.bf16 %v499_v9  ;;  %v1381_v23 = vunpack.c.h.s8.bf16 %v501_v11  ;;  %v1429_v11 = vunpack.c.h.s8.bf16 %v525_v58 }
 0x14e   :  { %1885 = vmatprep.subr.bf16.mxu0 %v1315_v24  ;;  %2213 = vmatprep.subr.bf16.mxu1 %v1317_v26  ;;  %v507_v24 = vld [vmem:[%s6117_s1 + $0xb88] sm:$0xff]  ;;  %v509_v26 = vld [vmem:[%s6117_s1 + $0xb98] sm:$0xff] }
 0x151   :  { %1886 = vmatpush1.bf16.msra.mxu0 %v1314_v29  ;;  %2214 = vmatpush1.bf16.msra.mxu1 %v1316_v30  ;;  %v1387_v29 = vunpack.c.l.s8.bf16 %v507_v24  ;;  %v1389_v30 = vunpack.c.l.s8.bf16 %v509_v26 }
 0x152   :  { %1887 = vmatprep.subr.bf16.mxu0 %v1323_v31  ;;  %2215 = vmatprep.subr.bf16.mxu1 %v1325_v32  ;;  %v506_v31 = vld [vmem:[%s6117_s1 + $0xb80] sm:$0xff]  ;;  %v508_v32 = vld [vmem:[%s6117_s1 + $0xb90] sm:$0xff] }
 0x153   :  { %v1386_v34 = vunpack.c.l.s8.bf16 %v506_v31  ;;  %v1388_v35 = vunpack.c.l.s8.bf16 %v508_v32  ;;  %v1394_v46 = vunpack.c.h.s8.bf16 %v506_v31  ;;  %v1396_v44 = vunpack.c.h.s8.bf16 %v508_v32 }
 0x155   :  { %1888 = vmatpush1.bf16.msra.mxu0 %v1322_v36  ;;  %2216 = vmatpush1.bf16.msra.mxu1 %v1324_v37  ;;  %v1395_v36 = vunpack.c.h.s8.bf16 %v507_v24  ;;  %v1397_v37 = vunpack.c.h.s8.bf16 %v509_v26 }
 0x156   :  { %1889 = vmatprep.subr.bf16.mxu0 %v1331_v39  ;;  %2217 = vmatprep.subr.bf16.mxu1 %v1333_v40  ;;  %v515_v39 = vld [vmem:[%s6117_s1 + $0xbc8] sm:$0xff]  ;;  %v517_v40 = vld [vmem:[%s6117_s1 + $0xbd8] sm:$0xff] }
 0x159   :  { %1890 = vmatpush1.bf16.msra.mxu0 %v1330_v45  ;;  %2218 = vmatpush1.bf16.msra.mxu1 %v1332_v41  ;;  %v1403_v45 = vunpack.c.l.s8.bf16 %v515_v39  ;;  %v1405_v41 = vunpack.c.l.s8.bf16 %v517_v40 }
 0x15a   :  { %1891 = vmatprep.subr.bf16.mxu0 %v1339_v47  ;;  %2219 = vmatprep.subr.bf16.mxu1 %v1341_v48  ;;  %v514_v47 = vld [vmem:[%s6117_s1 + $0xbc0] sm:$0xff]  ;;  %v516_v48 = vld [vmem:[%s6117_s1 + $0xbd0] sm:$0xff] }
 0x15b   :  { %v1402_v51 = vunpack.c.l.s8.bf16 %v514_v47 }
 0x15d   :  { %1892 = vmatpush1.bf16.msra.mxu0 %v1338_v52  ;;  %2220 = vmatpush1.bf16.msra.mxu1 %v1340_v53  ;;  %v1404_v52 = vunpack.c.l.s8.bf16 %v516_v48  ;;  %v1411_v53 = vunpack.c.h.s8.bf16 %v515_v39 }
 0x15e   :  { %1893 = vmatprep.subr.bf16.mxu0 %v1347_v56  ;;  %2221 = vmatprep.subr.bf16.mxu1 %v1349_v57  ;;  %v1413_v56 = vunpack.c.h.s8.bf16 %v517_v40  ;;  %v523_v57 = vld [vmem:[%s6117_s1 + $0xc08] sm:$0xff] }
 0x15f   :  { %v1427_v9 = vunpack.c.h.s8.bf16 %v523_v57 }
 0x161   :  { %1894 = vmatpush1.bf16.msra.mxu0 %v1346_v61  ;;  %2222 = vmatpush1.bf16.msra.mxu1 %v1348_v59  ;;  %v1410_v61 = vunpack.c.h.s8.bf16 %v514_v47  ;;  %v1412_v59 = vunpack.c.h.s8.bf16 %v516_v48 }
 0x162   :  { %1895 = vmatprep.subr.bf16.mxu0 %v1355_v63  ;;  %2223 = vmatprep.subr.bf16.mxu1 %v1357_v0  ;;  %v1419_v63 = vunpack.c.l.s8.bf16 %v523_v57  ;;  %v1421_v0 = vunpack.c.l.s8.bf16 %v525_v58 }
 0x165   :  { %1896 = vmatpush1.bf16.msra.mxu0 %v1354_v4  ;;  %2224 = vmatpush1.bf16.msra.mxu1 %v1356_v5  ;;  %v104_v4 = vcombine.high %v4647_v60, %v4647_v60  ;;  %v4659_v5 = vpack.c.bf16 %v4530_v49, %v4530_v49  ;;  %v1426_v49 = vunpack.c.h.s8.bf16 %v522_v1 }
 0x166   :  { %1897 = vmatprep.subr.bf16.mxu0 %v1363_v7  ;;  %2225 = vmatprep.subr.bf16.mxu1 %v1365_v8  ;;  %v1418_v7 = vunpack.c.l.s8.bf16 %v522_v1  ;;  %v1420_v8 = vunpack.c.l.s8.bf16 %v524_v3 }
 0x169   :  { %1898 = vmatpush1.bf16.msra.mxu0 %v1362_v18  ;;  %2226 = vmatpush1.bf16.msra.mxu1 %v1364_v13  ;;  %v531_v18 = vld [vmem:[%s6117_s1 + $0xc48] sm:$0xff]  ;;  %v533_v13 = vld [vmem:[%s6117_s1 + $0xc58] sm:$0xff] }
 0x16a   :  { %1899 = vmatprep.subr.bf16.mxu0 %v1371_v2  ;;  %2227 = vmatprep.subr.bf16.mxu1 %v1373_v15  ;;  %v4667_v2 = vpack.c.bf16 %v104_v4, %v104_v4  ;;  %v1428_v15 = vunpack.c.h.s8.bf16 %v524_v3  ;;  %v1435_v16 = vunpack.c.l.s8.bf16 %v531_v18  ;;  %v1437_v12 = vunpack.c.l.s8.bf16 %v533_v13  ;;  %v554_v4 = vld [vmem:[%s6117_s1 + $0xd00] sm:$0xff] }
 0x16b   :  { %v1443_v24 = vunpack.c.h.s8.bf16 %v531_v18  ;;  %v1445_v26 = vunpack.c.h.s8.bf16 %v533_v13  ;;  %v563_v13 = vld [vmem:[%s6117_s1 + $0xd48] sm:$0xff] }
 0x16d   :  { %1900 = vmatpush1.bf16.msra.mxu0 %v1370_v19  ;;  %2228 = vmatpush1.bf16.msra.mxu1 %v1372_v21  ;;  %v530_v19 = vld [vmem:[%s6117_s1 + $0xc40] sm:$0xff]  ;;  %v532_v21 = vld [vmem:[%s6117_s1 + $0xc50] sm:$0xff] }
 0x16e   :  { %1901 = vmatprep.subr.bf16.mxu0 %v1379_v22  ;;  %2229 = vmatprep.subr.bf16.mxu1 %v1381_v23  ;;  %v1434_v22 = vunpack.c.l.s8.bf16 %v530_v19  ;;  %v1436_v23 = vunpack.c.l.s8.bf16 %v532_v21 }
 0x171   :  { %1902 = vmatpush1.bf16.msra.mxu0 %v1378_v27  ;;  %2230 = vmatpush1.bf16.msra.mxu1 %v1380_v25  ;;  %v539_v27 = vld [vmem:[%s6117_s1 + $0xc88] sm:$0xff]  ;;  %v541_v25 = vld [vmem:[%s6117_s1 + $0xc98] sm:$0xff] }
 0x172   :  { %1903 = vmatprep.subr.bf16.mxu0 %v1387_v29  ;;  %2231 = vmatprep.subr.bf16.mxu1 %v1389_v30  ;;  %v1442_v29 = vunpack.c.h.s8.bf16 %v530_v19  ;;  %v1444_v30 = vunpack.c.h.s8.bf16 %v532_v21  ;;  %v1451_v31 = vunpack.c.l.s8.bf16 %v539_v27  ;;  %v1453_v32 = vunpack.c.l.s8.bf16 %v541_v25  ;;  %v562_v21 = vld [vmem:[%s6117_s1 + $0xd40] sm:$0xff] }
 0x173   :  { %v1459_v39 = vunpack.c.h.s8.bf16 %v539_v27  ;;  %v1461_v40 = vunpack.c.h.s8.bf16 %v541_v25  ;;  %v571_v25 = vld [vmem:[%s6117_s1 + $0xd88] sm:$0xff] }
 0x175   :  { %1904 = vmatpush1.bf16.msra.mxu0 %v1386_v34  ;;  %2232 = vmatpush1.bf16.msra.mxu1 %v1388_v35  ;;  %v538_v34 = vld [vmem:[%s6117_s1 + $0xc80] sm:$0xff]  ;;  %v540_v35 = vld [vmem:[%s6117_s1 + $0xc90] sm:$0xff] }
 0x176   :  { %1905 = vmatprep.subr.bf16.mxu0 %v1395_v36  ;;  %2233 = vmatprep.subr.bf16.mxu1 %v1397_v37  ;;  %v1450_v36 = vunpack.c.l.s8.bf16 %v538_v34  ;;  %v1452_v37 = vunpack.c.l.s8.bf16 %v540_v35 }
 0x179   :  { %1906 = vmatpush1.bf16.msra.mxu0 %v1394_v46  ;;  %2234 = vmatpush1.bf16.msra.mxu1 %v1396_v44  ;;  %v547_v46 = vld [vmem:[%s6117_s1 + $0xcc8] sm:$0xff]  ;;  %v549_v44 = vld [vmem:[%s6117_s1 + $0xcd8] sm:$0xff] }
 0x17a   :  { %1907 = vmatprep.subr.bf16.mxu0 %v1403_v45  ;;  %2235 = vmatprep.subr.bf16.mxu1 %v1405_v41  ;;  %v1458_v45 = vunpack.c.h.s8.bf16 %v538_v34  ;;  %v1460_v41 = vunpack.c.h.s8.bf16 %v540_v35  ;;  %v1467_v47 = vunpack.c.l.s8.bf16 %v547_v46  ;;  %v1469_v48 = vunpack.c.l.s8.bf16 %v549_v44  ;;  %v570_v35 = vld [vmem:[%s6117_s1 + $0xd80] sm:$0xff] }
 0x17b   :  { %v1475_v57 = vunpack.c.h.s8.bf16 %v547_v46  ;;  %v1477_v58 = vunpack.c.h.s8.bf16 %v549_v44  ;;  %v579_v44 = vld [vmem:[%s6117_s1 + $0xdc8] sm:$0xff] }
 0x17d   :  { %1908 = vmatpush1.bf16.msra.mxu0 %v1402_v51  ;;  %2236 = vmatpush1.bf16.msra.mxu1 %v1404_v52  ;;  %v546_v51 = vld [vmem:[%s6117_s1 + $0xcc0] sm:$0xff]  ;;  %v548_v52 = vld [vmem:[%s6117_s1 + $0xcd0] sm:$0xff] }
 0x17e   :  { %1909 = vmatprep.subr.bf16.mxu0 %v1411_v53  ;;  %2237 = vmatprep.subr.bf16.mxu1 %v1413_v56  ;;  %v1466_v53 = vunpack.c.l.s8.bf16 %v546_v51  ;;  %v1468_v56 = vunpack.c.l.s8.bf16 %v548_v52 }
 0x181   :  { %1910 = vmatpush1.bf16.msra.mxu0 %v1410_v61  ;;  %2238 = vmatpush1.bf16.msra.mxu1 %v1412_v59  ;;  %v555_v61 = vld [vmem:[%s6117_s1 + $0xd08] sm:$0xff]  ;;  %v557_v59 = vld [vmem:[%s6117_s1 + $0xd18] sm:$0xff] }
 0x182   :  { %1920 = vmatprep.subr.bf16.mxu0 %v1419_v63  ;;  %2248 = vmatprep.subr.bf16.mxu1 %v1421_v0  ;;  %v1474_v63 = vunpack.c.h.s8.bf16 %v546_v51  ;;  %v1476_v0 = vunpack.c.h.s8.bf16 %v548_v52  ;;  %v1483_v1 = vunpack.c.l.s8.bf16 %v555_v61  ;;  %v1485_v3 = vunpack.c.l.s8.bf16 %v557_v59  ;;  %v578_v52 = vld [vmem:[%s6117_s1 + $0xdc0] sm:$0xff] }
 0x183   :  { %v1493_v18 = vunpack.c.h.s8.bf16 %v557_v59 }
 0x184   :  { %1912 = vmatmul.mubr.bf16.vlgmr.msra.gmra.mrb[0].mxu0 %v4659_v5  ;;  %2240 = vmatmul.mubr.bf16.vlgmr.msra.gmra.mrb[0].mxu1 %v4659_v5 }
 0x185   :  { %1921 = vmatpush1.bf16.msra.mxu0 %v1418_v7  ;;  %2249 = vmatpush1.bf16.msra.mxu1 %v1420_v8  ;;  %v556_v7 = vld [vmem:[%s6117_s1 + $0xd10] sm:$0xff]  ;;  %v1482_v8 = vunpack.c.l.s8.bf16 %v554_v4 }
 0x186   :  { %1922 = vmatprep.subr.bf16.mxu0 %v1427_v9  ;;  %2250 = vmatprep.subr.bf16.mxu1 %v1429_v11  ;;  %v1484_v9 = vunpack.c.l.s8.bf16 %v556_v7  ;;  %v1491_v11 = vunpack.c.h.s8.bf16 %v555_v61  ;;  %v1539_v61 = vunpack.c.h.s8.bf16 %v579_v44 }
 0x187   :  { %1952 = vmatprep.mubr.bf16.mxu0 %v4667_v2  ;;  %2280 = vmatprep.mubr.bf16.mxu1 %v4667_v2 }
 0x189   :  { %1923 = vmatpush1.bf16.msra.mxu0 %v1426_v49  ;;  %2251 = vmatpush1.bf16.msra.mxu1 %v1428_v15  ;;  %v565_v49 = vld [vmem:[%s6117_s1 + $0xd58] sm:$0xff]  ;;  %v1490_v15 = vunpack.c.h.s8.bf16 %v554_v4 }
 0x18a   :  { %1924 = vmatprep.subr.bf16.mxu0 %v1435_v16  ;;  %2252 = vmatprep.subr.bf16.mxu1 %v1437_v12  ;;  %v1492_v16 = vunpack.c.h.s8.bf16 %v556_v7  ;;  %v1499_v12 = vunpack.c.l.s8.bf16 %v563_v13  ;;  %v1501_v19 = vunpack.c.l.s8.bf16 %v565_v49  ;;  %v1509_v27 = vunpack.c.h.s8.bf16 %v565_v49 }
 0x18d   :  { %1925 = vmatpush1.bf16.msra.mxu0 %v1434_v22  ;;  %2253 = vmatpush1.bf16.msra.mxu1 %v1436_v23  ;;  %v564_v22 = vld [vmem:[%s6117_s1 + $0xd50] sm:$0xff]  ;;  %v1498_v23 = vunpack.c.l.s8.bf16 %v562_v21 }
 0x18e   :  { %1926 = vmatprep.subr.bf16.mxu0 %v1443_v24  ;;  %2254 = vmatprep.subr.bf16.mxu1 %v1445_v26  ;;  %v1500_v24 = vunpack.c.l.s8.bf16 %v564_v22  ;;  %v1507_v26 = vunpack.c.h.s8.bf16 %v563_v13 }
 0x191   :  { %1927 = vmatpush1.bf16.msra.mxu0 %v1442_v29  ;;  %2255 = vmatpush1.bf16.msra.mxu1 %v1444_v30  ;;  %v573_v29 = vld [vmem:[%s6117_s1 + $0xd98] sm:$0xff]  ;;  %v1506_v30 = vunpack.c.h.s8.bf16 %v562_v21 }
 0x192   :  { %1928 = vmatprep.subr.bf16.mxu0 %v1451_v31  ;;  %2256 = vmatprep.subr.bf16.mxu1 %v1453_v32  ;;  %v1508_v31 = vunpack.c.h.s8.bf16 %v564_v22  ;;  %v1515_v32 = vunpack.c.l.s8.bf16 %v571_v25  ;;  %v1517_v34 = vunpack.c.l.s8.bf16 %v573_v29  ;;  %v1525_v46 = vunpack.c.h.s8.bf16 %v573_v29 }
 0x195   :  { %1929 = vmatpush1.bf16.msra.mxu0 %v1450_v36  ;;  %2257 = vmatpush1.bf16.msra.mxu1 %v1452_v37  ;;  %v572_v36 = vld [vmem:[%s6117_s1 + $0xd90] sm:$0xff]  ;;  %v1514_v37 = vunpack.c.l.s8.bf16 %v570_v35 }
 0x196   :  { %1930 = vmatprep.subr.bf16.mxu0 %v1459_v39  ;;  %2258 = vmatprep.subr.bf16.mxu1 %v1461_v40  ;;  %v1516_v39 = vunpack.c.l.s8.bf16 %v572_v36  ;;  %v1523_v40 = vunpack.c.h.s8.bf16 %v571_v25 }
 0x199   :  { %1931 = vmatpush1.bf16.msra.mxu0 %v1458_v45  ;;  %2259 = vmatpush1.bf16.msra.mxu1 %v1460_v41  ;;  %v581_v45 = vld [vmem:[%s6117_s1 + $0xdd8] sm:$0xff]  ;;  %v1522_v41 = vunpack.c.h.s8.bf16 %v570_v35 }
 0x19a   :  { %1932 = vmatprep.subr.bf16.mxu0 %v1467_v47  ;;  %2260 = vmatprep.subr.bf16.mxu1 %v1469_v48  ;;  %v1524_v47 = vunpack.c.h.s8.bf16 %v572_v36  ;;  %v1531_v48 = vunpack.c.l.s8.bf16 %v579_v44  ;;  %v1533_v51 = vunpack.c.l.s8.bf16 %v581_v45  ;;  %v1541_v59 = vunpack.c.h.s8.bf16 %v581_v45 }
 0x19d   :  { %1933 = vmatpush1.bf16.msra.mxu0 %v1466_v53  ;;  %2261 = vmatpush1.bf16.msra.mxu1 %v1468_v56  ;;  %v580_v53 = vld [vmem:[%s6117_s1 + $0xdd0] sm:$0xff]  ;;  %v89_v56 = vcombine.high %v4637_v50, %v4637_v50  ;;  %v1538_v50 = vunpack.c.h.s8.bf16 %v578_v52 }
 0x19e   :  { %1934 = vmatprep.subr.bf16.mxu0 %v1475_v57  ;;  %2262 = vmatprep.subr.bf16.mxu1 %v1477_v58  ;;  %v1530_v57 = vunpack.c.l.s8.bf16 %v578_v52  ;;  %v1532_v58 = vunpack.c.l.s8.bf16 %v580_v53 }
 0x1a1   :  { %1935 = vmatpush1.bf16.msra.mxu0 %v1474_v63  ;;  %2263 = vmatpush1.bf16.msra.mxu1 %v1476_v0  ;;  %v587_v63 = vld [vmem:[%s6117_s1 + $0xe08] sm:$0xff]  ;;  %v589_v0 = vld [vmem:[%s6117_s1 + $0xe18] sm:$0xff] }
 0x1a2   :  { %1936 = vmatprep.subr.bf16.mxu0 %v1483_v1  ;;  %2264 = vmatprep.subr.bf16.mxu1 %v1485_v3  ;;  %v4760_v1 = vrot.slane %v89_v56, %v3995_v42  ;;  %v1540_v3 = vunpack.c.h.s8.bf16 %v580_v53  ;;  %v1547_v4 = vunpack.c.l.s8.bf16 %v587_v63  ;;  %v1549_v7 = vunpack.c.l.s8.bf16 %v589_v0 }
 0x1a3   :  { %v1555_v49 = vunpack.c.h.s8.bf16 %v587_v63 }
 0x1a4   :  { %v105_v42 = vcombine.high %v4760_v1, %v4760_v1 }
 0x1a5   :  { %1937 = vmatpush1.bf16.msra.mxu0 %v1482_v8  ;;  %2265 = vmatpush1.bf16.msra.mxu1 %v1484_v9  ;;  %v586_v8 = vld [vmem:[%s6117_s1 + $0xe00] sm:$0xff]  ;;  %v588_v9 = vld [vmem:[%s6117_s1 + $0xe10] sm:$0xff] }
 0x1a6   :  { %1938 = vmatprep.subr.bf16.mxu0 %v1491_v11  ;;  %2266 = vmatprep.subr.bf16.mxu1 %v1493_v18  ;;  %v4772_v11 = vpack.c.bf16 %v4647_v60, %v4647_v60  ;;  %v1546_v18 = vunpack.c.l.s8.bf16 %v586_v8  ;;  %v1548_v13 = vunpack.c.l.s8.bf16 %v588_v9  ;;  %v1554_v60 = vunpack.c.h.s8.bf16 %v586_v8 }
 0x1a7   :  { %v1556_v21 = vunpack.c.h.s8.bf16 %v588_v9 }
 0x1a9   :  { %1939 = vmatpush1.bf16.msra.mxu0 %v1490_v15  ;;  %2267 = vmatpush1.bf16.msra.mxu1 %v1492_v16  ;;  %v1557_v15 = vunpack.c.h.s8.bf16 %v589_v0  ;;  %v595_v16 = vld [vmem:[%s6117_s1 + $0xe48] sm:$0xff] }
 0x1aa   :  { %1940 = vmatprep.subr.bf16.mxu0 %v1499_v12  ;;  %2268 = vmatprep.subr.bf16.mxu1 %v1501_v19  ;;  %v597_v12 = vld [vmem:[%s6117_s1 + $0xe58] sm:$0xff]  ;;  %v4780_v19 = vpack.c.bf16 %v105_v42, %v105_v42  ;;  %v1563_v22 = vunpack.c.l.s8.bf16 %v595_v16  ;;  %v1571_v29 = vunpack.c.h.s8.bf16 %v595_v16  ;;  %v618_v42 = vld [vmem:[%s6117_s1 + $0xf00] sm:$0xff] }
 0x1ad   :  { %1941 = vmatpush1.bf16.msra.mxu0 %v1498_v23  ;;  %2269 = vmatpush1.bf16.msra.mxu1 %v1500_v24  ;;  %v1565_v23 = vunpack.c.l.s8.bf16 %v597_v12  ;;  %v594_v24 = vld [vmem:[%s6117_s1 + $0xe40] sm:$0xff] }
 0x1ae   :  { %1942 = vmatprep.subr.bf16.mxu0 %v1507_v26  ;;  %2270 = vmatprep.subr.bf16.mxu1 %v1509_v27  ;;  %v596_v26 = vld [vmem:[%s6117_s1 + $0xe50] sm:$0xff]  ;;  %v1562_v27 = vunpack.c.l.s8.bf16 %v594_v24 }
 0x1af   :  { %v1564_v25 = vunpack.c.l.s8.bf16 %v596_v26  ;;  %v1572_v35 = vunpack.c.h.s8.bf16 %v596_v26  ;;  %v626_v26 = vld [vmem:[%s6117_s1 + $0xf40] sm:$0xff] }
 0x1b1   :  { %1943 = vmatpush1.bf16.msra.mxu0 %v1506_v30  ;;  %2271 = vmatpush1.bf16.msra.mxu1 %v1508_v31  ;;  %v1573_v30 = vunpack.c.h.s8.bf16 %v597_v12  ;;  %v603_v31 = vld [vmem:[%s6117_s1 + $0xe88] sm:$0xff] }
 0x1b2   :  { %1944 = vmatprep.subr.bf16.mxu0 %v1515_v32  ;;  %2272 = vmatprep.subr.bf16.mxu1 %v1517_v34  ;;  %v605_v32 = vld [vmem:[%s6117_s1 + $0xe98] sm:$0xff]  ;;  %v1570_v34 = vunpack.c.h.s8.bf16 %v594_v24  ;;  %v1579_v36 = vunpack.c.l.s8.bf16 %v603_v31  ;;  %v1587_v45 = vunpack.c.h.s8.bf16 %v603_v31  ;;  %v627_v12 = vld [vmem:[%s6117_s1 + $0xf48] sm:$0xff] }
 0x1b5   :  { %1945 = vmatpush1.bf16.msra.mxu0 %v1514_v37  ;;  %2273 = vmatpush1.bf16.msra.mxu1 %v1516_v39  ;;  %v1581_v37 = vunpack.c.l.s8.bf16 %v605_v32  ;;  %v602_v39 = vld [vmem:[%s6117_s1 + $0xe80] sm:$0xff] }
 0x1b6   :  { %1946 = vmatprep.subr.bf16.mxu0 %v1523_v40  ;;  %2274 = vmatprep.subr.bf16.mxu1 %v1525_v46  ;;  %v604_v40 = vld [vmem:[%s6117_s1 + $0xe90] sm:$0xff]  ;;  %v1578_v46 = vunpack.c.l.s8.bf16 %v602_v39 }
 0x1b7   :  { %v1580_v44 = vunpack.c.l.s8.bf16 %v604_v40  ;;  %v1588_v52 = vunpack.c.h.s8.bf16 %v604_v40  ;;  %v634_v40 = vld [vmem:[%s6117_s1 + $0xf80] sm:$0xff] }
 0x1b9   :  { %1947 = vmatpush1.bf16.msra.mxu0 %v1522_v41  ;;  %2275 = vmatpush1.bf16.msra.mxu1 %v1524_v47  ;;  %v1589_v41 = vunpack.c.h.s8.bf16 %v605_v32  ;;  %v611_v47 = vld [vmem:[%s6117_s1 + $0xec8] sm:$0xff] }
 0x1ba   :  { %1948 = vmatprep.subr.bf16.mxu0 %v1531_v48  ;;  %2276 = vmatprep.subr.bf16.mxu1 %v1533_v51  ;;  %v613_v48 = vld [vmem:[%s6117_s1 + $0xed8] sm:$0xff]  ;;  %v1586_v51 = vunpack.c.h.s8.bf16 %v602_v39  ;;  %v1595_v53 = vunpack.c.l.s8.bf16 %v611_v47  ;;  %v1603_v63 = vunpack.c.h.s8.bf16 %v611_v47  ;;  %v635_v32 = vld [vmem:[%s6117_s1 + $0xf88] sm:$0xff] }
 0x1bb   :  { %v1597_v56 = vunpack.c.l.s8.bf16 %v613_v48  ;;  %v1605_v0 = vunpack.c.h.s8.bf16 %v613_v48  ;;  %v643_v48 = vld [vmem:[%s6117_s1 + $0xfc8] sm:$0xff] }
 0x1bd   :  { %1949 = vmatpush1.bf16.msra.mxu0 %v1530_v57  ;;  %2277 = vmatpush1.bf16.msra.mxu1 %v1532_v58  ;;  %v610_v57 = vld [vmem:[%s6117_s1 + $0xec0] sm:$0xff]  ;;  %v612_v58 = vld [vmem:[%s6117_s1 + $0xed0] sm:$0xff] }
 0x1be   :  { %1950 = vmatprep.subr.bf16.mxu0 %v1539_v61  ;;  %2278 = vmatprep.subr.bf16.mxu1 %v1541_v59  ;;  %v1594_v61 = vunpack.c.l.s8.bf16 %v610_v57  ;;  %v1596_v59 = vunpack.c.l.s8.bf16 %v612_v58 }
 0x1c1   :  { %1951 = vmatpush1.bf16.msra.mxu0 %v1538_v50  ;;  %2279 = vmatpush1.bf16.msra.mxu1 %v1540_v3  ;;  %v619_v50 = vld [vmem:[%s6117_s1 + $0xf08] sm:$0xff]  ;;  %v621_v3 = vld [vmem:[%s6117_s1 + $0xf18] sm:$0xff] }
 0x1c2   :  { %1961 = vmatprep.subr.bf16.mxu0 %v1547_v4  ;;  %2289 = vmatprep.subr.bf16.mxu1 %v1549_v7  ;;  %v1602_v4 = vunpack.c.h.s8.bf16 %v610_v57  ;;  %v1604_v7 = vunpack.c.h.s8.bf16 %v612_v58  ;;  %v1611_v8 = vunpack.c.l.s8.bf16 %v619_v50  ;;  %v1613_v9 = vunpack.c.l.s8.bf16 %v621_v3  ;;  %v642_v58 = vld [vmem:[%s6117_s1 + $0xfc0] sm:$0xff] }
 0x1c3   :  { %v1621_v16 = vunpack.c.h.s8.bf16 %v621_v3  ;;  %v143_v3 = vld [vmem:[%s6117_s1 + $0x28] sm:$0xff] }
 0x1c4   :  { %1953 = vmatmul.mubr.bf16.vlgmr.msra.gmra.mrb[0].mxu0 %v4772_v11  ;;  %2281 = vmatmul.mubr.bf16.vlgmr.msra.gmra.mrb[0].mxu1 %v4772_v11 }
 0x1c5   :  { %1962 = vmatpush1.bf16.msra.mxu0 %v1546_v18  ;;  %2290 = vmatpush1.bf16.msra.mxu1 %v1548_v13  ;;  %v620_v18 = vld [vmem:[%s6117_s1 + $0xf10] sm:$0xff]  ;;  %v1610_v13 = vunpack.c.l.s8.bf16 %v618_v42 }
 0x1c6   :  { %1963 = vmatprep.subr.bf16.mxu0 %v1555_v49  ;;  %2291 = vmatprep.subr.bf16.mxu1 %v1557_v15  ;;  %v1612_v49 = vunpack.c.l.s8.bf16 %v620_v18  ;;  %v1619_v15 = vunpack.c.h.s8.bf16 %v619_v50 }
 0x1c7   :  { %1993 = vmatprep.mubr.bf16.mxu0 %v4780_v19  ;;  %2321 = vmatprep.mubr.bf16.mxu1 %v4780_v19 }
 0x1c9   :  { %1964 = vmatpush1.bf16.msra.mxu0 %v1554_v60  ;;  %2292 = vmatpush1.bf16.msra.mxu1 %v1556_v21  ;;  %v629_v60 = vld [vmem:[%s6117_s1 + $0xf58] sm:$0xff]  ;;  %v1618_v21 = vunpack.c.h.s8.bf16 %v618_v42 }
 0x1ca   :  { %1965 = vmatprep.subr.bf16.mxu0 %v1563_v22  ;;  %2293 = vmatprep.subr.bf16.mxu1 %v1565_v23  ;;  %v1620_v22 = vunpack.c.h.s8.bf16 %v620_v18  ;;  %v1627_v23 = vunpack.c.l.s8.bf16 %v627_v12  ;;  %v1629_v24 = vunpack.c.l.s8.bf16 %v629_v60  ;;  %v1637_v31 = vunpack.c.h.s8.bf16 %v629_v60  ;;  %v142_v18 = vld [vmem:[%s6117_s1 + $0x20] sm:$0xff] }
 0x1cd   :  { %1966 = vmatpush1.bf16.msra.mxu0 %v1562_v27  ;;  %2294 = vmatpush1.bf16.msra.mxu1 %v1564_v25  ;;  %v628_v27 = vld [vmem:[%s6117_s1 + $0xf50] sm:$0xff]  ;;  %v1626_v25 = vunpack.c.l.s8.bf16 %v626_v26 }
 0x1ce   :  { %1967 = vmatprep.subr.bf16.mxu0 %v1571_v29  ;;  %2295 = vmatprep.subr.bf16.mxu1 %v1573_v30  ;;  %v1628_v29 = vunpack.c.l.s8.bf16 %v628_v27  ;;  %v1635_v30 = vunpack.c.h.s8.bf16 %v627_v12  ;;  %v663_v12 = vunpack.c.h.s8.bf16 %v143_v3 }
 0x1d1   :  { %1968 = vmatpush1.bf16.msra.mxu0 %v1570_v34  ;;  %2296 = vmatpush1.bf16.msra.mxu1 %v1572_v35  ;;  %v637_v34 = vld [vmem:[%s6117_s1 + $0xf98] sm:$0xff]  ;;  %v1634_v35 = vunpack.c.h.s8.bf16 %v626_v26 }
 0x1d2   :  { %1969 = vmatprep.subr.bf16.mxu0 %v1579_v36  ;;  %2297 = vmatprep.subr.bf16.mxu1 %v1581_v37  ;;  %v1636_v36 = vunpack.c.h.s8.bf16 %v628_v27  ;;  %v1643_v37 = vunpack.c.l.s8.bf16 %v635_v32  ;;  %v1645_v39 = vunpack.c.l.s8.bf16 %v637_v34  ;;  %v1653_v47 = vunpack.c.h.s8.bf16 %v637_v34  ;;  %v150_v27 = vld [vmem:[%s6117_s1 + $0x60] sm:$0xff]  ;;  %v159_v34 = vld [vmem:[%s6117_s1 + $0xa8] sm:$0xff] }
 0x1d5   :  { %1970 = vmatpush1.bf16.msra.mxu0 %v1578_v46  ;;  %2298 = vmatpush1.bf16.msra.mxu1 %v1580_v44  ;;  %v636_v46 = vld [vmem:[%s6117_s1 + $0xf90] sm:$0xff]  ;;  %v1642_v44 = vunpack.c.l.s8.bf16 %v634_v40 }
 0x1d6   :  { %1971 = vmatprep.subr.bf16.mxu0 %v1587_v45  ;;  %2299 = vmatprep.subr.bf16.mxu1 %v1589_v41  ;;  %v1644_v45 = vunpack.c.l.s8.bf16 %v636_v46  ;;  %v1651_v41 = vunpack.c.h.s8.bf16 %v635_v32 }
 0x1d9   :  { %1972 = vmatpush1.bf16.msra.mxu0 %v1586_v51  ;;  %2300 = vmatpush1.bf16.msra.mxu1 %v1588_v52  ;;  %v645_v51 = vld [vmem:[%s6117_s1 + $0xfd8] sm:$0xff]  ;;  %v1650_v52 = vunpack.c.h.s8.bf16 %v634_v40  ;;  %v158_v40 = vld [vmem:[%s6117_s1 + $0xa0] sm:$0xff] }
 0x1da   :  { %1973 = vmatprep.subr.bf16.mxu0 %v1595_v53  ;;  %2301 = vmatprep.subr.bf16.mxu1 %v1597_v56  ;;  %v1652_v53 = vunpack.c.h.s8.bf16 %v636_v46  ;;  %v1659_v56 = vunpack.c.l.s8.bf16 %v643_v48  ;;  %v1661_v57 = vunpack.c.l.s8.bf16 %v645_v51  ;;  %v1669_v50 = vunpack.c.h.s8.bf16 %v645_v51  ;;  %v160_v46 = vld [vmem:[%s6117_s1 + $0xb0] sm:$0xff]  ;;  %v169_v51 = vld [vmem:[%s6117_s1 + $0xf8] sm:$0xff] }
 0x1dd   :  { %1974 = vmatpush1.bf16.msra.mxu0 %v1594_v61  ;;  %2302 = vmatpush1.bf16.msra.mxu1 %v1596_v59  ;;  %v644_v61 = vld [vmem:[%s6117_s1 + $0xfd0] sm:$0xff]  ;;  %v1658_v59 = vunpack.c.l.s8.bf16 %v642_v58 }
 0x1de   :  { %1975 = vmatprep.subr.bf16.mxu0 %v1603_v63  ;;  %2303 = vmatprep.subr.bf16.mxu1 %v1605_v0  ;;  %v1660_v63 = vunpack.c.l.s8.bf16 %v644_v61  ;;  %v1667_v0 = vunpack.c.h.s8.bf16 %v643_v48  ;;  %v167_v48 = vld [vmem:[%s6117_s1 + $0xe8] sm:$0xff] }
 0x1e1   :  { %1976 = vmatpush1.bf16.msra.mxu0 %v1602_v4  ;;  %2304 = vmatpush1.bf16.msra.mxu1 %v1604_v7  ;;  %v145_v4 = vld [vmem:[%s6117_s1 + $0x38] sm:$0xff]  ;;  %v1666_v7 = vunpack.c.h.s8.bf16 %v642_v58  ;;  %v166_v58 = vld [vmem:[%s6117_s1 + $0xe0] sm:$0xff] }
 0x1e2   :  { %1977 = vmatprep.subr.bf16.mxu0 %v1611_v8  ;;  %2305 = vmatprep.subr.bf16.mxu1 %v1613_v9  ;;  %v1668_v8 = vunpack.c.h.s8.bf16 %v644_v61  ;;  %v655_v9 = vunpack.c.l.s8.bf16 %v143_v3  ;;  %v657_v42 = vunpack.c.l.s8.bf16 %v145_v4  ;;  %v665_v60 = vunpack.c.h.s8.bf16 %v145_v4  ;;  %v168_v61 = vld [vmem:[%s6117_s1 + $0xf0] sm:$0xff]  ;;  %v175_v3 = vld [vmem:[%s6117_s1 + $0x128] sm:$0xff]  ;;  %v177_v4 = vld [vmem:[%s6117_s1 + $0x138] sm:$0xff] }
 0x1e5   :  { %1978 = vmatpush1.bf16.msra.mxu0 %v1610_v13  ;;  %2306 = vmatpush1.bf16.msra.mxu1 %v1612_v49  ;;  %v144_v13 = vld [vmem:[%s6117_s1 + $0x30] sm:$0xff]  ;;  %v4878_v49 = vpack.c.bf16 %v4760_v1, %v4760_v1  ;;  %v662_v1 = vunpack.c.h.s8.bf16 %v142_v18 }
 0x1e6   :  { %1979 = vmatprep.subr.bf16.mxu0 %v1619_v15  ;;  %2307 = vmatprep.subr.bf16.mxu1 %v1621_v16  ;;  %v654_v15 = vunpack.c.l.s8.bf16 %v142_v18  ;;  %v656_v16 = vunpack.c.l.s8.bf16 %v144_v13  ;;  %v174_v18 = vld [vmem:[%s6117_s1 + $0x120] sm:$0xff] }
 0x1e9   :  { %1980 = vmatpush1.bf16.msra.mxu0 %v1618_v21  ;;  %2308 = vmatpush1.bf16.msra.mxu1 %v1620_v22  ;;  %v151_v21 = vld [vmem:[%s6117_s1 + $0x68] sm:$0xff]  ;;  %v153_v22 = vld [vmem:[%s6117_s1 + $0x78] sm:$0xff] }
 0x1ea   :  { %1981 = vmatprep.subr.bf16.mxu0 %v1627_v23  ;;  %2309 = vmatprep.subr.bf16.mxu1 %v1629_v24  ;;  %v664_v23 = vunpack.c.h.s8.bf16 %v144_v13  ;;  %v671_v24 = vunpack.c.l.s8.bf16 %v151_v21  ;;  %v673_v26 = vunpack.c.l.s8.bf16 %v153_v22  ;;  %v681_v32 = vunpack.c.h.s8.bf16 %v153_v22  ;;  %v176_v13 = vld [vmem:[%s6117_s1 + $0x130] sm:$0xff]  ;;  %v185_v22 = vld [vmem:[%s6117_s1 + $0x178] sm:$0xff] }
 0x1ed   :  { %1982 = vmatpush1.bf16.msra.mxu0 %v1626_v25  ;;  %2310 = vmatpush1.bf16.msra.mxu1 %v1628_v29  ;;  %v152_v25 = vld [vmem:[%s6117_s1 + $0x70] sm:$0xff]  ;;  %v670_v29 = vunpack.c.l.s8.bf16 %v150_v27 }
 0x1ee   :  { %1983 = vmatprep.subr.bf16.mxu0 %v1635_v30  ;;  %2311 = vmatprep.subr.bf16.mxu1 %v1637_v31  ;;  %v672_v30 = vunpack.c.l.s8.bf16 %v152_v25  ;;  %v679_v31 = vunpack.c.h.s8.bf16 %v151_v21  ;;  %v183_v21 = vld [vmem:[%s6117_s1 + $0x168] sm:$0xff] }
 0x1f1   :  { %1984 = vmatpush1.bf16.msra.mxu0 %v1634_v35  ;;  %2312 = vmatpush1.bf16.msra.mxu1 %v1636_v36  ;;  %v161_v35 = vld [vmem:[%s6117_s1 + $0xb8] sm:$0xff]  ;;  %v678_v36 = vunpack.c.h.s8.bf16 %v150_v27  ;;  %v182_v27 = vld [vmem:[%s6117_s1 + $0x160] sm:$0xff] }
 0x1f2   :  { %1985 = vmatprep.subr.bf16.mxu0 %v1643_v37  ;;  %2313 = vmatprep.subr.bf16.mxu1 %v1645_v39  ;;  %v687_v37 = vunpack.c.l.s8.bf16 %v159_v34  ;;  %v689_v39 = vunpack.c.l.s8.bf16 %v161_v35 }
 0x1f5   :  { %1986 = vmatpush1.bf16.msra.mxu0 %v1642_v44  ;;  %2314 = vmatpush1.bf16.msra.mxu1 %v1644_v45  ;;  %v686_v44 = vunpack.c.l.s8.bf16 %v158_v40  ;;  %v688_v45 = vunpack.c.l.s8.bf16 %v160_v46 }
 0x1f6   :  { %1987 = vmatprep.subr.bf16.mxu0 %v1651_v41  ;;  %2315 = vmatprep.subr.bf16.mxu1 %v1653_v47  ;;  %v695_v41 = vunpack.c.h.s8.bf16 %v159_v34  ;;  %v697_v47 = vunpack.c.h.s8.bf16 %v161_v35  ;;  %v191_v34 = vld [vmem:[%s6117_s1 + $0x1a8] sm:$0xff]  ;;  %v193_v35 = vld [vmem:[%s6117_s1 + $0x1b8] sm:$0xff] }
 0x1f9   :  { %1988 = vmatpush1.bf16.msra.mxu0 %v1650_v52  ;;  %2316 = vmatpush1.bf16.msra.mxu1 %v1652_v53  ;;  %v694_v52 = vunpack.c.h.s8.bf16 %v158_v40  ;;  %v696_v53 = vunpack.c.h.s8.bf16 %v160_v46  ;;  %v190_v40 = vld [vmem:[%s6117_s1 + $0x1a0] sm:$0xff]  ;;  %v192_v46 = vld [vmem:[%s6117_s1 + $0x1b0] sm:$0xff] }
 0x1fa   :  { %1989 = vmatprep.subr.bf16.mxu0 %v1659_v56  ;;  %2317 = vmatprep.subr.bf16.mxu1 %v1661_v57  ;;  %v703_v56 = vunpack.c.l.s8.bf16 %v167_v48  ;;  %v705_v57 = vunpack.c.l.s8.bf16 %v169_v51 }
 0x1fd   :  { %1990 = vmatpush1.bf16.msra.mxu0 %v1658_v59  ;;  %2318 = vmatpush1.bf16.msra.mxu1 %v1660_v63  ;;  %v702_v59 = vunpack.c.l.s8.bf16 %v166_v58  ;;  %v704_v63 = vunpack.c.l.s8.bf16 %v168_v61 }
 0x1fe   :  { %1991 = vmatprep.subr.bf16.mxu0 %v1667_v0  ;;  %2319 = vmatprep.subr.bf16.mxu1 %v1669_v50  ;;  %v711_v0 = vunpack.c.h.s8.bf16 %v167_v48  ;;  %v713_v50 = vunpack.c.h.s8.bf16 %v169_v51  ;;  %v199_v48 = vld [vmem:[%s6117_s1 + $0x1e8] sm:$0xff]  ;;  %v201_v51 = vld [vmem:[%s6117_s1 + $0x1f8] sm:$0xff] }
 0x201   :  { %1992 = vmatpush1.bf16.msra.mxu0 %v1666_v7  ;;  %2320 = vmatpush1.bf16.msra.mxu1 %v1668_v8  ;;  %v710_v7 = vunpack.c.h.s8.bf16 %v166_v58  ;;  %v712_v8 = vunpack.c.h.s8.bf16 %v168_v61  ;;  %v198_v58 = vld [vmem:[%s6117_s1 + $0x1e0] sm:$0xff]  ;;  %v200_v61 = vld [vmem:[%s6117_s1 + $0x1f0] sm:$0xff] }
 0x202   :  { %2330 = vmatprep.subr.bf16.mxu0 %v655_v9  ;;  %2658 = vmatprep.subr.bf16.mxu1 %v657_v42  ;;  %v719_v9 = vunpack.c.l.s8.bf16 %v175_v3  ;;  %v721_v42 = vunpack.c.l.s8.bf16 %v177_v4 }
 0x204   :  { %1994 = vmatmul.mubr.bf16.vlgmr.msra.gmra.mrb[0].mxu0 %v4878_v49  ;;  %2322 = vmatmul.mubr.bf16.vlgmr.msra.gmra.mrb[0].mxu1 %v4878_v49 }
 0x205   :  { %2331 = vmatpush1.bf16.msra.mxu0 %v654_v15  ;;  %2659 = vmatpush1.bf16.msra.mxu1 %v656_v16  ;;  %v718_v15 = vunpack.c.l.s8.bf16 %v174_v18  ;;  %v720_v16 = vunpack.c.l.s8.bf16 %v176_v13 }
 0x206   :  { %2332 = vmatprep.subr.bf16.mxu0 %v663_v12  ;;  %2660 = vmatprep.subr.bf16.mxu1 %v665_v60  ;;  %v727_v12 = vunpack.c.h.s8.bf16 %v175_v3  ;;  %v729_v60 = vunpack.c.h.s8.bf16 %v177_v4  ;;  %v207_v3 = vld [vmem:[%s6117_s1 + $0x228] sm:$0xff]  ;;  %v209_v4 = vld [vmem:[%s6117_s1 + $0x238] sm:$0xff] }
 0x207   :  { %2362 = vmatprep.mubr.bf16.mxu0 %v4009_v55  ;;  %2690 = vmatprep.mubr.bf16.mxu1 %v4009_v55  ;;  %v680_v55 = vunpack.c.h.s8.bf16 %v152_v25  ;;  %v184_v25 = vld [vmem:[%s6117_s1 + $0x170] sm:$0xff] }
 0x209   :  { %2333 = vmatpush1.bf16.msra.mxu0 %v662_v1  ;;  %2661 = vmatpush1.bf16.msra.mxu1 %v664_v23  ;;  %v726_v1 = vunpack.c.h.s8.bf16 %v174_v18  ;;  %v728_v23 = vunpack.c.h.s8.bf16 %v176_v13  ;;  %v206_v18 = vld [vmem:[%s6117_s1 + $0x220] sm:$0xff]  ;;  %v208_v13 = vld [vmem:[%s6117_s1 + $0x230] sm:$0xff] }
 0x20a   :  { %2334 = vmatprep.subr.bf16.mxu0 %v671_v24  ;;  %2662 = vmatprep.subr.bf16.mxu1 %v673_v26  ;;  %v735_v24 = vunpack.c.l.s8.bf16 %v183_v21  ;;  %v737_v26 = vunpack.c.l.s8.bf16 %v185_v22 }
 0x20d   :  { %2335 = vmatpush1.bf16.msra.mxu0 %v670_v29  ;;  %2663 = vmatpush1.bf16.msra.mxu1 %v672_v30  ;;  %v734_v29 = vunpack.c.l.s8.bf16 %v182_v27  ;;  %v736_v30 = vunpack.c.l.s8.bf16 %v184_v25 }
 0x20e   :  { %2336 = vmatprep.subr.bf16.mxu0 %v679_v31  ;;  %2664 = vmatprep.subr.bf16.mxu1 %v681_v32  ;;  %v743_v31 = vunpack.c.h.s8.bf16 %v183_v21  ;;  %v745_v32 = vunpack.c.h.s8.bf16 %v185_v22  ;;  %v215_v21 = vld [vmem:[%s6117_s1 + $0x268] sm:$0xff]  ;;  %v217_v22 = vld [vmem:[%s6117_s1 + $0x278] sm:$0xff] }
 0x211   :  { %2337 = vmatpush1.bf16.msra.mxu0 %v678_v36  ;;  %2665 = vmatpush1.bf16.msra.mxu1 %v680_v55  ;;  %v742_v36 = vunpack.c.h.s8.bf16 %v182_v27  ;;  %v744_v55 = vunpack.c.h.s8.bf16 %v184_v25  ;;  %v214_v27 = vld [vmem:[%s6117_s1 + $0x260] sm:$0xff]  ;;  %v216_v25 = vld [vmem:[%s6117_s1 + $0x270] sm:$0xff] }
 0x212   :  { %2338 = vmatprep.subr.bf16.mxu0 %v687_v37  ;;  %2666 = vmatprep.subr.bf16.mxu1 %v689_v39  ;;  %v751_v37 = vunpack.c.l.s8.bf16 %v191_v34  ;;  %v753_v39 = vunpack.c.l.s8.bf16 %v193_v35 }
 0x215   :  { %2339 = vmatpush1.bf16.msra.mxu0 %v686_v44  ;;  %2667 = vmatpush1.bf16.msra.mxu1 %v688_v45  ;;  %v750_v44 = vunpack.c.l.s8.bf16 %v190_v40  ;;  %v752_v45 = vunpack.c.l.s8.bf16 %v192_v46 }
 0x216   :  { %2340 = vmatprep.subr.bf16.mxu0 %v695_v41  ;;  %2668 = vmatprep.subr.bf16.mxu1 %v697_v47  ;;  %v759_v41 = vunpack.c.h.s8.bf16 %v191_v34  ;;  %v761_v47 = vunpack.c.h.s8.bf16 %v193_v35  ;;  %v225_v34 = vld [vmem:[%s6117_s1 + $0x2b8] sm:$0xff]  ;;  %v806_v35 = vunpack.c.h.s8.bf16 %v214_v27 }
 0x219   :  { %2341 = vmatpush1.bf16.msra.mxu0 %v694_v52  ;;  %2669 = vmatpush1.bf16.msra.mxu1 %v696_v53  ;;  %v758_v52 = vunpack.c.h.s8.bf16 %v190_v40  ;;  %v760_v53 = vunpack.c.h.s8.bf16 %v192_v46 }
 0x21a   :  { %2342 = vmatprep.subr.bf16.mxu0 %v703_v56  ;;  %2670 = vmatprep.subr.bf16.mxu1 %v705_v57  ;;  %v767_v56 = vunpack.c.l.s8.bf16 %v199_v48  ;;  %v769_v57 = vunpack.c.l.s8.bf16 %v201_v51 }
 0x21d   :  { %2343 = vmatpush1.bf16.msra.mxu0 %v702_v59  ;;  %2671 = vmatpush1.bf16.msra.mxu1 %v704_v63  ;;  %v766_v59 = vunpack.c.l.s8.bf16 %v198_v58  ;;  %v768_v63 = vunpack.c.l.s8.bf16 %v200_v61 }
 0x21e   :  { %2344 = vmatprep.subr.bf16.mxu0 %v711_v0  ;;  %2672 = vmatprep.subr.bf16.mxu1 %v713_v50  ;;  %v775_v0 = vunpack.c.h.s8.bf16 %v199_v48  ;;  %v777_v50 = vunpack.c.h.s8.bf16 %v201_v51 }
 0x221   :  { %2345 = vmatpush1.bf16.msra.mxu0 %v710_v7  ;;  %2673 = vmatpush1.bf16.msra.mxu1 %v712_v8  ;;  %v774_v7 = vunpack.c.h.s8.bf16 %v198_v58  ;;  %v776_v8 = vunpack.c.h.s8.bf16 %v200_v61 }
 0x222   :  { %2346 = vmatprep.subr.bf16.mxu0 %v719_v9  ;;  %2674 = vmatprep.subr.bf16.mxu1 %v721_v42  ;;  %v783_v9 = vunpack.c.l.s8.bf16 %v207_v3  ;;  %v785_v42 = vunpack.c.l.s8.bf16 %v209_v4 }
 0x225   :  { %2347 = vmatpush1.bf16.msra.mxu0 %v718_v15  ;;  %2675 = vmatpush1.bf16.msra.mxu1 %v720_v16  ;;  %v782_v15 = vunpack.c.l.s8.bf16 %v206_v18  ;;  %v784_v16 = vunpack.c.l.s8.bf16 %v208_v13 }
 0x226   :  { %2348 = vmatprep.subr.bf16.mxu0 %v727_v12  ;;  %2676 = vmatprep.subr.bf16.mxu1 %v729_v60  ;;  %v791_v12 = vunpack.c.h.s8.bf16 %v207_v3  ;;  %v793_v60 = vunpack.c.h.s8.bf16 %v209_v4 }
 0x229   :  { %2349 = vmatpush1.bf16.msra.mxu0 %v726_v1  ;;  %2677 = vmatpush1.bf16.msra.mxu1 %v728_v23  ;;  %v790_v1 = vunpack.c.h.s8.bf16 %v206_v18  ;;  %v792_v23 = vunpack.c.h.s8.bf16 %v208_v13 }
 0x22a   :  { %2350 = vmatprep.subr.bf16.mxu0 %v735_v24  ;;  %2678 = vmatprep.subr.bf16.mxu1 %v737_v26  ;;  %v799_v24 = vunpack.c.l.s8.bf16 %v215_v21  ;;  %v801_v26 = vunpack.c.l.s8.bf16 %v217_v22 }
 0x22d   :  { %2351 = vmatpush1.bf16.msra.mxu0 %v734_v29  ;;  %2679 = vmatpush1.bf16.msra.mxu1 %v736_v30  ;;  %v800_v29 = vunpack.c.l.s8.bf16 %v216_v25  ;;  %v807_v30 = vunpack.c.h.s8.bf16 %v215_v21 }
 0x22e   :  { %2352 = vmatprep.subr.bf16.mxu0 %v743_v31  ;;  %2680 = vmatprep.subr.bf16.mxu1 %v745_v32  ;;  %v809_v31 = vunpack.c.h.s8.bf16 %v217_v22  ;;  %v223_v32 = vld [vmem:[%s6117_s1 + $0x2a8] sm:$0xff] }
 0x231   :  { %2353 = vmatpush1.bf16.msra.mxu0 %v742_v36  ;;  %2681 = vmatpush1.bf16.msra.mxu1 %v744_v55  ;;  %v815_v36 = vunpack.c.l.s8.bf16 %v223_v32  ;;  %v817_v55 = vunpack.c.l.s8.bf16 %v225_v34 }
 0x232   :  { %2354 = vmatprep.subr.bf16.mxu0 %v751_v37  ;;  %2682 = vmatprep.subr.bf16.mxu1 %v753_v39  ;;  %v222_v37 = vld [vmem:[%s6117_s1 + $0x2a0] sm:$0xff]  ;;  %v224_v39 = vld [vmem:[%s6117_s1 + $0x2b0] sm:$0xff] }
 0x233   :  { %v814_v40 = vunpack.c.l.s8.bf16 %v222_v37  ;;  %v816_v46 = vunpack.c.l.s8.bf16 %v224_v39  ;;  %v822_v48 = vunpack.c.h.s8.bf16 %v222_v37  ;;  %v824_v51 = vunpack.c.h.s8.bf16 %v224_v39 }
 0x235   :  { %2355 = vmatpush1.bf16.msra.mxu0 %v750_v44  ;;  %2683 = vmatpush1.bf16.msra.mxu1 %v752_v45  ;;  %v823_v44 = vunpack.c.h.s8.bf16 %v223_v32  ;;  %v825_v45 = vunpack.c.h.s8.bf16 %v225_v34 }
 0x236   :  { %2356 = vmatprep.subr.bf16.mxu0 %v759_v41  ;;  %2684 = vmatprep.subr.bf16.mxu1 %v761_v47  ;;  %v231_v41 = vld [vmem:[%s6117_s1 + $0x2e8] sm:$0xff]  ;;  %v233_v47 = vld [vmem:[%s6117_s1 + $0x2f8] sm:$0xff] }
 0x239   :  { %2357 = vmatpush1.bf16.msra.mxu0 %v758_v52  ;;  %2685 = vmatpush1.bf16.msra.mxu1 %v760_v53  ;;  %v831_v52 = vunpack.c.l.s8.bf16 %v231_v41  ;;  %v833_v53 = vunpack.c.l.s8.bf16 %v233_v47 }
 0x23a   :  { %2358 = vmatprep.subr.bf16.mxu0 %v767_v56  ;;  %2686 = vmatprep.subr.bf16.mxu1 %v769_v57  ;;  %v230_v56 = vld [vmem:[%s6117_s1 + $0x2e0] sm:$0xff]  ;;  %v232_v57 = vld [vmem:[%s6117_s1 + $0x2f0] sm:$0xff] }
 0x23b   :  { %v830_v58 = vunpack.c.l.s8.bf16 %v230_v56  ;;  %v832_v61 = vunpack.c.l.s8.bf16 %v232_v57  ;;  %v838_v3 = vunpack.c.h.s8.bf16 %v230_v56  ;;  %v840_v4 = vunpack.c.h.s8.bf16 %v232_v57 }
 0x23d   :  { %2359 = vmatpush1.bf16.msra.mxu0 %v766_v59  ;;  %2687 = vmatpush1.bf16.msra.mxu1 %v768_v63  ;;  %v839_v59 = vunpack.c.h.s8.bf16 %v231_v41  ;;  %v841_v63 = vunpack.c.h.s8.bf16 %v233_v47 }
 0x23e   :  { %2360 = vmatprep.subr.bf16.mxu0 %v775_v0  ;;  %2688 = vmatprep.subr.bf16.mxu1 %v777_v50  ;;  %v239_v0 = vld [vmem:[%s6117_s1 + $0x328] sm:$0xff]  ;;  %v241_v50 = vld [vmem:[%s6117_s1 + $0x338] sm:$0xff] }
 0x241   :  { %2361 = vmatpush1.bf16.msra.mxu0 %v774_v7  ;;  %2689 = vmatpush1.bf16.msra.mxu1 %v776_v8  ;;  %v847_v7 = vunpack.c.l.s8.bf16 %v239_v0  ;;  %v849_v8 = vunpack.c.l.s8.bf16 %v241_v50 }
 0x242   :  { %2371 = vmatprep.subr.bf16.mxu0 %v783_v9  ;;  %2699 = vmatprep.subr.bf16.mxu1 %v785_v42  ;;  %v238_v9 = vld [vmem:[%s6117_s1 + $0x320] sm:$0xff]  ;;  %v240_v42 = vld [vmem:[%s6117_s1 + $0x330] sm:$0xff] }
 0x243   :  { %v846_v18 = vunpack.c.l.s8.bf16 %v238_v9  ;;  %v848_v13 = vunpack.c.l.s8.bf16 %v240_v42  ;;  %v854_v21 = vunpack.c.h.s8.bf16 %v238_v9  ;;  %v856_v22 = vunpack.c.h.s8.bf16 %v240_v42 }
 0x244   :  { %2363 = vmatmul.mubr.bf16.vlgmr.msra.gmra.mrb[4].mxu0 %v4082_v54  ;;  %2691 = vmatmul.mubr.bf16.vlgmr.msra.gmra.mrb[4].mxu1 %v4082_v54  ;;  %v798_v54 = vunpack.c.l.s8.bf16 %v214_v27 }
 0x245   :  { %2372 = vmatpush1.bf16.msra.mxu0 %v782_v15  ;;  %2700 = vmatpush1.bf16.msra.mxu1 %v784_v16  ;;  %v855_v15 = vunpack.c.h.s8.bf16 %v239_v0  ;;  %v857_v16 = vunpack.c.h.s8.bf16 %v241_v50 }
 0x246   :  { %2373 = vmatprep.subr.bf16.mxu0 %v791_v12  ;;  %2701 = vmatprep.subr.bf16.mxu1 %v793_v60  ;;  %v247_v12 = vld [vmem:[%s6117_s1 + $0x368] sm:$0xff]  ;;  %v249_v60 = vld [vmem:[%s6117_s1 + $0x378] sm:$0xff] }
 0x247   :  { %2403 = vmatprep.mubr.bf16.mxu0 %v4090_v62  ;;  %2731 = vmatprep.mubr.bf16.mxu1 %v4090_v62  ;;  %v808_v62 = vunpack.c.h.s8.bf16 %v216_v25 }
 0x249   :  { %2374 = vmatpush1.bf16.msra.mxu0 %v790_v1  ;;  %2702 = vmatpush1.bf16.msra.mxu1 %v792_v23  ;;  %v863_v1 = vunpack.c.l.s8.bf16 %v247_v12  ;;  %v865_v23 = vunpack.c.l.s8.bf16 %v249_v60 }
 0x24a   :  { %2375 = vmatprep.subr.bf16.mxu0 %v799_v24  ;;  %2703 = vmatprep.subr.bf16.mxu1 %v801_v26  ;;  %v246_v24 = vld [vmem:[%s6117_s1 + $0x360] sm:$0xff]  ;;  %v248_v26 = vld [vmem:[%s6117_s1 + $0x370] sm:$0xff] }
 0x24b   :  { %v862_v27 = vunpack.c.l.s8.bf16 %v246_v24  ;;  %v864_v25 = vunpack.c.l.s8.bf16 %v248_v26  ;;  %v870_v32 = vunpack.c.h.s8.bf16 %v246_v24  ;;  %v872_v34 = vunpack.c.h.s8.bf16 %v248_v26 }
 0x24d   :  { %2376 = vmatpush1.bf16.msra.mxu0 %v798_v54  ;;  %2704 = vmatpush1.bf16.msra.mxu1 %v800_v29  ;;  %v871_v54 = vunpack.c.h.s8.bf16 %v247_v12  ;;  %v873_v29 = vunpack.c.h.s8.bf16 %v249_v60 }
 0x24e   :  { %2377 = vmatprep.subr.bf16.mxu0 %v807_v30  ;;  %2705 = vmatprep.subr.bf16.mxu1 %v809_v31  ;;  %v255_v30 = vld [vmem:[%s6117_s1 + $0x3a8] sm:$0xff]  ;;  %v257_v31 = vld [vmem:[%s6117_s1 + $0x3b8] sm:$0xff] }
 0x251   :  { %2378 = vmatpush1.bf16.msra.mxu0 %v806_v35  ;;  %2706 = vmatpush1.bf16.msra.mxu1 %v808_v62  ;;  %v879_v35 = vunpack.c.l.s8.bf16 %v255_v30  ;;  %v881_v62 = vunpack.c.l.s8.bf16 %v257_v31 }
 0x252   :  { %2379 = vmatprep.subr.bf16.mxu0 %v815_v36  ;;  %2707 = vmatprep.subr.bf16.mxu1 %v817_v55  ;;  %v254_v36 = vld [vmem:[%s6117_s1 + $0x3a0] sm:$0xff]  ;;  %v256_v55 = vld [vmem:[%s6117_s1 + $0x3b0] sm:$0xff] }
 0x253   :  { %v878_v37 = vunpack.c.l.s8.bf16 %v254_v36  ;;  %v880_v39 = vunpack.c.l.s8.bf16 %v256_v55  ;;  %v886_v41 = vunpack.c.h.s8.bf16 %v254_v36  ;;  %v888_v47 = vunpack.c.h.s8.bf16 %v256_v55 }
 0x255   :  { %2380 = vmatpush1.bf16.msra.mxu0 %v814_v40  ;;  %2708 = vmatpush1.bf16.msra.mxu1 %v816_v46  ;;  %v887_v40 = vunpack.c.h.s8.bf16 %v255_v30  ;;  %v889_v46 = vunpack.c.h.s8.bf16 %v257_v31 }
 0x256   :  { %2381 = vmatprep.subr.bf16.mxu0 %v823_v44  ;;  %2709 = vmatprep.subr.bf16.mxu1 %v825_v45  ;;  %v263_v44 = vld [vmem:[%s6117_s1 + $0x3e8] sm:$0xff]  ;;  %v265_v45 = vld [vmem:[%s6117_s1 + $0x3f8] sm:$0xff] }
 0x259   :  { %2382 = vmatpush1.bf16.msra.mxu0 %v822_v48  ;;  %2710 = vmatpush1.bf16.msra.mxu1 %v824_v51  ;;  %v895_v48 = vunpack.c.l.s8.bf16 %v263_v44  ;;  %v897_v51 = vunpack.c.l.s8.bf16 %v265_v45 }
 0x25a   :  { %2383 = vmatprep.subr.bf16.mxu0 %v831_v52  ;;  %2711 = vmatprep.subr.bf16.mxu1 %v833_v53  ;;  %v262_v52 = vld [vmem:[%s6117_s1 + $0x3e0] sm:$0xff]  ;;  %v264_v53 = vld [vmem:[%s6117_s1 + $0x3f0] sm:$0xff] }
 0x25b   :  { %v894_v56 = vunpack.c.l.s8.bf16 %v262_v52  ;;  %v896_v57 = vunpack.c.l.s8.bf16 %v264_v53  ;;  %v902_v0 = vunpack.c.h.s8.bf16 %v262_v52  ;;  %v904_v50 = vunpack.c.h.s8.bf16 %v264_v53 }
 0x25d   :  { %2384 = vmatpush1.bf16.msra.mxu0 %v830_v58  ;;  %2712 = vmatpush1.bf16.msra.mxu1 %v832_v61  ;;  %v903_v58 = vunpack.c.h.s8.bf16 %v263_v44  ;;  %v905_v61 = vunpack.c.h.s8.bf16 %v265_v45 }
 0x25e   :  { %2385 = vmatprep.subr.bf16.mxu0 %v839_v59  ;;  %2713 = vmatprep.subr.bf16.mxu1 %v841_v63  ;;  %v271_v59 = vld [vmem:[%s6117_s1 + $0x428] sm:$0xff]  ;;  %v273_v63 = vld [vmem:[%s6117_s1 + $0x438] sm:$0xff] }
 0x261   :  { %2386 = vmatpush1.bf16.msra.mxu0 %v838_v3  ;;  %2714 = vmatpush1.bf16.msra.mxu1 %v840_v4  ;;  %v911_v3 = vunpack.c.l.s8.bf16 %v271_v59  ;;  %v913_v4 = vunpack.c.l.s8.bf16 %v273_v63 }
 0x262   :  { %2387 = vmatprep.subr.bf16.mxu0 %v847_v7  ;;  %2715 = vmatprep.subr.bf16.mxu1 %v849_v8  ;;  %v270_v7 = vld [vmem:[%s6117_s1 + $0x420] sm:$0xff]  ;;  %v272_v8 = vld [vmem:[%s6117_s1 + $0x430] sm:$0xff] }
 0x263   :  { %v910_v9 = vunpack.c.l.s8.bf16 %v270_v7  ;;  %v912_v42 = vunpack.c.l.s8.bf16 %v272_v8  ;;  %v918_v12 = vunpack.c.h.s8.bf16 %v270_v7  ;;  %v920_v60 = vunpack.c.h.s8.bf16 %v272_v8 }
 0x265   :  { %2388 = vmatpush1.bf16.msra.mxu0 %v846_v18  ;;  %2716 = vmatpush1.bf16.msra.mxu1 %v848_v13  ;;  %v919_v18 = vunpack.c.h.s8.bf16 %v271_v59  ;;  %v921_v13 = vunpack.c.h.s8.bf16 %v273_v63 }
 0x266   :  { %2389 = vmatprep.subr.bf16.mxu0 %v855_v15  ;;  %2717 = vmatprep.subr.bf16.mxu1 %v857_v16  ;;  %v279_v15 = vld [vmem:[%s6117_s1 + $0x468] sm:$0xff]  ;;  %v281_v16 = vld [vmem:[%s6117_s1 + $0x478] sm:$0xff] }
 0x267   :  { %v935_v26 = vunpack.c.h.s8.bf16 %v279_v15 }
 0x269   :  { %2390 = vmatpush1.bf16.msra.mxu0 %v854_v21  ;;  %2718 = vmatpush1.bf16.msra.mxu1 %v856_v22  ;;  %v927_v21 = vunpack.c.l.s8.bf16 %v279_v15  ;;  %v929_v22 = vunpack.c.l.s8.bf16 %v281_v16 }
 0x26a   :  { %2391 = vmatprep.subr.bf16.mxu0 %v863_v1  ;;  %2719 = vmatprep.subr.bf16.mxu1 %v865_v23  ;;  %v278_v1 = vld [vmem:[%s6117_s1 + $0x460] sm:$0xff]  ;;  %v280_v23 = vld [vmem:[%s6117_s1 + $0x470] sm:$0xff] }
 0x26b   :  { %v928_v24 = vunpack.c.l.s8.bf16 %v280_v23 }
 0x26d   :  { %2392 = vmatpush1.bf16.msra.mxu0 %v862_v27  ;;  %2720 = vmatpush1.bf16.msra.mxu1 %v864_v25  ;;  %v937_v27 = vunpack.c.h.s8.bf16 %v281_v16  ;;  %v287_v25 = vld [vmem:[%s6117_s1 + $0x4a8] sm:$0xff] }
 0x26e   :  { %2393 = vmatprep.subr.bf16.mxu0 %v871_v54  ;;  %2721 = vmatprep.subr.bf16.mxu1 %v873_v29  ;;  %v289_v54 = vld [vmem:[%s6117_s1 + $0x4b8] sm:$0xff]  ;;  %v934_v29 = vunpack.c.h.s8.bf16 %v278_v1  ;;  %v943_v30 = vunpack.c.l.s8.bf16 %v287_v25  ;;  %v951_v36 = vunpack.c.h.s8.bf16 %v287_v25 }
 0x26f   :  { %v945_v31 = vunpack.c.l.s8.bf16 %v289_v54  ;;  %v953_v55 = vunpack.c.h.s8.bf16 %v289_v54 }
 0x271   :  { %2394 = vmatpush1.bf16.msra.mxu0 %v870_v32  ;;  %2722 = vmatpush1.bf16.msra.mxu1 %v872_v34  ;;  %v286_v32 = vld [vmem:[%s6117_s1 + $0x4a0] sm:$0xff]  ;;  %v288_v34 = vld [vmem:[%s6117_s1 + $0x4b0] sm:$0xff] }
 0x272   :  { %2395 = vmatprep.subr.bf16.mxu0 %v879_v35  ;;  %2723 = vmatprep.subr.bf16.mxu1 %v881_v62  ;;  %v942_v35 = vunpack.c.l.s8.bf16 %v286_v32  ;;  %v944_v62 = vunpack.c.l.s8.bf16 %v288_v34 }
 0x275   :  { %2396 = vmatpush1.bf16.msra.mxu0 %v878_v37  ;;  %2724 = vmatpush1.bf16.msra.mxu1 %v880_v39  ;;  %v295_v37 = vld [vmem:[%s6117_s1 + $0x4e8] sm:$0xff]  ;;  %v297_v39 = vld [vmem:[%s6117_s1 + $0x4f8] sm:$0xff] }
 0x276   :  { %2397 = vmatprep.subr.bf16.mxu0 %v887_v40  ;;  %2725 = vmatprep.subr.bf16.mxu1 %v889_v46  ;;  %v950_v40 = vunpack.c.h.s8.bf16 %v286_v32  ;;  %v952_v46 = vunpack.c.h.s8.bf16 %v288_v34  ;;  %v959_v44 = vunpack.c.l.s8.bf16 %v295_v37  ;;  %v961_v45 = vunpack.c.l.s8.bf16 %v297_v39 }
 0x277   :  { %v967_v52 = vunpack.c.h.s8.bf16 %v295_v37  ;;  %v969_v53 = vunpack.c.h.s8.bf16 %v297_v39 }
 0x279   :  { %2398 = vmatpush1.bf16.msra.mxu0 %v886_v41  ;;  %2726 = vmatpush1.bf16.msra.mxu1 %v888_v47  ;;  %v294_v41 = vld [vmem:[%s6117_s1 + $0x4e0] sm:$0xff]  ;;  %v296_v47 = vld [vmem:[%s6117_s1 + $0x4f0] sm:$0xff] }
 0x27a   :  { %2399 = vmatprep.subr.bf16.mxu0 %v895_v48  ;;  %2727 = vmatprep.subr.bf16.mxu1 %v897_v51  ;;  %v958_v48 = vunpack.c.l.s8.bf16 %v294_v41  ;;  %v960_v51 = vunpack.c.l.s8.bf16 %v296_v47 }
 0x27d   :  { %2400 = vmatpush1.bf16.msra.mxu0 %v894_v56  ;;  %2728 = vmatpush1.bf16.msra.mxu1 %v896_v57  ;;  %v303_v56 = vld [vmem:[%s6117_s1 + $0x528] sm:$0xff]  ;;  %v305_v57 = vld [vmem:[%s6117_s1 + $0x538] sm:$0xff] }
 0x27e   :  { %2401 = vmatprep.subr.bf16.mxu0 %v903_v58  ;;  %2729 = vmatprep.subr.bf16.mxu1 %v905_v61  ;;  %v966_v58 = vunpack.c.h.s8.bf16 %v294_v41  ;;  %v968_v61 = vunpack.c.h.s8.bf16 %v296_v47  ;;  %v975_v59 = vunpack.c.l.s8.bf16 %v303_v56  ;;  %v977_v63 = vunpack.c.l.s8.bf16 %v305_v57 }
 0x27f   :  { %v983_v7 = vunpack.c.h.s8.bf16 %v303_v56  ;;  %v985_v8 = vunpack.c.h.s8.bf16 %v305_v57 }
 0x281   :  { %2402 = vmatpush1.bf16.msra.mxu0 %v902_v0  ;;  %2730 = vmatpush1.bf16.msra.mxu1 %v904_v50  ;;  %v302_v0 = vld [vmem:[%s6117_s1 + $0x520] sm:$0xff]  ;;  %v304_v50 = vld [vmem:[%s6117_s1 + $0x530] sm:$0xff] }
 0x282   :  { %2412 = vmatprep.subr.bf16.mxu0 %v911_v3  ;;  %2740 = vmatprep.subr.bf16.mxu1 %v913_v4  ;;  %v974_v3 = vunpack.c.l.s8.bf16 %v302_v0  ;;  %v976_v4 = vunpack.c.l.s8.bf16 %v304_v50 }
 0x284   :  { %2404 = vmatmul.mubr.bf16.vlgmr.msra.gmra.mrb[4].mxu0 %v4199_v33  ;;  %2732 = vmatmul.mubr.bf16.vlgmr.msra.gmra.mrb[4].mxu1 %v4199_v33  ;;  %v926_v33 = vunpack.c.l.s8.bf16 %v278_v1 }
 0x285   :  { %2413 = vmatpush1.bf16.msra.mxu0 %v910_v9  ;;  %2741 = vmatpush1.bf16.msra.mxu1 %v912_v42  ;;  %v311_v9 = vld [vmem:[%s6117_s1 + $0x568] sm:$0xff]  ;;  %v313_v42 = vld [vmem:[%s6117_s1 + $0x578] sm:$0xff] }
 0x286   :  { %2414 = vmatprep.subr.bf16.mxu0 %v919_v18  ;;  %2742 = vmatprep.subr.bf16.mxu1 %v921_v13  ;;  %v982_v18 = vunpack.c.h.s8.bf16 %v302_v0  ;;  %v984_v13 = vunpack.c.h.s8.bf16 %v304_v50  ;;  %v991_v15 = vunpack.c.l.s8.bf16 %v311_v9  ;;  %v993_v16 = vunpack.c.l.s8.bf16 %v313_v42 }
 0x287   :  { %2444 = vmatprep.mubr.bf16.mxu0 %v4207_v43  ;;  %2772 = vmatprep.mubr.bf16.mxu1 %v4207_v43  ;;  %v936_v43 = vunpack.c.h.s8.bf16 %v280_v23  ;;  %v999_v1 = vunpack.c.h.s8.bf16 %v311_v9  ;;  %v1001_v23 = vunpack.c.h.s8.bf16 %v313_v42 }
 0x289   :  { %2415 = vmatpush1.bf16.msra.mxu0 %v918_v12  ;;  %2743 = vmatpush1.bf16.msra.mxu1 %v920_v60  ;;  %v310_v12 = vld [vmem:[%s6117_s1 + $0x560] sm:$0xff]  ;;  %v312_v60 = vld [vmem:[%s6117_s1 + $0x570] sm:$0xff] }
 0x28a   :  { %2416 = vmatprep.subr.bf16.mxu0 %v927_v21  ;;  %2744 = vmatprep.subr.bf16.mxu1 %v929_v22  ;;  %v990_v21 = vunpack.c.l.s8.bf16 %v310_v12  ;;  %v992_v22 = vunpack.c.l.s8.bf16 %v312_v60 }
 0x28d   :  { %2417 = vmatpush1.bf16.msra.mxu0 %v926_v33  ;;  %2745 = vmatpush1.bf16.msra.mxu1 %v928_v24  ;;  %v319_v33 = vld [vmem:[%s6117_s1 + $0x5a8] sm:$0xff]  ;;  %v321_v24 = vld [vmem:[%s6117_s1 + $0x5b8] sm:$0xff] }
 0x28e   :  { %2418 = vmatprep.subr.bf16.mxu0 %v935_v26  ;;  %2746 = vmatprep.subr.bf16.mxu1 %v937_v27  ;;  %v998_v26 = vunpack.c.h.s8.bf16 %v310_v12  ;;  %v1000_v27 = vunpack.c.h.s8.bf16 %v312_v60  ;;  %v1007_v25 = vunpack.c.l.s8.bf16 %v319_v33  ;;  %v1009_v54 = vunpack.c.l.s8.bf16 %v321_v24  ;;  %v351_v60 = vld [vmem:[%s6117_s1 + $0x6a8] sm:$0xff] }
 0x28f   :  { %v1015_v32 = vunpack.c.h.s8.bf16 %v319_v33  ;;  %v1017_v34 = vunpack.c.h.s8.bf16 %v321_v24  ;;  %v350_v33 = vld [vmem:[%s6117_s1 + $0x6a0] sm:$0xff]  ;;  %v352_v24 = vld [vmem:[%s6117_s1 + $0x6b0] sm:$0xff] }
 0x291   :  { %2419 = vmatpush1.bf16.msra.mxu0 %v934_v29  ;;  %2747 = vmatpush1.bf16.msra.mxu1 %v936_v43  ;;  %v318_v29 = vld [vmem:[%s6117_s1 + $0x5a0] sm:$0xff]  ;;  %v320_v43 = vld [vmem:[%s6117_s1 + $0x5b0] sm:$0xff] }
 0x292   :  { %2420 = vmatprep.subr.bf16.mxu0 %v943_v30  ;;  %2748 = vmatprep.subr.bf16.mxu1 %v945_v31  ;;  %v1006_v30 = vunpack.c.l.s8.bf16 %v318_v29  ;;  %v1008_v31 = vunpack.c.l.s8.bf16 %v320_v43 }
 0x295   :  { %2421 = vmatpush1.bf16.msra.mxu0 %v942_v35  ;;  %2749 = vmatpush1.bf16.msra.mxu1 %v944_v62  ;;  %v327_v35 = vld [vmem:[%s6117_s1 + $0x5e8] sm:$0xff]  ;;  %v329_v62 = vld [vmem:[%s6117_s1 + $0x5f8] sm:$0xff] }
 0x296   :  { %2422 = vmatprep.subr.bf16.mxu0 %v951_v36  ;;  %2750 = vmatprep.subr.bf16.mxu1 %v953_v55  ;;  %v1014_v36 = vunpack.c.h.s8.bf16 %v318_v29  ;;  %v1016_v55 = vunpack.c.h.s8.bf16 %v320_v43  ;;  %v1023_v37 = vunpack.c.l.s8.bf16 %v327_v35  ;;  %v1025_v39 = vunpack.c.l.s8.bf16 %v329_v62  ;;  %v359_v29 = vld [vmem:[%s6117_s1 + $0x6e8] sm:$0xff]  ;;  %v361_v43 = vld [vmem:[%s6117_s1 + $0x6f8] sm:$0xff] }
 0x297   :  { %v1031_v41 = vunpack.c.h.s8.bf16 %v327_v35  ;;  %v1033_v47 = vunpack.c.h.s8.bf16 %v329_v62  ;;  %v358_v35 = vld [vmem:[%s6117_s1 + $0x6e0] sm:$0xff]  ;;  %v360_v62 = vld [vmem:[%s6117_s1 + $0x6f0] sm:$0xff] }
 0x299   :  { %2423 = vmatpush1.bf16.msra.mxu0 %v950_v40  ;;  %2751 = vmatpush1.bf16.msra.mxu1 %v952_v46  ;;  %v326_v40 = vld [vmem:[%s6117_s1 + $0x5e0] sm:$0xff]  ;;  %v328_v46 = vld [vmem:[%s6117_s1 + $0x5f0] sm:$0xff] }
 0x29a   :  { %2424 = vmatprep.subr.bf16.mxu0 %v959_v44  ;;  %2752 = vmatprep.subr.bf16.mxu1 %v961_v45  ;;  %v1022_v44 = vunpack.c.l.s8.bf16 %v326_v40  ;;  %v1024_v45 = vunpack.c.l.s8.bf16 %v328_v46 }
 0x29d   :  { %2425 = vmatpush1.bf16.msra.mxu0 %v958_v48  ;;  %2753 = vmatpush1.bf16.msra.mxu1 %v960_v51  ;;  %v335_v48 = vld [vmem:[%s6117_s1 + $0x628] sm:$0xff]  ;;  %v337_v51 = vld [vmem:[%s6117_s1 + $0x638] sm:$0xff] }
 0x29e   :  { %2426 = vmatprep.subr.bf16.mxu0 %v967_v52  ;;  %2754 = vmatprep.subr.bf16.mxu1 %v969_v53  ;;  %v1030_v52 = vunpack.c.h.s8.bf16 %v326_v40  ;;  %v1032_v53 = vunpack.c.h.s8.bf16 %v328_v46  ;;  %v1039_v56 = vunpack.c.l.s8.bf16 %v335_v48  ;;  %v1041_v57 = vunpack.c.l.s8.bf16 %v337_v51 }
 0x29f   :  { %v1047_v0 = vunpack.c.h.s8.bf16 %v335_v48  ;;  %v1049_v50 = vunpack.c.h.s8.bf16 %v337_v51  ;;  %v1095_v48 = vunpack.c.h.s8.bf16 %v359_v29  ;;  %v1097_v51 = vunpack.c.h.s8.bf16 %v361_v43 }
 0x2a1   :  { %2427 = vmatpush1.bf16.msra.mxu0 %v966_v58  ;;  %2755 = vmatpush1.bf16.msra.mxu1 %v968_v61  ;;  %v334_v58 = vld [vmem:[%s6117_s1 + $0x620] sm:$0xff]  ;;  %v336_v61 = vld [vmem:[%s6117_s1 + $0x630] sm:$0xff] }
 0x2a2   :  { %2428 = vmatprep.subr.bf16.mxu0 %v975_v59  ;;  %2756 = vmatprep.subr.bf16.mxu1 %v977_v63  ;;  %v1038_v59 = vunpack.c.l.s8.bf16 %v334_v58  ;;  %v1040_v63 = vunpack.c.l.s8.bf16 %v336_v61 }
 0x2a5   :  { %2429 = vmatpush1.bf16.msra.mxu0 %v974_v3  ;;  %2757 = vmatpush1.bf16.msra.mxu1 %v976_v4  ;;  %v343_v3 = vld [vmem:[%s6117_s1 + $0x668] sm:$0xff]  ;;  %v345_v4 = vld [vmem:[%s6117_s1 + $0x678] sm:$0xff] }
 0x2a6   :  { %2430 = vmatprep.subr.bf16.mxu0 %v983_v7  ;;  %2758 = vmatprep.subr.bf16.mxu1 %v985_v8  ;;  %v1046_v7 = vunpack.c.h.s8.bf16 %v334_v58  ;;  %v1048_v8 = vunpack.c.h.s8.bf16 %v336_v61  ;;  %v1055_v9 = vunpack.c.l.s8.bf16 %v343_v3  ;;  %v1057_v42 = vunpack.c.l.s8.bf16 %v345_v4 }
 0x2a7   :  { %v1065_v12 = vunpack.c.h.s8.bf16 %v345_v4 }
 0x2a9   :  { %2431 = vmatpush1.bf16.msra.mxu0 %v982_v18  ;;  %2759 = vmatpush1.bf16.msra.mxu1 %v984_v13  ;;  %v342_v18 = vld [vmem:[%s6117_s1 + $0x660] sm:$0xff]  ;;  %v344_v13 = vld [vmem:[%s6117_s1 + $0x670] sm:$0xff] }
 0x2aa   :  { %2432 = vmatprep.subr.bf16.mxu0 %v991_v15  ;;  %2760 = vmatprep.subr.bf16.mxu1 %v993_v16  ;;  %v1056_v15 = vunpack.c.l.s8.bf16 %v344_v13  ;;  %v1063_v16 = vunpack.c.h.s8.bf16 %v343_v3 }
 0x2ad   :  { %2433 = vmatpush1.bf16.msra.mxu0 %v990_v21  ;;  %2761 = vmatpush1.bf16.msra.mxu1 %v992_v22  ;;  %v353_v21 = vld [vmem:[%s6117_s1 + $0x6b8] sm:$0xff]  ;;  %v1062_v22 = vunpack.c.h.s8.bf16 %v342_v18 }
 0x2ae   :  { %2434 = vmatprep.subr.bf16.mxu0 %v999_v1  ;;  %2762 = vmatprep.subr.bf16.mxu1 %v1001_v23  ;;  %v1071_v1 = vunpack.c.l.s8.bf16 %v351_v60  ;;  %v1073_v23 = vunpack.c.l.s8.bf16 %v353_v21 }
 0x2b1   :  { %2435 = vmatpush1.bf16.msra.mxu0 %v998_v26  ;;  %2763 = vmatpush1.bf16.msra.mxu1 %v1000_v27  ;;  %v1070_v26 = vunpack.c.l.s8.bf16 %v350_v33  ;;  %v1072_v27 = vunpack.c.l.s8.bf16 %v352_v24 }
 0x2b2   :  { %2436 = vmatprep.subr.bf16.mxu0 %v1007_v25  ;;  %2764 = vmatprep.subr.bf16.mxu1 %v1009_v54  ;;  %v1079_v25 = vunpack.c.h.s8.bf16 %v351_v60  ;;  %v1081_v54 = vunpack.c.h.s8.bf16 %v353_v21 }
 0x2b5   :  { %2437 = vmatpush1.bf16.msra.mxu0 %v1006_v30  ;;  %2765 = vmatpush1.bf16.msra.mxu1 %v1008_v31  ;;  %v1078_v30 = vunpack.c.h.s8.bf16 %v350_v33  ;;  %v1080_v31 = vunpack.c.h.s8.bf16 %v352_v24 }
 0x2b6   :  { %2438 = vmatprep.subr.bf16.mxu0 %v1015_v32  ;;  %2766 = vmatprep.subr.bf16.mxu1 %v1017_v34  ;;  %v1087_v32 = vunpack.c.l.s8.bf16 %v359_v29  ;;  %v1089_v34 = vunpack.c.l.s8.bf16 %v361_v43 }
 0x2b9   :  { %2439 = vmatpush1.bf16.msra.mxu0 %v1014_v36  ;;  %2767 = vmatpush1.bf16.msra.mxu1 %v1016_v55 }
 0x2ba   :  { %2440 = vmatprep.subr.bf16.mxu0 %v1023_v37  ;;  %2768 = vmatprep.subr.bf16.mxu1 %v1025_v39 }
 0x2bd   :  { %2441 = vmatpush1.bf16.msra.mxu0 %v1022_v44  ;;  %2769 = vmatpush1.bf16.msra.mxu1 %v1024_v45  ;;  %v1086_v44 = vunpack.c.l.s8.bf16 %v358_v35  ;;  %v1088_v45 = vunpack.c.l.s8.bf16 %v360_v62 }
 0x2be   :  { %2442 = vmatprep.subr.bf16.mxu0 %v1031_v41  ;;  %2770 = vmatprep.subr.bf16.mxu1 %v1033_v47 }
 0x2c1   :  { %2443 = vmatpush1.bf16.msra.mxu0 %v1030_v52  ;;  %2771 = vmatpush1.bf16.msra.mxu1 %v1032_v53  ;;  %v367_v52 = vld [vmem:[%s6117_s1 + $0x728] sm:$0xff]  ;;  %v369_v53 = vld [vmem:[%s6117_s1 + $0x738] sm:$0xff] }
 0x2c2   :  { %2453 = vmatprep.subr.bf16.mxu0 %v1039_v56  ;;  %2781 = vmatprep.subr.bf16.mxu1 %v1041_v57  ;;  %v1094_v56 = vunpack.c.h.s8.bf16 %v358_v35  ;;  %v1096_v57 = vunpack.c.h.s8.bf16 %v360_v62  ;;  %v1103_v58 = vunpack.c.l.s8.bf16 %v367_v52  ;;  %v1105_v61 = vunpack.c.l.s8.bf16 %v369_v53 }
 0x2c3   :  { %v1111_v3 = vunpack.c.h.s8.bf16 %v367_v52  ;;  %v1113_v4 = vunpack.c.h.s8.bf16 %v369_v53 }
 0x2c4   :  { %2445 = vmatmul.mubr.bf16.vlgmr.msra.gmra.mrb[4].mxu0 %v4312_v20  ;;  %2773 = vmatmul.mubr.bf16.vlgmr.msra.gmra.mrb[4].mxu1 %v4312_v20  ;;  %v1054_v20 = vunpack.c.l.s8.bf16 %v342_v18 }
 0x2c5   :  { %2454 = vmatpush1.bf16.msra.mxu0 %v1038_v59  ;;  %2782 = vmatpush1.bf16.msra.mxu1 %v1040_v63  ;;  %v366_v59 = vld [vmem:[%s6117_s1 + $0x720] sm:$0xff]  ;;  %v368_v63 = vld [vmem:[%s6117_s1 + $0x730] sm:$0xff] }
 0x2c6   :  { %2455 = vmatprep.subr.bf16.mxu0 %v1047_v0  ;;  %2783 = vmatprep.subr.bf16.mxu1 %v1049_v50  ;;  %v1102_v0 = vunpack.c.l.s8.bf16 %v366_v59  ;;  %v1104_v50 = vunpack.c.l.s8.bf16 %v368_v63 }
 0x2c7   :  { %2485 = vmatprep.mubr.bf16.mxu0 %v4320_v28  ;;  %2813 = vmatprep.mubr.bf16.mxu1 %v4320_v28  ;;  %v1064_v28 = vunpack.c.h.s8.bf16 %v344_v13 }
 0x2c9   :  { %2456 = vmatpush1.bf16.msra.mxu0 %v1046_v7  ;;  %2784 = vmatpush1.bf16.msra.mxu1 %v1048_v8  ;;  %v375_v7 = vld [vmem:[%s6117_s1 + $0x768] sm:$0xff]  ;;  %v377_v8 = vld [vmem:[%s6117_s1 + $0x778] sm:$0xff] }
 0x2ca   :  { %2457 = vmatprep.subr.bf16.mxu0 %v1055_v9  ;;  %2785 = vmatprep.subr.bf16.mxu1 %v1057_v42  ;;  %v1110_v9 = vunpack.c.h.s8.bf16 %v366_v59  ;;  %v1112_v42 = vunpack.c.h.s8.bf16 %v368_v63  ;;  %v1119_v18 = vunpack.c.l.s8.bf16 %v375_v7  ;;  %v1121_v13 = vunpack.c.l.s8.bf16 %v377_v8 }
 0x2cb   :  { %v1127_v60 = vunpack.c.h.s8.bf16 %v375_v7  ;;  %v1129_v21 = vunpack.c.h.s8.bf16 %v377_v8 }
 0x2cd   :  { %2458 = vmatpush1.bf16.msra.mxu0 %v1054_v20  ;;  %2786 = vmatpush1.bf16.msra.mxu1 %v1056_v15  ;;  %v374_v20 = vld [vmem:[%s6117_s1 + $0x760] sm:$0xff]  ;;  %v376_v15 = vld [vmem:[%s6117_s1 + $0x770] sm:$0xff] }
 0x2ce   :  { %2459 = vmatprep.subr.bf16.mxu0 %v1063_v16  ;;  %2787 = vmatprep.subr.bf16.mxu1 %v1065_v12  ;;  %v1118_v16 = vunpack.c.l.s8.bf16 %v374_v20  ;;  %v1120_v12 = vunpack.c.l.s8.bf16 %v376_v15 }
 0x2d1   :  { %2460 = vmatpush1.bf16.msra.mxu0 %v1062_v22  ;;  %2788 = vmatpush1.bf16.msra.mxu1 %v1064_v28  ;;  %v383_v22 = vld [vmem:[%s6117_s1 + $0x7a8] sm:$0xff]  ;;  %v385_v28 = vld [vmem:[%s6117_s1 + $0x7b8] sm:$0xff] }
 0x2d2   :  { %2461 = vmatprep.subr.bf16.mxu0 %v1071_v1  ;;  %2789 = vmatprep.subr.bf16.mxu1 %v1073_v23  ;;  %v1126_v1 = vunpack.c.h.s8.bf16 %v374_v20  ;;  %v1128_v23 = vunpack.c.h.s8.bf16 %v376_v15  ;;  %v1135_v33 = vunpack.c.l.s8.bf16 %v383_v22  ;;  %v1137_v24 = vunpack.c.l.s8.bf16 %v385_v28 }
 0x2d3   :  { %v1143_v29 = vunpack.c.h.s8.bf16 %v383_v22  ;;  %v1145_v43 = vunpack.c.h.s8.bf16 %v385_v28 }
 0x2d5   :  { %2462 = vmatpush1.bf16.msra.mxu0 %v1070_v26  ;;  %2790 = vmatpush1.bf16.msra.mxu1 %v1072_v27  ;;  %v382_v26 = vld [vmem:[%s6117_s1 + $0x7a0] sm:$0xff]  ;;  %v384_v27 = vld [vmem:[%s6117_s1 + $0x7b0] sm:$0xff] }
 0x2d6   :  { %2463 = vmatprep.subr.bf16.mxu0 %v1079_v25  ;;  %2791 = vmatprep.subr.bf16.mxu1 %v1081_v54  ;;  %v1134_v25 = vunpack.c.l.s8.bf16 %v382_v26  ;;  %v1136_v54 = vunpack.c.l.s8.bf16 %v384_v27 }
 0x2d7   :  { %v5220_v36 = vpop.f32.mrb[0].mxu0  ;;  %v5222_v55 = vpop.f32.mrb[0].mxu1 }
 0x2d8   :  { %v5224_v37 = vpop.f32.mrb[1].mxu0  ;;  %v5226_v39 = vpop.f32.mrb[1].mxu1 }
 0x2d9   :  { %v1999_v40 = vpop.f32.mrb[2].mxu0  ;;  %v2327_v46 = vpop.f32.mrb[2].mxu1  ;;  %2464 = vmatpush1.bf16.msra.mxu0 %v1078_v30  ;;  %2792 = vmatpush1.bf16.msra.mxu1 %v1080_v31  ;;  %v391_v30 = vld [vmem:[%s6117_s1 + $0x7e8] sm:$0xff]  ;;  %v393_v31 = vld [vmem:[%s6117_s1 + $0x7f8] sm:$0xff] }
 0x2da   :  { %v2000_v41 = vpop.f32.mrb[3].mxu0  ;;  %v2328_v47 = vpop.f32.mrb[3].mxu1  ;;  %2465 = vmatprep.subr.bf16.mxu0 %v1087_v32  ;;  %2793 = vmatprep.subr.bf16.mxu1 %v1089_v34  ;;  %v1142_v32 = vunpack.c.h.s8.bf16 %v382_v26  ;;  %v1144_v34 = vunpack.c.h.s8.bf16 %v384_v27  ;;  %v1151_v35 = vunpack.c.l.s8.bf16 %v391_v30  ;;  %v1153_v62 = vunpack.c.l.s8.bf16 %v393_v31  ;;  %v390_v40 = vld [vmem:[%s6117_s1 + $0x7e0] sm:$0xff]  ;;  %v392_v46 = vld [vmem:[%s6117_s1 + $0x7f0] sm:$0xff] }
 0x2db   :  { %v1159_v41 = vunpack.c.h.s8.bf16 %v391_v30  ;;  %v1161_v47 = vunpack.c.h.s8.bf16 %v393_v31  ;;  %v1158_v52 = vunpack.c.h.s8.bf16 %v390_v40  ;;  %v1160_v53 = vunpack.c.h.s8.bf16 %v392_v46 }
 0x2dd   :  { %2466 = vmatpush1.bf16.msra.mxu0 %v1086_v44  ;;  %2794 = vmatpush1.bf16.msra.mxu1 %v1088_v45  ;;  %v1150_v44 = vunpack.c.l.s8.bf16 %v390_v40  ;;  %v1152_v45 = vunpack.c.l.s8.bf16 %v392_v46 }
 0x2de   :  { %2467 = vmatprep.subr.bf16.mxu0 %v1095_v48  ;;  %2795 = vmatprep.subr.bf16.mxu1 %v1097_v51  ;;  %v399_v48 = vld [vmem:[%s6117_s1 + $0x828] sm:$0xff]  ;;  %v401_v51 = vld [vmem:[%s6117_s1 + $0x838] sm:$0xff] }
 0x2e1   :  { %2468 = vmatpush1.bf16.msra.mxu0 %v1094_v56  ;;  %2796 = vmatpush1.bf16.msra.mxu1 %v1096_v57  ;;  %v1167_v56 = vunpack.c.l.s8.bf16 %v399_v48  ;;  %v1169_v57 = vunpack.c.l.s8.bf16 %v401_v51 }
 0x2e2   :  { %2469 = vmatprep.subr.bf16.mxu0 %v1103_v58  ;;  %2797 = vmatprep.subr.bf16.mxu1 %v1105_v61  ;;  %v398_v58 = vld [vmem:[%s6117_s1 + $0x820] sm:$0xff]  ;;  %v400_v61 = vld [vmem:[%s6117_s1 + $0x830] sm:$0xff] }
 0x2e3   :  { %v1166_v59 = vunpack.c.l.s8.bf16 %v398_v58  ;;  %v1168_v63 = vunpack.c.l.s8.bf16 %v400_v61  ;;  %v1174_v7 = vunpack.c.h.s8.bf16 %v398_v58  ;;  %v1176_v8 = vunpack.c.h.s8.bf16 %v400_v61 }
 0x2e5   :  { %2470 = vmatpush1.bf16.msra.mxu0 %v1102_v0  ;;  %2798 = vmatpush1.bf16.msra.mxu1 %v1104_v50  ;;  %v1175_v0 = vunpack.c.h.s8.bf16 %v399_v48  ;;  %v1177_v50 = vunpack.c.h.s8.bf16 %v401_v51 }
 0x2e6   :  { %2471 = vmatprep.subr.bf16.mxu0 %v1111_v3  ;;  %2799 = vmatprep.subr.bf16.mxu1 %v1113_v4  ;;  %v407_v3 = vld [vmem:[%s6117_s1 + $0x868] sm:$0xff]  ;;  %v409_v4 = vld [vmem:[%s6117_s1 + $0x878] sm:$0xff] }
 0x2e7   :  { %v1191_v15 = vunpack.c.h.s8.bf16 %v407_v3 }
 0x2e9   :  { %2472 = vmatpush1.bf16.msra.mxu0 %v1110_v9  ;;  %2800 = vmatpush1.bf16.msra.mxu1 %v1112_v42  ;;  %v1183_v9 = vunpack.c.l.s8.bf16 %v407_v3  ;;  %v1185_v42 = vunpack.c.l.s8.bf16 %v409_v4 }
 0x2ea   :  { %2473 = vmatprep.subr.bf16.mxu0 %v1119_v18  ;;  %2801 = vmatprep.subr.bf16.mxu1 %v1121_v13  ;;  %v406_v18 = vld [vmem:[%s6117_s1 + $0x860] sm:$0xff]  ;;  %v408_v13 = vld [vmem:[%s6117_s1 + $0x870] sm:$0xff] }
 0x2eb   :  { %v1184_v20 = vunpack.c.l.s8.bf16 %v408_v13 }
 0x2ed   :  { %2474 = vmatpush1.bf16.msra.mxu0 %v1118_v16  ;;  %2802 = vmatpush1.bf16.msra.mxu1 %v1120_v12  ;;  %v1193_v16 = vunpack.c.h.s8.bf16 %v409_v4  ;;  %v415_v12 = vld [vmem:[%s6117_s1 + $0x8a8] sm:$0xff] }
 0x2ee   :  { %2475 = vmatprep.subr.bf16.mxu0 %v1127_v60  ;;  %2803 = vmatprep.subr.bf16.mxu1 %v1129_v21  ;;  %v417_v60 = vld [vmem:[%s6117_s1 + $0x8b8] sm:$0xff]  ;;  %v1190_v21 = vunpack.c.h.s8.bf16 %v406_v18  ;;  %v1199_v22 = vunpack.c.l.s8.bf16 %v415_v12  ;;  %v1207_v26 = vunpack.c.h.s8.bf16 %v415_v12 }
 0x2ef   :  { %v1201_v28 = vunpack.c.l.s8.bf16 %v417_v60  ;;  %v1209_v27 = vunpack.c.h.s8.bf16 %v417_v60 }
 0x2f1   :  { %2476 = vmatpush1.bf16.msra.mxu0 %v1126_v1  ;;  %2804 = vmatpush1.bf16.msra.mxu1 %v1128_v23  ;;  %v414_v1 = vld [vmem:[%s6117_s1 + $0x8a0] sm:$0xff]  ;;  %v416_v23 = vld [vmem:[%s6117_s1 + $0x8b0] sm:$0xff] }
 0x2f2   :  { %2477 = vmatprep.subr.bf16.mxu0 %v1135_v33  ;;  %2805 = vmatprep.subr.bf16.mxu1 %v1137_v24  ;;  %v1198_v33 = vunpack.c.l.s8.bf16 %v414_v1  ;;  %v1200_v24 = vunpack.c.l.s8.bf16 %v416_v23 }
 0x2f5   :  { %2478 = vmatpush1.bf16.msra.mxu0 %v1134_v25  ;;  %2806 = vmatpush1.bf16.msra.mxu1 %v1136_v54  ;;  %v423_v25 = vld [vmem:[%s6117_s1 + $0x8e8] sm:$0xff]  ;;  %v425_v54 = vld [vmem:[%s6117_s1 + $0x8f8] sm:$0xff] }
 0x2f6   :  { %2479 = vmatprep.subr.bf16.mxu0 %v1143_v29  ;;  %2807 = vmatprep.subr.bf16.mxu1 %v1145_v43  ;;  %v1206_v29 = vunpack.c.h.s8.bf16 %v414_v1  ;;  %v1208_v43 = vunpack.c.h.s8.bf16 %v416_v23  ;;  %v1215_v30 = vunpack.c.l.s8.bf16 %v423_v25  ;;  %v1217_v31 = vunpack.c.l.s8.bf16 %v425_v54 }
 0x2f7   :  { %v1223_v40 = vunpack.c.h.s8.bf16 %v423_v25  ;;  %v1225_v46 = vunpack.c.h.s8.bf16 %v425_v54 }
 0x2f9   :  { %2480 = vmatpush1.bf16.msra.mxu0 %v1142_v32  ;;  %2808 = vmatpush1.bf16.msra.mxu1 %v1144_v34  ;;  %v422_v32 = vld [vmem:[%s6117_s1 + $0x8e0] sm:$0xff]  ;;  %v424_v34 = vld [vmem:[%s6117_s1 + $0x8f0] sm:$0xff] }
 0x2fa   :  { %2481 = vmatprep.subr.bf16.mxu0 %v1151_v35  ;;  %2809 = vmatprep.subr.bf16.mxu1 %v1153_v62  ;;  %v1214_v35 = vunpack.c.l.s8.bf16 %v422_v32  ;;  %v1216_v62 = vunpack.c.l.s8.bf16 %v424_v34 }
 0x2fd   :  { %2482 = vmatpush1.bf16.msra.mxu0 %v1150_v44  ;;  %2810 = vmatpush1.bf16.msra.mxu1 %v1152_v45  ;;  %v431_v44 = vld [vmem:[%s6117_s1 + $0x928] sm:$0xff]  ;;  %v433_v45 = vld [vmem:[%s6117_s1 + $0x938] sm:$0xff] }
 0x2fe   :  { %2483 = vmatprep.subr.bf16.mxu0 %v1159_v41  ;;  %2811 = vmatprep.subr.bf16.mxu1 %v1161_v47  ;;  %v1222_v41 = vunpack.c.h.s8.bf16 %v422_v32  ;;  %v1224_v47 = vunpack.c.h.s8.bf16 %v424_v34  ;;  %v1231_v48 = vunpack.c.l.s8.bf16 %v431_v44  ;;  %v1233_v51 = vunpack.c.l.s8.bf16 %v433_v45 }
 0x2ff   :  { %v1239_v58 = vunpack.c.h.s8.bf16 %v431_v44  ;;  %v1241_v61 = vunpack.c.h.s8.bf16 %v433_v45 }
 0x301   :  { %2484 = vmatpush1.bf16.msra.mxu0 %v1158_v52  ;;  %2812 = vmatpush1.bf16.msra.mxu1 %v1160_v53  ;;  %v430_v52 = vld [vmem:[%s6117_s1 + $0x920] sm:$0xff]  ;;  %v432_v53 = vld [vmem:[%s6117_s1 + $0x930] sm:$0xff] }
 0x302   :  { %2494 = vmatprep.subr.bf16.mxu0 %v1167_v56  ;;  %2822 = vmatprep.subr.bf16.mxu1 %v1169_v57  ;;  %v1230_v56 = vunpack.c.l.s8.bf16 %v430_v52  ;;  %v1232_v57 = vunpack.c.l.s8.bf16 %v432_v53 }
 0x304   :  { %2486 = vmatmul.mubr.bf16.vlgmr.msra.gmra.mrb[4].mxu0 %v4429_v10  ;;  %2814 = vmatmul.mubr.bf16.vlgmr.msra.gmra.mrb[4].mxu1 %v4429_v10  ;;  %v1182_v10 = vunpack.c.l.s8.bf16 %v406_v18 }
 0x305   :  { %2495 = vmatpush1.bf16.msra.mxu0 %v1166_v59  ;;  %2823 = vmatpush1.bf16.msra.mxu1 %v1168_v63  ;;  %v439_v59 = vld [vmem:[%s6117_s1 + $0x968] sm:$0xff]  ;;  %v441_v63 = vld [vmem:[%s6117_s1 + $0x978] sm:$0xff] }
 0x306   :  { %2496 = vmatprep.subr.bf16.mxu0 %v1175_v0  ;;  %2824 = vmatprep.subr.bf16.mxu1 %v1177_v50  ;;  %v1238_v0 = vunpack.c.h.s8.bf16 %v430_v52  ;;  %v1240_v50 = vunpack.c.h.s8.bf16 %v432_v53  ;;  %v1247_v3 = vunpack.c.l.s8.bf16 %v439_v59  ;;  %v1249_v4 = vunpack.c.l.s8.bf16 %v441_v63 }
 0x307   :  { %2526 = vmatprep.mubr.bf16.mxu0 %v4437_v17  ;;  %2854 = vmatprep.mubr.bf16.mxu1 %v4437_v17  ;;  %v1192_v17 = vunpack.c.h.s8.bf16 %v408_v13  ;;  %v1255_v18 = vunpack.c.h.s8.bf16 %v439_v59  ;;  %v1257_v13 = vunpack.c.h.s8.bf16 %v441_v63 }
 0x309   :  { %2497 = vmatpush1.bf16.msra.mxu0 %v1174_v7  ;;  %2825 = vmatpush1.bf16.msra.mxu1 %v1176_v8  ;;  %v438_v7 = vld [vmem:[%s6117_s1 + $0x960] sm:$0xff]  ;;  %v440_v8 = vld [vmem:[%s6117_s1 + $0x970] sm:$0xff] }
 0x30a   :  { %2498 = vmatprep.subr.bf16.mxu0 %v1183_v9  ;;  %2826 = vmatprep.subr.bf16.mxu1 %v1185_v42  ;;  %v1246_v9 = vunpack.c.l.s8.bf16 %v438_v7  ;;  %v1248_v42 = vunpack.c.l.s8.bf16 %v440_v8 }
 0x30d   :  { %2499 = vmatpush1.bf16.msra.mxu0 %v1182_v10  ;;  %2827 = vmatpush1.bf16.msra.mxu1 %v1184_v20  ;;  %v447_v10 = vld [vmem:[%s6117_s1 + $0x9a8] sm:$0xff]  ;;  %v449_v20 = vld [vmem:[%s6117_s1 + $0x9b8] sm:$0xff] }
 0x30e   :  { %2500 = vmatprep.subr.bf16.mxu0 %v1191_v15  ;;  %2828 = vmatprep.subr.bf16.mxu1 %v1193_v16  ;;  %v1254_v15 = vunpack.c.h.s8.bf16 %v438_v7  ;;  %v1256_v16 = vunpack.c.h.s8.bf16 %v440_v8  ;;  %v1263_v12 = vunpack.c.l.s8.bf16 %v447_v10  ;;  %v1265_v60 = vunpack.c.l.s8.bf16 %v449_v20  ;;  %v479_v8 = vld [vmem:[%s6117_s1 + $0xaa8] sm:$0xff] }
 0x30f   :  { %v1271_v1 = vunpack.c.h.s8.bf16 %v447_v10  ;;  %v1273_v23 = vunpack.c.h.s8.bf16 %v449_v20  ;;  %v478_v10 = vld [vmem:[%s6117_s1 + $0xaa0] sm:$0xff]  ;;  %v480_v20 = vld [vmem:[%s6117_s1 + $0xab0] sm:$0xff] }
 0x311   :  { %2501 = vmatpush1.bf16.msra.mxu0 %v1190_v21  ;;  %2829 = vmatpush1.bf16.msra.mxu1 %v1192_v17  ;;  %v446_v21 = vld [vmem:[%s6117_s1 + $0x9a0] sm:$0xff]  ;;  %v448_v17 = vld [vmem:[%s6117_s1 + $0x9b0] sm:$0xff] }
 0x312   :  { %2502 = vmatprep.subr.bf16.mxu0 %v1199_v22  ;;  %2830 = vmatprep.subr.bf16.mxu1 %v1201_v28  ;;  %v1262_v22 = vunpack.c.l.s8.bf16 %v446_v21  ;;  %v1264_v28 = vunpack.c.l.s8.bf16 %v448_v17 }
 0x315   :  { %2503 = vmatpush1.bf16.msra.mxu0 %v1198_v33  ;;  %2831 = vmatpush1.bf16.msra.mxu1 %v1200_v24  ;;  %v455_v33 = vld [vmem:[%s6117_s1 + $0x9e8] sm:$0xff]  ;;  %v457_v24 = vld [vmem:[%s6117_s1 + $0x9f8] sm:$0xff] }
 0x316   :  { %2504 = vmatprep.subr.bf16.mxu0 %v1207_v26  ;;  %2832 = vmatprep.subr.bf16.mxu1 %v1209_v27  ;;  %v1270_v26 = vunpack.c.h.s8.bf16 %v446_v21  ;;  %v1272_v27 = vunpack.c.h.s8.bf16 %v448_v17  ;;  %v1279_v25 = vunpack.c.l.s8.bf16 %v455_v33  ;;  %v1281_v54 = vunpack.c.l.s8.bf16 %v457_v24  ;;  %v487_v21 = vld [vmem:[%s6117_s1 + $0xae8] sm:$0xff]  ;;  %v489_v17 = vld [vmem:[%s6117_s1 + $0xaf8] sm:$0xff] }
 0x317   :  { %v1287_v32 = vunpack.c.h.s8.bf16 %v455_v33  ;;  %v1289_v34 = vunpack.c.h.s8.bf16 %v457_v24  ;;  %v486_v33 = vld [vmem:[%s6117_s1 + $0xae0] sm:$0xff]  ;;  %v488_v24 = vld [vmem:[%s6117_s1 + $0xaf0] sm:$0xff] }
 0x319   :  { %2505 = vmatpush1.bf16.msra.mxu0 %v1206_v29  ;;  %2833 = vmatpush1.bf16.msra.mxu1 %v1208_v43  ;;  %v454_v29 = vld [vmem:[%s6117_s1 + $0x9e0] sm:$0xff]  ;;  %v456_v43 = vld [vmem:[%s6117_s1 + $0x9f0] sm:$0xff] }
 0x31a   :  { %2506 = vmatprep.subr.bf16.mxu0 %v1215_v30  ;;  %2834 = vmatprep.subr.bf16.mxu1 %v1217_v31  ;;  %v1278_v30 = vunpack.c.l.s8.bf16 %v454_v29  ;;  %v1280_v31 = vunpack.c.l.s8.bf16 %v456_v43 }
 0x31d   :  { %2507 = vmatpush1.bf16.msra.mxu0 %v1214_v35  ;;  %2835 = vmatpush1.bf16.msra.mxu1 %v1216_v62  ;;  %v463_v35 = vld [vmem:[%s6117_s1 + $0xa28] sm:$0xff]  ;;  %v465_v62 = vld [vmem:[%s6117_s1 + $0xa38] sm:$0xff] }
 0x31e   :  { %2508 = vmatprep.subr.bf16.mxu0 %v1223_v40  ;;  %2836 = vmatprep.subr.bf16.mxu1 %v1225_v46  ;;  %v1286_v40 = vunpack.c.h.s8.bf16 %v454_v29  ;;  %v1288_v46 = vunpack.c.h.s8.bf16 %v456_v43  ;;  %v1295_v44 = vunpack.c.l.s8.bf16 %v463_v35  ;;  %v1297_v45 = vunpack.c.l.s8.bf16 %v465_v62  ;;  %v495_v29 = vld [vmem:[%s6117_s1 + $0xb28] sm:$0xff]  ;;  %v497_v43 = vld [vmem:[%s6117_s1 + $0xb38] sm:$0xff] }
 0x31f   :  { %v1303_v52 = vunpack.c.h.s8.bf16 %v463_v35  ;;  %v1305_v53 = vunpack.c.h.s8.bf16 %v465_v62  ;;  %v494_v35 = vld [vmem:[%s6117_s1 + $0xb20] sm:$0xff]  ;;  %v496_v62 = vld [vmem:[%s6117_s1 + $0xb30] sm:$0xff] }
 0x321   :  { %2509 = vmatpush1.bf16.msra.mxu0 %v1222_v41  ;;  %2837 = vmatpush1.bf16.msra.mxu1 %v1224_v47  ;;  %v462_v41 = vld [vmem:[%s6117_s1 + $0xa20] sm:$0xff]  ;;  %v464_v47 = vld [vmem:[%s6117_s1 + $0xa30] sm:$0xff] }
 0x322   :  { %2510 = vmatprep.subr.bf16.mxu0 %v1231_v48  ;;  %2838 = vmatprep.subr.bf16.mxu1 %v1233_v51  ;;  %v1294_v48 = vunpack.c.l.s8.bf16 %v462_v41  ;;  %v1296_v51 = vunpack.c.l.s8.bf16 %v464_v47 }
 0x325   :  { %2511 = vmatpush1.bf16.msra.mxu0 %v1230_v56  ;;  %2839 = vmatpush1.bf16.msra.mxu1 %v1232_v57  ;;  %v471_v56 = vld [vmem:[%s6117_s1 + $0xa68] sm:$0xff]  ;;  %v473_v57 = vld [vmem:[%s6117_s1 + $0xa78] sm:$0xff] }
 0x326   :  { %2512 = vmatprep.subr.bf16.mxu0 %v1239_v58  ;;  %2840 = vmatprep.subr.bf16.mxu1 %v1241_v61  ;;  %v1302_v58 = vunpack.c.h.s8.bf16 %v462_v41  ;;  %v1304_v61 = vunpack.c.h.s8.bf16 %v464_v47  ;;  %v1311_v59 = vunpack.c.l.s8.bf16 %v471_v56  ;;  %v1313_v63 = vunpack.c.l.s8.bf16 %v473_v57  ;;  %v503_v41 = vld [vmem:[%s6117_s1 + $0xb68] sm:$0xff]  ;;  %v505_v47 = vld [vmem:[%s6117_s1 + $0xb78] sm:$0xff] }
 0x327   :  { %v1321_v7 = vunpack.c.h.s8.bf16 %v473_v57  ;;  %v504_v57 = vld [vmem:[%s6117_s1 + $0xb70] sm:$0xff] }
 0x329   :  { %2513 = vmatpush1.bf16.msra.mxu0 %v1238_v0  ;;  %2841 = vmatpush1.bf16.msra.mxu1 %v1240_v50  ;;  %v470_v0 = vld [vmem:[%s6117_s1 + $0xa60] sm:$0xff]  ;;  %v472_v50 = vld [vmem:[%s6117_s1 + $0xa70] sm:$0xff] }
 0x32a   :  { %2514 = vmatprep.subr.bf16.mxu0 %v1247_v3  ;;  %2842 = vmatprep.subr.bf16.mxu1 %v1249_v4  ;;  %v1312_v3 = vunpack.c.l.s8.bf16 %v472_v50  ;;  %v1319_v4 = vunpack.c.h.s8.bf16 %v471_v56  ;;  %v502_v56 = vld [vmem:[%s6117_s1 + $0xb60] sm:$0xff] }
 0x32d   :  { %2515 = vmatpush1.bf16.msra.mxu0 %v1246_v9  ;;  %2843 = vmatpush1.bf16.msra.mxu1 %v1248_v42  ;;  %v481_v9 = vld [vmem:[%s6117_s1 + $0xab8] sm:$0xff]  ;;  %v1318_v42 = vunpack.c.h.s8.bf16 %v470_v0 }
 0x32e   :  { %2516 = vmatprep.subr.bf16.mxu0 %v1255_v18  ;;  %2844 = vmatprep.subr.bf16.mxu1 %v1257_v13  ;;  %v1327_v18 = vunpack.c.l.s8.bf16 %v479_v8  ;;  %v1329_v13 = vunpack.c.l.s8.bf16 %v481_v9 }
 0x331   :  { %2517 = vmatpush1.bf16.msra.mxu0 %v1254_v15  ;;  %2845 = vmatpush1.bf16.msra.mxu1 %v1256_v16  ;;  %v1326_v15 = vunpack.c.l.s8.bf16 %v478_v10  ;;  %v1328_v16 = vunpack.c.l.s8.bf16 %v480_v20 }
 0x332   :  { %2518 = vmatprep.subr.bf16.mxu0 %v1263_v12  ;;  %2846 = vmatprep.subr.bf16.mxu1 %v1265_v60  ;;  %v1335_v12 = vunpack.c.h.s8.bf16 %v479_v8  ;;  %v1337_v60 = vunpack.c.h.s8.bf16 %v481_v9  ;;  %v510_v8 = vld [vmem:[%s6117_s1 + $0xba0] sm:$0xff]  ;;  %v512_v9 = vld [vmem:[%s6117_s1 + $0xbb0] sm:$0xff] }
 0x335   :  { %2519 = vmatpush1.bf16.msra.mxu0 %v1262_v22  ;;  %2847 = vmatpush1.bf16.msra.mxu1 %v1264_v28  ;;  %v1334_v22 = vunpack.c.h.s8.bf16 %v478_v10  ;;  %v1336_v28 = vunpack.c.h.s8.bf16 %v480_v20  ;;  %v519_v10 = vld [vmem:[%s6117_s1 + $0xbe8] sm:$0xff]  ;;  %v521_v20 = vld [vmem:[%s6117_s1 + $0xbf8] sm:$0xff] }
 0x336   :  { %2520 = vmatprep.subr.bf16.mxu0 %v1271_v1  ;;  %2848 = vmatprep.subr.bf16.mxu1 %v1273_v23  ;;  %v1343_v1 = vunpack.c.l.s8.bf16 %v487_v21  ;;  %v1345_v23 = vunpack.c.l.s8.bf16 %v489_v17 }
 0x339   :  { %2521 = vmatpush1.bf16.msra.mxu0 %v1270_v26  ;;  %2849 = vmatpush1.bf16.msra.mxu1 %v1272_v27  ;;  %v1342_v26 = vunpack.c.l.s8.bf16 %v486_v33  ;;  %v1344_v27 = vunpack.c.l.s8.bf16 %v488_v24 }
 0x33a   :  { %2522 = vmatprep.subr.bf16.mxu0 %v1279_v25  ;;  %2850 = vmatprep.subr.bf16.mxu1 %v1281_v54  ;;  %v1351_v25 = vunpack.c.h.s8.bf16 %v487_v21  ;;  %v1353_v54 = vunpack.c.h.s8.bf16 %v489_v17  ;;  %v518_v21 = vld [vmem:[%s6117_s1 + $0xbe0] sm:$0xff]  ;;  %v520_v17 = vld [vmem:[%s6117_s1 + $0xbf0] sm:$0xff] }
 0x33d   :  { %2523 = vmatpush1.bf16.msra.mxu0 %v1278_v30  ;;  %2851 = vmatpush1.bf16.msra.mxu1 %v1280_v31  ;;  %v1350_v30 = vunpack.c.h.s8.bf16 %v486_v33  ;;  %v1352_v31 = vunpack.c.h.s8.bf16 %v488_v24  ;;  %v527_v33 = vld [vmem:[%s6117_s1 + $0xc28] sm:$0xff]  ;;  %v529_v24 = vld [vmem:[%s6117_s1 + $0xc38] sm:$0xff] }
 0x33e   :  { %2524 = vmatprep.subr.bf16.mxu0 %v1287_v32  ;;  %2852 = vmatprep.subr.bf16.mxu1 %v1289_v34  ;;  %v1359_v32 = vunpack.c.l.s8.bf16 %v495_v29  ;;  %v1361_v34 = vunpack.c.l.s8.bf16 %v497_v43 }
 0x341   :  { %2525 = vmatpush1.bf16.msra.mxu0 %v1286_v40  ;;  %2853 = vmatpush1.bf16.msra.mxu1 %v1288_v46  ;;  %v1358_v40 = vunpack.c.l.s8.bf16 %v494_v35  ;;  %v1360_v46 = vunpack.c.l.s8.bf16 %v496_v62 }
 0x342   :  { %2535 = vmatprep.subr.bf16.mxu0 %v1295_v44  ;;  %2863 = vmatprep.subr.bf16.mxu1 %v1297_v45  ;;  %v1367_v44 = vunpack.c.h.s8.bf16 %v495_v29  ;;  %v1369_v45 = vunpack.c.h.s8.bf16 %v497_v43  ;;  %v526_v29 = vld [vmem:[%s6117_s1 + $0xc20] sm:$0xff]  ;;  %v528_v43 = vld [vmem:[%s6117_s1 + $0xc30] sm:$0xff] }
 0x344   :  { %2527 = vmatmul.mubr.bf16.vlgmr.msra.gmra.mrb[4].mxu0 %v4542_v6  ;;  %2855 = vmatmul.mubr.bf16.vlgmr.msra.gmra.mrb[4].mxu1 %v4542_v6  ;;  %v1310_v6 = vunpack.c.l.s8.bf16 %v470_v0  ;;  %v511_v0 = vld [vmem:[%s6117_s1 + $0xba8] sm:$0xff] }
 0x345   :  { %2536 = vmatpush1.bf16.msra.mxu0 %v1294_v48  ;;  %2864 = vmatpush1.bf16.msra.mxu1 %v1296_v51  ;;  %v1366_v48 = vunpack.c.h.s8.bf16 %v494_v35  ;;  %v1368_v51 = vunpack.c.h.s8.bf16 %v496_v62  ;;  %v535_v35 = vld [vmem:[%s6117_s1 + $0xc68] sm:$0xff]  ;;  %v537_v62 = vld [vmem:[%s6117_s1 + $0xc78] sm:$0xff] }
 0x346   :  { %2537 = vmatprep.subr.bf16.mxu0 %v1303_v52  ;;  %2865 = vmatprep.subr.bf16.mxu1 %v1305_v53  ;;  %v1375_v52 = vunpack.c.l.s8.bf16 %v503_v41  ;;  %v1377_v53 = vunpack.c.l.s8.bf16 %v505_v47 }
 0x347   :  { %2567 = vmatprep.mubr.bf16.mxu0 %v4550_v14  ;;  %2895 = vmatprep.mubr.bf16.mxu1 %v4550_v14  ;;  %v1320_v14 = vunpack.c.h.s8.bf16 %v472_v50  ;;  %v513_v50 = vld [vmem:[%s6117_s1 + $0xbb8] sm:$0xff] }
 0x349   :  { %2538 = vmatpush1.bf16.msra.mxu0 %v1302_v58  ;;  %2866 = vmatpush1.bf16.msra.mxu1 %v1304_v61  ;;  %v1374_v58 = vunpack.c.l.s8.bf16 %v502_v56  ;;  %v1376_v61 = vunpack.c.l.s8.bf16 %v504_v57 }
 0x34a   :  { %2539 = vmatprep.subr.bf16.mxu0 %v1311_v59  ;;  %2867 = vmatprep.subr.bf16.mxu1 %v1313_v63  ;;  %v1383_v59 = vunpack.c.h.s8.bf16 %v503_v41  ;;  %v1385_v63 = vunpack.c.h.s8.bf16 %v505_v47  ;;  %v534_v41 = vld [vmem:[%s6117_s1 + $0xc60] sm:$0xff]  ;;  %v536_v47 = vld [vmem:[%s6117_s1 + $0xc70] sm:$0xff] }
 0x34d   :  { %2540 = vmatpush1.bf16.msra.mxu0 %v1310_v6  ;;  %2868 = vmatpush1.bf16.msra.mxu1 %v1312_v3  ;;  %v1382_v6 = vunpack.c.h.s8.bf16 %v502_v56  ;;  %v1384_v3 = vunpack.c.h.s8.bf16 %v504_v57  ;;  %v545_v56 = vld [vmem:[%s6117_s1 + $0xcb8] sm:$0xff]  ;;  %v1446_v57 = vunpack.c.h.s8.bf16 %v534_v41 }
 0x34e   :  { %2541 = vmatprep.subr.bf16.mxu0 %v1319_v4  ;;  %2869 = vmatprep.subr.bf16.mxu1 %v1321_v7  ;;  %v1391_v4 = vunpack.c.l.s8.bf16 %v511_v0  ;;  %v1393_v7 = vunpack.c.l.s8.bf16 %v513_v50 }
 0x351   :  { %2542 = vmatpush1.bf16.msra.mxu0 %v1318_v42  ;;  %2870 = vmatpush1.bf16.msra.mxu1 %v1320_v14  ;;  %v1390_v42 = vunpack.c.l.s8.bf16 %v510_v8  ;;  %v1392_v14 = vunpack.c.l.s8.bf16 %v512_v9 }
 0x352   :  { %2543 = vmatprep.subr.bf16.mxu0 %v1327_v18  ;;  %2871 = vmatprep.subr.bf16.mxu1 %v1329_v13  ;;  %v1399_v18 = vunpack.c.h.s8.bf16 %v511_v0  ;;  %v1401_v13 = vunpack.c.h.s8.bf16 %v513_v50 }
 0x355   :  { %2544 = vmatpush1.bf16.msra.mxu0 %v1326_v15  ;;  %2872 = vmatpush1.bf16.msra.mxu1 %v1328_v16  ;;  %v1398_v15 = vunpack.c.h.s8.bf16 %v510_v8  ;;  %v1400_v16 = vunpack.c.h.s8.bf16 %v512_v9 }
 0x356   :  { %2545 = vmatprep.subr.bf16.mxu0 %v1335_v12  ;;  %2873 = vmatprep.subr.bf16.mxu1 %v1337_v60  ;;  %v1407_v12 = vunpack.c.l.s8.bf16 %v519_v10  ;;  %v1409_v60 = vunpack.c.l.s8.bf16 %v521_v20 }
 0x359   :  { %2546 = vmatpush1.bf16.msra.mxu0 %v1334_v22  ;;  %2874 = vmatpush1.bf16.msra.mxu1 %v1336_v28  ;;  %v1406_v22 = vunpack.c.l.s8.bf16 %v518_v21  ;;  %v1408_v28 = vunpack.c.l.s8.bf16 %v520_v17 }
 0x35a   :  { %2547 = vmatprep.subr.bf16.mxu0 %v1343_v1  ;;  %2875 = vmatprep.subr.bf16.mxu1 %v1345_v23  ;;  %v1415_v1 = vunpack.c.h.s8.bf16 %v519_v10  ;;  %v1417_v23 = vunpack.c.h.s8.bf16 %v521_v20 }
 0x35d   :  { %2548 = vmatpush1.bf16.msra.mxu0 %v1342_v26  ;;  %2876 = vmatpush1.bf16.msra.mxu1 %v1344_v27  ;;  %v1414_v26 = vunpack.c.h.s8.bf16 %v518_v21  ;;  %v1416_v27 = vunpack.c.h.s8.bf16 %v520_v17 }
 0x35e   :  { %2549 = vmatprep.subr.bf16.mxu0 %v1351_v25  ;;  %2877 = vmatprep.subr.bf16.mxu1 %v1353_v54  ;;  %v1423_v25 = vunpack.c.l.s8.bf16 %v527_v33  ;;  %v1425_v54 = vunpack.c.l.s8.bf16 %v529_v24 }
 0x361   :  { %2550 = vmatpush1.bf16.msra.mxu0 %v1350_v30  ;;  %2878 = vmatpush1.bf16.msra.mxu1 %v1352_v31  ;;  %v1422_v30 = vunpack.c.l.s8.bf16 %v526_v29  ;;  %v1424_v31 = vunpack.c.l.s8.bf16 %v528_v43 }
 0x362   :  { %2551 = vmatprep.subr.bf16.mxu0 %v1359_v32  ;;  %2879 = vmatprep.subr.bf16.mxu1 %v1361_v34  ;;  %v1431_v32 = vunpack.c.h.s8.bf16 %v527_v33  ;;  %v1433_v34 = vunpack.c.h.s8.bf16 %v529_v24 }
 0x365   :  { %2552 = vmatpush1.bf16.msra.mxu0 %v1358_v40  ;;  %2880 = vmatpush1.bf16.msra.mxu1 %v1360_v46  ;;  %v1430_v40 = vunpack.c.h.s8.bf16 %v526_v29  ;;  %v1432_v46 = vunpack.c.h.s8.bf16 %v528_v43 }
 0x366   :  { %2553 = vmatprep.subr.bf16.mxu0 %v1367_v44  ;;  %2881 = vmatprep.subr.bf16.mxu1 %v1369_v45  ;;  %v1439_v44 = vunpack.c.l.s8.bf16 %v535_v35  ;;  %v1441_v45 = vunpack.c.l.s8.bf16 %v537_v62 }
 0x369   :  { %2554 = vmatpush1.bf16.msra.mxu0 %v1366_v48  ;;  %2882 = vmatpush1.bf16.msra.mxu1 %v1368_v51  ;;  %v1440_v48 = vunpack.c.l.s8.bf16 %v536_v47  ;;  %v1447_v51 = vunpack.c.h.s8.bf16 %v535_v35 }
 0x36a   :  { %2555 = vmatprep.subr.bf16.mxu0 %v1375_v52  ;;  %2883 = vmatprep.subr.bf16.mxu1 %v1377_v53  ;;  %v1449_v52 = vunpack.c.h.s8.bf16 %v537_v62  ;;  %v543_v53 = vld [vmem:[%s6117_s1 + $0xca8] sm:$0xff] }
 0x36d   :  { %2556 = vmatpush1.bf16.msra.mxu0 %v1374_v58  ;;  %2884 = vmatpush1.bf16.msra.mxu1 %v1376_v61  ;;  %v1455_v58 = vunpack.c.l.s8.bf16 %v543_v53  ;;  %v1457_v61 = vunpack.c.l.s8.bf16 %v545_v56 }
 0x36e   :  { %2557 = vmatprep.subr.bf16.mxu0 %v1383_v59  ;;  %2885 = vmatprep.subr.bf16.mxu1 %v1385_v63  ;;  %v542_v59 = vld [vmem:[%s6117_s1 + $0xca0] sm:$0xff]  ;;  %v544_v63 = vld [vmem:[%s6117_s1 + $0xcb0] sm:$0xff] }
 0x36f   :  { %v1454_v0 = vunpack.c.l.s8.bf16 %v542_v59  ;;  %v1456_v50 = vunpack.c.l.s8.bf16 %v544_v63  ;;  %v1462_v8 = vunpack.c.h.s8.bf16 %v542_v59  ;;  %v1464_v9 = vunpack.c.h.s8.bf16 %v544_v63 }
 0x371   :  { %2558 = vmatpush1.bf16.msra.mxu0 %v1382_v6  ;;  %2886 = vmatpush1.bf16.msra.mxu1 %v1384_v3  ;;  %v1463_v6 = vunpack.c.h.s8.bf16 %v543_v53  ;;  %v1465_v3 = vunpack.c.h.s8.bf16 %v545_v56 }
 0x372   :  { %2559 = vmatprep.subr.bf16.mxu0 %v1391_v4  ;;  %2887 = vmatprep.subr.bf16.mxu1 %v1393_v7  ;;  %v551_v4 = vld [vmem:[%s6117_s1 + $0xce8] sm:$0xff]  ;;  %v553_v7 = vld [vmem:[%s6117_s1 + $0xcf8] sm:$0xff] }
 0x375   :  { %2560 = vmatpush1.bf16.msra.mxu0 %v1390_v42  ;;  %2888 = vmatpush1.bf16.msra.mxu1 %v1392_v14  ;;  %v1471_v42 = vunpack.c.l.s8.bf16 %v551_v4  ;;  %v1473_v14 = vunpack.c.l.s8.bf16 %v553_v7 }
 0x376   :  { %2561 = vmatprep.subr.bf16.mxu0 %v1399_v18  ;;  %2889 = vmatprep.subr.bf16.mxu1 %v1401_v13  ;;  %v550_v18 = vld [vmem:[%s6117_s1 + $0xce0] sm:$0xff]  ;;  %v552_v13 = vld [vmem:[%s6117_s1 + $0xcf0] sm:$0xff] }
 0x377   :  { %v1470_v10 = vunpack.c.l.s8.bf16 %v550_v18  ;;  %v1472_v20 = vunpack.c.l.s8.bf16 %v552_v13  ;;  %v1478_v21 = vunpack.c.h.s8.bf16 %v550_v18  ;;  %v1480_v17 = vunpack.c.h.s8.bf16 %v552_v13 }
 0x379   :  { %2562 = vmatpush1.bf16.msra.mxu0 %v1398_v15  ;;  %2890 = vmatpush1.bf16.msra.mxu1 %v1400_v16  ;;  %v1479_v15 = vunpack.c.h.s8.bf16 %v551_v4  ;;  %v1481_v16 = vunpack.c.h.s8.bf16 %v553_v7 }
 0x37a   :  { %2563 = vmatprep.subr.bf16.mxu0 %v1407_v12  ;;  %2891 = vmatprep.subr.bf16.mxu1 %v1409_v60  ;;  %v559_v12 = vld [vmem:[%s6117_s1 + $0xd28] sm:$0xff]  ;;  %v561_v60 = vld [vmem:[%s6117_s1 + $0xd38] sm:$0xff] }
 0x37d   :  { %2564 = vmatpush1.bf16.msra.mxu0 %v1406_v22  ;;  %2892 = vmatpush1.bf16.msra.mxu1 %v1408_v28  ;;  %v1487_v22 = vunpack.c.l.s8.bf16 %v559_v12  ;;  %v1489_v28 = vunpack.c.l.s8.bf16 %v561_v60 }
 0x37e   :  { %2565 = vmatprep.subr.bf16.mxu0 %v1415_v1  ;;  %2893 = vmatprep.subr.bf16.mxu1 %v1417_v23  ;;  %v558_v1 = vld [vmem:[%s6117_s1 + $0xd20] sm:$0xff]  ;;  %v560_v23 = vld [vmem:[%s6117_s1 + $0xd30] sm:$0xff] }
 0x37f   :  { %v1486_v33 = vunpack.c.l.s8.bf16 %v558_v1  ;;  %v1488_v24 = vunpack.c.l.s8.bf16 %v560_v23  ;;  %v1494_v29 = vunpack.c.h.s8.bf16 %v558_v1  ;;  %v1496_v43 = vunpack.c.h.s8.bf16 %v560_v23 }
 0x381   :  { %2566 = vmatpush1.bf16.msra.mxu0 %v1414_v26  ;;  %2894 = vmatpush1.bf16.msra.mxu1 %v1416_v27  ;;  %v1495_v26 = vunpack.c.h.s8.bf16 %v559_v12  ;;  %v1497_v27 = vunpack.c.h.s8.bf16 %v561_v60 }
 0x382   :  { %2576 = vmatprep.subr.bf16.mxu0 %v1423_v25  ;;  %2904 = vmatprep.subr.bf16.mxu1 %v1425_v54  ;;  %v567_v25 = vld [vmem:[%s6117_s1 + $0xd68] sm:$0xff]  ;;  %v569_v54 = vld [vmem:[%s6117_s1 + $0xd78] sm:$0xff] }
 0x384   :  { %2568 = vmatmul.mubr.bf16.vlgmr.msra.gmra.mrb[4].mxu0 %v4659_v5  ;;  %2896 = vmatmul.mubr.bf16.vlgmr.msra.gmra.mrb[4].mxu1 %v4659_v5  ;;  %v1438_v5 = vunpack.c.l.s8.bf16 %v534_v41 }
 0x385   :  { %2577 = vmatpush1.bf16.msra.mxu0 %v1422_v30  ;;  %2905 = vmatpush1.bf16.msra.mxu1 %v1424_v31  ;;  %v1503_v30 = vunpack.c.l.s8.bf16 %v567_v25  ;;  %v1505_v31 = vunpack.c.l.s8.bf16 %v569_v54 }
 0x386   :  { %2578 = vmatprep.subr.bf16.mxu0 %v1431_v32  ;;  %2906 = vmatprep.subr.bf16.mxu1 %v1433_v34  ;;  %v566_v32 = vld [vmem:[%s6117_s1 + $0xd60] sm:$0xff]  ;;  %v568_v34 = vld [vmem:[%s6117_s1 + $0xd70] sm:$0xff] }
 0x387   :  { %2608 = vmatprep.mubr.bf16.mxu0 %v4667_v2  ;;  %2936 = vmatprep.mubr.bf16.mxu1 %v4667_v2  ;;  %v1448_v2 = vunpack.c.h.s8.bf16 %v536_v47  ;;  %v1502_v35 = vunpack.c.l.s8.bf16 %v566_v32  ;;  %v1504_v62 = vunpack.c.l.s8.bf16 %v568_v34  ;;  %v1510_v41 = vunpack.c.h.s8.bf16 %v566_v32 }
 0x388   :  { %v1512_v47 = vunpack.c.h.s8.bf16 %v568_v34 }
 0x389   :  { %2579 = vmatpush1.bf16.msra.mxu0 %v1430_v40  ;;  %2907 = vmatpush1.bf16.msra.mxu1 %v1432_v46  ;;  %v1511_v40 = vunpack.c.h.s8.bf16 %v567_v25  ;;  %v1513_v46 = vunpack.c.h.s8.bf16 %v569_v54 }
 0x38a   :  { %2580 = vmatprep.subr.bf16.mxu0 %v1439_v44  ;;  %2908 = vmatprep.subr.bf16.mxu1 %v1441_v45  ;;  %v575_v44 = vld [vmem:[%s6117_s1 + $0xda8] sm:$0xff]  ;;  %v577_v45 = vld [vmem:[%s6117_s1 + $0xdb8] sm:$0xff] }
 0x38d   :  { %2581 = vmatpush1.bf16.msra.mxu0 %v1438_v5  ;;  %2909 = vmatpush1.bf16.msra.mxu1 %v1440_v48  ;;  %v1519_v5 = vunpack.c.l.s8.bf16 %v575_v44  ;;  %v1521_v48 = vunpack.c.l.s8.bf16 %v577_v45 }
 0x38e   :  { %2582 = vmatprep.subr.bf16.mxu0 %v1447_v51  ;;  %2910 = vmatprep.subr.bf16.mxu1 %v1449_v52  ;;  %v574_v51 = vld [vmem:[%s6117_s1 + $0xda0] sm:$0xff]  ;;  %v576_v52 = vld [vmem:[%s6117_s1 + $0xdb0] sm:$0xff] }
 0x38f   :  { %v1518_v53 = vunpack.c.l.s8.bf16 %v574_v51  ;;  %v1520_v56 = vunpack.c.l.s8.bf16 %v576_v52  ;;  %v1526_v59 = vunpack.c.h.s8.bf16 %v574_v51  ;;  %v1528_v63 = vunpack.c.h.s8.bf16 %v576_v52 }
 0x391   :  { %2583 = vmatpush1.bf16.msra.mxu0 %v1446_v57  ;;  %2911 = vmatpush1.bf16.msra.mxu1 %v1448_v2  ;;  %v1527_v57 = vunpack.c.h.s8.bf16 %v575_v44  ;;  %v1529_v2 = vunpack.c.h.s8.bf16 %v577_v45 }
 0x392   :  { %2584 = vmatprep.subr.bf16.mxu0 %v1455_v58  ;;  %2912 = vmatprep.subr.bf16.mxu1 %v1457_v61  ;;  %v583_v58 = vld [vmem:[%s6117_s1 + $0xde8] sm:$0xff]  ;;  %v585_v61 = vld [vmem:[%s6117_s1 + $0xdf8] sm:$0xff] }
 0x395   :  { %2585 = vmatpush1.bf16.msra.mxu0 %v1454_v0  ;;  %2913 = vmatpush1.bf16.msra.mxu1 %v1456_v50  ;;  %v1535_v0 = vunpack.c.l.s8.bf16 %v583_v58  ;;  %v1537_v50 = vunpack.c.l.s8.bf16 %v585_v61 }
 0x396   :  { %2586 = vmatprep.subr.bf16.mxu0 %v1463_v6  ;;  %2914 = vmatprep.subr.bf16.mxu1 %v1465_v3  ;;  %v582_v6 = vld [vmem:[%s6117_s1 + $0xde0] sm:$0xff]  ;;  %v584_v3 = vld [vmem:[%s6117_s1 + $0xdf0] sm:$0xff] }
 0x397   :  { %v1534_v4 = vunpack.c.l.s8.bf16 %v582_v6  ;;  %v1536_v7 = vunpack.c.l.s8.bf16 %v584_v3  ;;  %v1542_v18 = vunpack.c.h.s8.bf16 %v582_v6  ;;  %v1544_v13 = vunpack.c.h.s8.bf16 %v584_v3 }
 0x399   :  { %2587 = vmatpush1.bf16.msra.mxu0 %v1462_v8  ;;  %2915 = vmatpush1.bf16.msra.mxu1 %v1464_v9  ;;  %v1543_v8 = vunpack.c.h.s8.bf16 %v583_v58  ;;  %v1545_v9 = vunpack.c.h.s8.bf16 %v585_v61 }
 0x39a   :  { %2588 = vmatprep.subr.bf16.mxu0 %v1471_v42  ;;  %2916 = vmatprep.subr.bf16.mxu1 %v1473_v14  ;;  %v591_v42 = vld [vmem:[%s6117_s1 + $0xe28] sm:$0xff]  ;;  %v593_v14 = vld [vmem:[%s6117_s1 + $0xe38] sm:$0xff] }
 0x39d   :  { %2589 = vmatpush1.bf16.msra.mxu0 %v1470_v10  ;;  %2917 = vmatpush1.bf16.msra.mxu1 %v1472_v20  ;;  %v1551_v10 = vunpack.c.l.s8.bf16 %v591_v42  ;;  %v1553_v20 = vunpack.c.l.s8.bf16 %v593_v14 }
 0x39e   :  { %2590 = vmatprep.subr.bf16.mxu0 %v1479_v15  ;;  %2918 = vmatprep.subr.bf16.mxu1 %v1481_v16  ;;  %v590_v15 = vld [vmem:[%s6117_s1 + $0xe20] sm:$0xff]  ;;  %v592_v16 = vld [vmem:[%s6117_s1 + $0xe30] sm:$0xff] }
 0x39f   :  { %v1550_v12 = vunpack.c.l.s8.bf16 %v590_v15  ;;  %v1552_v60 = vunpack.c.l.s8.bf16 %v592_v16  ;;  %v1558_v1 = vunpack.c.h.s8.bf16 %v590_v15  ;;  %v1560_v23 = vunpack.c.h.s8.bf16 %v592_v16 }
 0x3a1   :  { %2591 = vmatpush1.bf16.msra.mxu0 %v1478_v21  ;;  %2919 = vmatpush1.bf16.msra.mxu1 %v1480_v17  ;;  %v1559_v21 = vunpack.c.h.s8.bf16 %v591_v42  ;;  %v1561_v17 = vunpack.c.h.s8.bf16 %v593_v14 }
 0x3a2   :  { %2592 = vmatprep.subr.bf16.mxu0 %v1487_v22  ;;  %2920 = vmatprep.subr.bf16.mxu1 %v1489_v28  ;;  %v599_v22 = vld [vmem:[%s6117_s1 + $0xe68] sm:$0xff]  ;;  %v601_v28 = vld [vmem:[%s6117_s1 + $0xe78] sm:$0xff] }
 0x3a3   :  { %v1575_v54 = vunpack.c.h.s8.bf16 %v599_v22 }
 0x3a5   :  { %2593 = vmatpush1.bf16.msra.mxu0 %v1486_v33  ;;  %2921 = vmatpush1.bf16.msra.mxu1 %v1488_v24  ;;  %v1567_v33 = vunpack.c.l.s8.bf16 %v599_v22  ;;  %v1569_v24 = vunpack.c.l.s8.bf16 %v601_v28 }
 0x3a6   :  { %2594 = vmatprep.subr.bf16.mxu0 %v1495_v26  ;;  %2922 = vmatprep.subr.bf16.mxu1 %v1497_v27  ;;  %v598_v26 = vld [vmem:[%s6117_s1 + $0xe60] sm:$0xff]  ;;  %v600_v27 = vld [vmem:[%s6117_s1 + $0xe70] sm:$0xff] }
 0x3a7   :  { %v1568_v25 = vunpack.c.l.s8.bf16 %v600_v27 }
 0x3a9   :  { %2595 = vmatpush1.bf16.msra.mxu0 %v1494_v29  ;;  %2923 = vmatpush1.bf16.msra.mxu1 %v1496_v43  ;;  %v1577_v29 = vunpack.c.h.s8.bf16 %v601_v28  ;;  %v607_v43 = vld [vmem:[%s6117_s1 + $0xea8] sm:$0xff] }
 0x3aa   :  { %2596 = vmatprep.subr.bf16.mxu0 %v1503_v30  ;;  %2924 = vmatprep.subr.bf16.mxu1 %v1505_v31  ;;  %v609_v30 = vld [vmem:[%s6117_s1 + $0xeb8] sm:$0xff]  ;;  %v1574_v31 = vunpack.c.h.s8.bf16 %v598_v26  ;;  %v1583_v32 = vunpack.c.l.s8.bf16 %v607_v43  ;;  %v1591_v44 = vunpack.c.h.s8.bf16 %v607_v43 }
 0x3ab   :  { %v1585_v34 = vunpack.c.l.s8.bf16 %v609_v30  ;;  %v1593_v45 = vunpack.c.h.s8.bf16 %v609_v30 }
 0x3ad   :  { %2597 = vmatpush1.bf16.msra.mxu0 %v1502_v35  ;;  %2925 = vmatpush1.bf16.msra.mxu1 %v1504_v62  ;;  %v606_v35 = vld [vmem:[%s6117_s1 + $0xea0] sm:$0xff]  ;;  %v608_v62 = vld [vmem:[%s6117_s1 + $0xeb0] sm:$0xff] }
 0x3ae   :  { %2598 = vmatprep.subr.bf16.mxu0 %v1511_v40  ;;  %2926 = vmatprep.subr.bf16.mxu1 %v1513_v46  ;;  %v1582_v40 = vunpack.c.l.s8.bf16 %v606_v35  ;;  %v1584_v46 = vunpack.c.l.s8.bf16 %v608_v62 }
 0x3b1   :  { %2599 = vmatpush1.bf16.msra.mxu0 %v1510_v41  ;;  %2927 = vmatpush1.bf16.msra.mxu1 %v1512_v47  ;;  %v615_v41 = vld [vmem:[%s6117_s1 + $0xee8] sm:$0xff]  ;;  %v617_v47 = vld [vmem:[%s6117_s1 + $0xef8] sm:$0xff] }
 0x3b2   :  { %2600 = vmatprep.subr.bf16.mxu0 %v1519_v5  ;;  %2928 = vmatprep.subr.bf16.mxu1 %v1521_v48  ;;  %v1590_v5 = vunpack.c.h.s8.bf16 %v606_v35  ;;  %v1592_v48 = vunpack.c.h.s8.bf16 %v608_v62  ;;  %v1599_v51 = vunpack.c.l.s8.bf16 %v615_v41  ;;  %v1601_v52 = vunpack.c.l.s8.bf16 %v617_v47 }
 0x3b3   :  { %v1607_v58 = vunpack.c.h.s8.bf16 %v615_v41  ;;  %v1609_v61 = vunpack.c.h.s8.bf16 %v617_v47  ;;  %v3002_v35 = vsub.s32 3, %v3981_v38  ;;  %v648_v41 = vld [vmem:[%s6117_s1 + $0xff0] sm:$0xff] }
 0x3b5   :  { %2601 = vmatpush1.bf16.msra.mxu0 %v1518_v53  ;;  %2929 = vmatpush1.bf16.msra.mxu1 %v1520_v56  ;;  %v614_v53 = vld [vmem:[%s6117_s1 + $0xee0] sm:$0xff]  ;;  %v616_v56 = vld [vmem:[%s6117_s1 + $0xef0] sm:$0xff] }
 0x3b6   :  { %2602 = vmatprep.subr.bf16.mxu0 %v1527_v57  ;;  %2930 = vmatprep.subr.bf16.mxu1 %v1529_v2  ;;  %v1598_v57 = vunpack.c.l.s8.bf16 %v614_v53  ;;  %v1600_v2 = vunpack.c.l.s8.bf16 %v616_v56 }
 0x3b9   :  { %2603 = vmatpush1.bf16.msra.mxu0 %v1526_v59  ;;  %2931 = vmatpush1.bf16.msra.mxu1 %v1528_v63  ;;  %v623_v59 = vld [vmem:[%s6117_s1 + $0xf28] sm:$0xff]  ;;  %v625_v63 = vld [vmem:[%s6117_s1 + $0xf38] sm:$0xff] }
 0x3ba   :  { %2604 = vmatprep.subr.bf16.mxu0 %v1535_v0  ;;  %2932 = vmatprep.subr.bf16.mxu1 %v1537_v50  ;;  %v1606_v0 = vunpack.c.h.s8.bf16 %v614_v53  ;;  %v1608_v50 = vunpack.c.h.s8.bf16 %v616_v56  ;;  %v1615_v6 = vunpack.c.l.s8.bf16 %v623_v59  ;;  %v1617_v3 = vunpack.c.l.s8.bf16 %v625_v63 }
 0x3bb   :  { %v1623_v42 = vunpack.c.h.s8.bf16 %v623_v59  ;;  %v1625_v14 = vunpack.c.h.s8.bf16 %v625_v63  ;;  %v3142_v59 = vld [vmem:[%s6121_s4 + $0x180] sm:$0xff]  ;;  %v3143_v63 = vld [vmem:[%s6121_s4 + $0x188] sm:$0xff] }
 0x3bd   :  { %2605 = vmatpush1.bf16.msra.mxu0 %v1534_v4  ;;  %2933 = vmatpush1.bf16.msra.mxu1 %v1536_v7  ;;  %v622_v4 = vld [vmem:[%s6117_s1 + $0xf20] sm:$0xff]  ;;  %v624_v7 = vld [vmem:[%s6117_s1 + $0xf30] sm:$0xff] }
 0x3be   :  { %2606 = vmatprep.subr.bf16.mxu0 %v1543_v8  ;;  %2934 = vmatprep.subr.bf16.mxu1 %v1545_v9  ;;  %v1614_v8 = vunpack.c.l.s8.bf16 %v622_v4  ;;  %v1616_v9 = vunpack.c.l.s8.bf16 %v624_v7 }
 0x3c1   :  { %2607 = vmatpush1.bf16.msra.mxu0 %v1542_v18  ;;  %2935 = vmatpush1.bf16.msra.mxu1 %v1544_v13  ;;  %v631_v18 = vld [vmem:[%s6117_s1 + $0xf68] sm:$0xff]  ;;  %v633_v13 = vld [vmem:[%s6117_s1 + $0xf78] sm:$0xff] }
 0x3c2   :  { %2617 = vmatprep.subr.bf16.mxu0 %v1551_v10  ;;  %2945 = vmatprep.subr.bf16.mxu1 %v1553_v20  ;;  %v1622_v10 = vunpack.c.h.s8.bf16 %v622_v4  ;;  %v1624_v20 = vunpack.c.h.s8.bf16 %v624_v7  ;;  %v1631_v15 = vunpack.c.l.s8.bf16 %v631_v18  ;;  %v1633_v16 = vunpack.c.l.s8.bf16 %v633_v13  ;;  %v3094_v7 = vld [vmem:[%s6121_s4] sm:$0xff] }
 0x3c3   :  { %v1639_v22 = vunpack.c.h.s8.bf16 %v631_v18  ;;  %v1641_v28 = vunpack.c.h.s8.bf16 %v633_v13  ;;  %v3672_v4 = vpack.c.bf16 %v3143_v63, %v3142_v59  ;;  %v3113_v13 = vld [vmem:[%s6121_s4 + $0x98] sm:$0xff]  ;;  %v3102_v59 = vld [vmem:[%s6121_s4 + $0x40] sm:$0xff]  ;;  %v3103_v63 = vld [vmem:[%s6121_s4 + $0x48] sm:$0xff] }
 0x3c4   :  { %2609 = vmatmul.mubr.bf16.vlgmr.msra.gmra.mrb[4].mxu0 %v4772_v11  ;;  %2937 = vmatmul.mubr.bf16.vlgmr.msra.gmra.mrb[4].mxu1 %v4772_v11  ;;  %v1566_v11 = vunpack.c.l.s8.bf16 %v598_v26 }
 0x3c5   :  { %2618 = vmatpush1.bf16.msra.mxu0 %v1550_v12  ;;  %2946 = vmatpush1.bf16.msra.mxu1 %v1552_v60  ;;  %v630_v12 = vld [vmem:[%s6117_s1 + $0xf60] sm:$0xff]  ;;  %v632_v60 = vld [vmem:[%s6117_s1 + $0xf70] sm:$0xff] }
 0x3c6   :  { %2619 = vmatprep.subr.bf16.mxu0 %v1559_v21  ;;  %2947 = vmatprep.subr.bf16.mxu1 %v1561_v17  ;;  %v1630_v21 = vunpack.c.l.s8.bf16 %v630_v12  ;;  %v1632_v17 = vunpack.c.l.s8.bf16 %v632_v60 }
 0x3c7   :  { %2649 = vmatprep.mubr.bf16.mxu0 %v4780_v19  ;;  %2977 = vmatprep.mubr.bf16.mxu1 %v4780_v19  ;;  %v1576_v19 = vunpack.c.h.s8.bf16 %v600_v27 }
 0x3c9   :  { %2620 = vmatpush1.bf16.msra.mxu0 %v1558_v1  ;;  %2948 = vmatpush1.bf16.msra.mxu1 %v1560_v23  ;;  %v639_v1 = vld [vmem:[%s6117_s1 + $0xfa8] sm:$0xff]  ;;  %v641_v23 = vld [vmem:[%s6117_s1 + $0xfb8] sm:$0xff] }
 0x3ca   :  { %2621 = vmatprep.subr.bf16.mxu0 %v1567_v33  ;;  %2949 = vmatprep.subr.bf16.mxu1 %v1569_v24  ;;  %v1638_v33 = vunpack.c.h.s8.bf16 %v630_v12  ;;  %v1640_v24 = vunpack.c.h.s8.bf16 %v632_v60  ;;  %v1647_v26 = vunpack.c.l.s8.bf16 %v639_v1  ;;  %v1649_v27 = vunpack.c.l.s8.bf16 %v641_v23  ;;  %v3096_v12 = vld [vmem:[%s6121_s4 + $0x10] sm:$0xff]  ;;  %v3097_v60 = vld [vmem:[%s6121_s4 + $0x18] sm:$0xff] }
 0x3cb   :  { %v1655_v43 = vunpack.c.h.s8.bf16 %v639_v1  ;;  %v1657_v30 = vunpack.c.h.s8.bf16 %v641_v23  ;;  %v3129_v1 = vld [vmem:[%s6121_s4 + $0x118] sm:$0xff]  ;;  %v3114_v23 = vld [vmem:[%s6121_s4 + $0xa0] sm:$0xff] }
 0x3cd   :  { %2622 = vmatpush1.bf16.msra.mxu0 %v1566_v11  ;;  %2950 = vmatpush1.bf16.msra.mxu1 %v1568_v25  ;;  %v638_v11 = vld [vmem:[%s6117_s1 + $0xfa0] sm:$0xff]  ;;  %v640_v25 = vld [vmem:[%s6117_s1 + $0xfb0] sm:$0xff] }
 0x3ce   :  { %2623 = vmatprep.subr.bf16.mxu0 %v1575_v54  ;;  %2951 = vmatprep.subr.bf16.mxu1 %v1577_v29  ;;  %v1646_v54 = vunpack.c.l.s8.bf16 %v638_v11  ;;  %v1648_v29 = vunpack.c.l.s8.bf16 %v640_v25  ;;  %v1654_v62 = vunpack.c.h.s8.bf16 %v638_v11  ;;  %v3646_v11 = vpack.c.bf16 %v3097_v60, %v3096_v12  ;;  %v3123_v12 = vld [vmem:[%s6121_s4 + $0xe8] sm:$0xff]  ;;  %v3154_v60 = vld [vmem:[%s6121_s4 + $0x1e0] sm:$0xff] }
 0x3d1   :  { %2624 = vmatpush1.bf16.msra.mxu0 %v1574_v31  ;;  %2952 = vmatpush1.bf16.msra.mxu1 %v1576_v19  ;;  %v2994_v31 = vsub.s32 1, %v3981_v38  ;;  %v647_v19 = vld [vmem:[%s6117_s1 + $0xfe8] sm:$0xff] }
 0x3d2   :  { %2625 = vmatprep.subr.bf16.mxu0 %v1583_v32  ;;  %2953 = vmatprep.subr.bf16.mxu1 %v1585_v34  ;;  %v649_v32 = vld [vmem:[%s6117_s1 + $0xff8] sm:$0xff]  ;;  %v5674_v34 = vld [vmem:[%s6119_s2] sm:$0xff]  ;;  %v1671_v53 = vunpack.c.h.s8.bf16 %v647_v19 }
 0x3d3   :  { %v2995_v47 = vrot.slane %v5674_v34, %v2994_v31  ;;  %v1673_v56 = vunpack.c.h.s8.bf16 %v649_v32 }
 0x3d5   :  { %2626 = vmatpush1.bf16.msra.mxu0 %v1582_v40  ;;  %2954 = vmatpush1.bf16.msra.mxu1 %v1584_v46  ;;  %v1656_v40 = vunpack.c.h.s8.bf16 %v640_v25  ;;  %v1663_v46 = vunpack.c.l.s8.bf16 %v647_v19  ;;  %v3116_v19 = vld [vmem:[%s6121_s4 + $0xb0] sm:$0xff] }
 0x3d6   :  { %2627 = vmatprep.subr.bf16.mxu0 %v1591_v44  ;;  %2955 = vmatprep.subr.bf16.mxu1 %v1593_v45  ;;  %v1665_v44 = vunpack.c.l.s8.bf16 %v649_v32  ;;  %v646_v45 = vld [vmem:[%s6117_s1 + $0xfe0] sm:$0xff]  ;;  %v3117_v32 = vld [vmem:[%s6121_s4 + $0xb8] sm:$0xff] }
 0x3d9   :  { %2628 = vmatpush1.bf16.msra.mxu0 %v1590_v5  ;;  %2956 = vmatpush1.bf16.msra.mxu1 %v1592_v48  ;;  %v5687_v5 = vld [vmem:[%s6120_s3] sm:$0xff]  ;;  %v3003_v48 = vrot.slane %v5674_v34, %v3002_v35 }
 0x3da   :  { %2629 = vmatprep.subr.bf16.mxu0 %v1599_v51  ;;  %2957 = vmatprep.subr.bf16.mxu1 %v1601_v52  ;;  %v1662_v51 = vunpack.c.l.s8.bf16 %v646_v45  ;;  %v1664_v52 = vunpack.c.l.s8.bf16 %v648_v41 }
 0x3dd   :  { %2630 = vmatpush1.bf16.msra.mxu0 %v1598_v57  ;;  %2958 = vmatpush1.bf16.msra.mxu1 %v1600_v2  ;;  %v3110_v57 = vld [vmem:[%s6121_s4 + $0x80] sm:$0xff]  ;;  %v3029_v2 = vmul.f32 %v2995_v47, %v5224_v37  ;;  %v1670_v37 = vunpack.c.h.s8.bf16 %v646_v45  ;;  %v3100_v45 = vld [vmem:[%s6121_s4 + $0x30] sm:$0xff] }
 0x3de   :  { %2631 = vmatprep.subr.bf16.mxu0 %v1607_v58  ;;  %2959 = vmatprep.subr.bf16.mxu1 %v1609_v61  ;;  %v3045_v58 = vrot.slane %v5687_v5, %v2994_v31  ;;  %v3111_v61 = vld [vmem:[%s6121_s4 + $0x88] sm:$0xff]  ;;  %v3132_v47 = vld [vmem:[%s6121_s4 + $0x130] sm:$0xff] }
 0x3df   :  { %v3131_v31 = vld [vmem:[%s6121_s4 + $0x128] sm:$0xff] }
 0x3e1   :  { %2632 = vmatpush1.bf16.msra.mxu0 %v1606_v0  ;;  %2960 = vmatpush1.bf16.msra.mxu1 %v1608_v50  ;;  %v3031_v0 = vmul.f32 %v3003_v48, %v5226_v39  ;;  %v3053_v50 = vrot.slane %v5687_v5, %v3002_v35  ;;  %v3126_v39 = vld [vmem:[%s6121_s4 + $0x100] sm:$0xff]  ;;  %v3148_v35 = vld [vmem:[%s6121_s4 + $0x1b0] sm:$0xff] }
 0x3e2   :  { %2633 = vmatprep.subr.bf16.mxu0 %v1615_v6  ;;  %2961 = vmatprep.subr.bf16.mxu1 %v1617_v3  ;;  %v1672_v6 = vunpack.c.h.s8.bf16 %v648_v41  ;;  %v3640_v3 = vpack.c.bf16 %v3111_v61, %v3110_v57  ;;  %v3101_v41 = vld [vmem:[%s6121_s4 + $0x38] sm:$0xff]  ;;  %v3151_v57 = vld [vmem:[%s6121_s4 + $0x1c8] sm:$0xff] }
 0x3e3   :  { %v3081_v18 = vadd.f32 %v3053_v50, %v3031_v0  ;;  %v3134_v0 = vld [vmem:[%s6121_s4 + $0x140] sm:$0xff] }
 0x3e5   :  { %2634 = vmatpush1.bf16.msra.mxu0 %v1614_v8  ;;  %2962 = vmatpush1.bf16.msra.mxu1 %v1616_v9  ;;  %v3095_v8 = vld [vmem:[%s6121_s4 + $0x8] sm:$0xff]  ;;  %v3079_v9 = vadd.f32 %v3045_v58, %v3029_v2  ;;  %v3654_v2 = vpack.c.bf16 %v3101_v41, %v3100_v45  ;;  %v3141_v45 = vld [vmem:[%s6121_s4 + $0x178] sm:$0xff]  ;;  %v3174_v41 = vld [vmem:[%s6121_s4 + $0x280] sm:$0xff] }
 0x3e6   :  { %2635 = vmatprep.subr.bf16.mxu0 %v1623_v42  ;;  %2963 = vmatprep.subr.bf16.mxu1 %v1625_v14  ;;  %v3127_v42 = vld [vmem:[%s6121_s4 + $0x108] sm:$0xff]  ;;  %v3112_v14 = vld [vmem:[%s6121_s4 + $0x90] sm:$0xff] }
 0x3e9   :  { %2636 = vmatpush1.bf16.msra.mxu0 %v1622_v10  ;;  %2964 = vmatpush1.bf16.msra.mxu1 %v1624_v20  ;;  %v3144_v10 = vld [vmem:[%s6121_s4 + $0x190] sm:$0xff]  ;;  %v3145_v20 = vld [vmem:[%s6121_s4 + $0x198] sm:$0xff] }
 0x3ea   :  { %2637 = vmatprep.subr.bf16.mxu0 %v1631_v15  ;;  %2965 = vmatprep.subr.bf16.mxu1 %v1633_v16  ;;  %v3642_v15 = vpack.c.bf16 %v3095_v8, %v3094_v7  ;;  %v3674_v16 = vpack.c.bf16 %v3127_v42, %v3126_v39  ;;  %v3153_v7 = vld [vmem:[%s6121_s4 + $0x1d8] sm:$0xff]  ;;  %v3658_v8 = vpack.c.bf16 %v3103_v63, %v3102_v59 }
 0x3eb   :  { %v3177_v59 = vld [vmem:[%s6121_s4 + $0x298] sm:$0xff] }
 0x3ed   :  { %2638 = vmatpush1.bf16.msra.mxu0 %v1630_v21  ;;  %2966 = vmatpush1.bf16.msra.mxu1 %v1632_v17  ;;  %v3128_v21 = vld [vmem:[%s6121_s4 + $0x110] sm:$0xff]  ;;  %v3087_v17 = vmax.f32 %v3079_v9, 0.0  ;;  %v2990_v9 = vsub.s32 0, %v3981_v38 }
 0x3ee   :  { %2639 = vmatprep.subr.bf16.mxu0 %v1639_v22  ;;  %2967 = vmatprep.subr.bf16.mxu1 %v1641_v28  ;;  %v3644_v22 = vpack.c.bf16 %v3113_v13, %v3112_v14  ;;  %v3676_v28 = vpack.c.bf16 %v3145_v20, %v3144_v10  ;;  %v3678_v25 = vpack.c.bf16 %v3129_v1, %v3128_v21  ;;  %v3104_v14 = vld [vmem:[%s6121_s4 + $0x50] sm:$0xff]  ;;  %v2998_v10 = vsub.s32 2, %v3981_v38  ;;  %v3155_v21 = vld [vmem:[%s6121_s4 + $0x1e8] sm:$0xff] }
 0x3ef   :  { %v3136_v13 = vld [vmem:[%s6121_s4 + $0x150] sm:$0xff] }
 0x3f1   :  { %2640 = vmatpush1.bf16.msra.mxu0 %v1638_v33  ;;  %2968 = vmatpush1.bf16.msra.mxu1 %v1640_v24  ;;  %v3115_v33 = vld [vmem:[%s6121_s4 + $0xa8] sm:$0xff]  ;;  %v3089_v24 = vmax.f32 %v3081_v18, 0.0  ;;  %v3105_v18 = vld [vmem:[%s6121_s4 + $0x58] sm:$0xff] }
 0x3f2   :  { %2641 = vmatprep.subr.bf16.mxu0 %v1647_v26  ;;  %2969 = vmatprep.subr.bf16.mxu1 %v1649_v27  ;;  %v3146_v26 = vld [vmem:[%s6121_s4 + $0x1a0] sm:$0xff]  ;;  %v3147_v27 = vld [vmem:[%s6121_s4 + $0x1a8] sm:$0xff] }
 0x3f5   :  { %2642 = vmatpush1.bf16.msra.mxu0 %v1646_v54  ;;  %2970 = vmatpush1.bf16.msra.mxu1 %v1648_v29  ;;  %v3648_v54 = vpack.c.bf16 %v3115_v33, %v3114_v23  ;;  %v3098_v29 = vld [vmem:[%s6121_s4 + $0x20] sm:$0xff]  ;;  %v3107_v33 = vld [vmem:[%s6121_s4 + $0x68] sm:$0xff] }
 0x3f6   :  { %2643 = vmatprep.subr.bf16.mxu0 %v1655_v43  ;;  %2971 = vmatprep.subr.bf16.mxu1 %v1657_v30  ;;  %v3130_v43 = vld [vmem:[%s6121_s4 + $0x120] sm:$0xff]  ;;  %v3680_v30 = vpack.c.bf16 %v3147_v27, %v3146_v26  ;;  %v2999_v26 = vrot.slane %v5674_v34, %v2998_v10  ;;  %v3696_v27 = vpack.c.bf16 %v3155_v21, %v3154_v60  ;;  %v3181_v60 = vld [vmem:[%s6121_s4 + $0x2b8] sm:$0xff] }
 0x3f7   :  { %v3106_v23 = vld [vmem:[%s6121_s4 + $0x60] sm:$0xff] }
 0x3f9   :  { %2644 = vmatpush1.bf16.msra.mxu0 %v1654_v62  ;;  %2972 = vmatpush1.bf16.msra.mxu1 %v1656_v40  ;;  %v3149_v62 = vld [vmem:[%s6121_s4 + $0x1b8] sm:$0xff] }
 0x3fa   :  { %2645 = vmatprep.subr.bf16.mxu0 %v1663_v46  ;;  %2973 = vmatprep.subr.bf16.mxu1 %v1665_v44  ;;  %v3682_v46 = vpack.c.bf16 %v3131_v31, %v3130_v43  ;;  %v3652_v44 = vpack.c.bf16 %v3117_v32, %v3116_v19  ;;  %v3684_v48 = vpack.c.bf16 %v3149_v62, %v3148_v35  ;;  %v3108_v35 = vld [vmem:[%s6121_s4 + $0x70] sm:$0xff]  ;;  %v3109_v62 = vld [vmem:[%s6121_s4 + $0x78] sm:$0xff] }
 0x3fb   :  { %v3041_v43 = vrot.slane %v5687_v5, %v2990_v9 }
 0x3fd   :  { %2646 = vmatpush1.bf16.msra.mxu0 %v1662_v51  ;;  %2974 = vmatpush1.bf16.msra.mxu1 %v1664_v52  ;;  %v3133_v51 = vld [vmem:[%s6121_s4 + $0x138] sm:$0xff]  ;;  %v3118_v52 = vld [vmem:[%s6121_s4 + $0xc0] sm:$0xff] }
 0x3fe   :  { %2647 = vmatprep.subr.bf16.mxu0 %v1671_v53  ;;  %2975 = vmatprep.subr.bf16.mxu1 %v1673_v56  ;;  %v3119_v53 = vld [vmem:[%s6121_s4 + $0xc8] sm:$0xff]  ;;  %v3150_v56 = vld [vmem:[%s6121_s4 + $0x1c0] sm:$0xff]  ;;  %v3686_v58 = vpack.c.bf16 %v3133_v51, %v3132_v47 }
 0x3ff   :  { %v3656_v61 = vpack.c.bf16 %v3119_v53, %v3118_v52  ;;  %v3688_v50 = vpack.c.bf16 %v3151_v57, %v3150_v56  ;;  %v3175_v47 = vld [vmem:[%s6121_s4 + $0x288] sm:$0xff]  ;;  %v3190_v52 = vld [vmem:[%s6121_s4 + $0x300] sm:$0xff] }
 0x400   :  { %v3704_v53 = vpack.c.bf16 %v3175_v47, %v3174_v41  ;;  %v3158_v56 = vld [vmem:[%s6121_s4 + $0x200] sm:$0xff]  ;;  %v3159_v57 = vld [vmem:[%s6121_s4 + $0x208] sm:$0xff] }
 0x401   :  { %2648 = vmatpush1.bf16.msra.mxu0 %v1670_v37  ;;  %2976 = vmatpush1.bf16.msra.mxu1 %v1672_v6  ;;  %v3135_v37 = vld [vmem:[%s6121_s4 + $0x148] sm:$0xff]  ;;  %v3120_v6 = vld [vmem:[%s6121_s4 + $0xd0] sm:$0xff]  ;;  %v3706_v63 = vpack.c.bf16 %v3159_v57, %v3158_v56  ;;  %v3202_v41 = vld [vmem:[%s6121_s4 + $0x360] sm:$0xff] }
 0x402   :  { %3641 = vmatprep.subr.bf16.mxu0 %v3640_v3  ;;  %3673 = vmatprep.subr.bf16.mxu1 %v3672_v4  ;;  %v3121_v3 = vld [vmem:[%s6121_s4 + $0xd8] sm:$0xff]  ;;  %v3152_v4 = vld [vmem:[%s6121_s4 + $0x1d0] sm:$0xff]  ;;  %v3690_v39 = vpack.c.bf16 %v3135_v37, %v3134_v0  ;;  %v3203_v47 = vld [vmem:[%s6121_s4 + $0x368] sm:$0xff] }
 0x403   :  { %v3660_v42 = vpack.c.bf16 %v3121_v3, %v3120_v6  ;;  %v3692_v20 = vpack.c.bf16 %v3153_v7, %v3152_v4  ;;  %v3192_v37 = vld [vmem:[%s6121_s4 + $0x310] sm:$0xff]  ;;  %v3161_v4 = vld [vmem:[%s6121_s4 + $0x218] sm:$0xff]  ;;  %v3207_v56 = vld [vmem:[%s6121_s4 + $0x388] sm:$0xff] }
 0x404   :  { %2650 = vmatmul.mubr.bf16.vlgmr.msra.gmra.mrb[4].mxu0 %v4878_v49  ;;  %2978 = vmatmul.mubr.bf16.vlgmr.msra.gmra.mrb[4].mxu1 %v4878_v49  ;;  %v3099_v49 = vld [vmem:[%s6121_s4 + $0x28] sm:$0xff]  ;;  %v3160_v3 = vld [vmem:[%s6121_s4 + $0x210] sm:$0xff] }
 0x405   :  { %3643 = vmatpush3.bf16.msra.mxu0 %v3642_v15  ;;  %3294 = vmatprep.mubr.f32.mxu0 %v3087_v17  ;;  %v3650_v40 = vpack.c.bf16 %v3099_v49, %v3098_v29  ;;  %v3137_v15 = vld [vmem:[%s6121_s4 + $0x158] sm:$0xff]  ;;  %v3662_v17 = vpack.c.bf16 %v3105_v18, %v3104_v14  ;;  %v3156_v29 = vld [vmem:[%s6121_s4 + $0x1f0] sm:$0xff]  ;;  %v3710_v14 = vpack.c.bf16 %v3161_v4, %v3160_v3  ;;  %v3214_v3 = vld [vmem:[%s6121_s4 + $0x3c0] sm:$0xff] }
 0x406   :  { %3675 = vmatpush3.bf16.msra.mxu1 %v3674_v16  ;;  %3364 = vmatprep.mubr.f32.mxu1 %v3089_v24  ;;  %v3122_v16 = vld [vmem:[%s6121_s4 + $0xe0] sm:$0xff]  ;;  %v3157_v49 = vld [vmem:[%s6121_s4 + $0x1f8] sm:$0xff]  ;;  %v3215_v4 = vld [vmem:[%s6121_s4 + $0x3c8] sm:$0xff] }
 0x407   :  { %3645 = vmatprep.subr.bf16.mxu0 %v3644_v22  ;;  %3677 = vmatprep.subr.bf16.mxu1 %v3676_v28  ;;  %v2991_v22 = vrot.slane %v5674_v34, %v2990_v9  ;;  %v3694_v28 = vpack.c.bf16 %v3137_v15, %v3136_v13  ;;  %v3664_v1 = vpack.c.bf16 %v3123_v12, %v3122_v16  ;;  %v3138_v24 = vld [vmem:[%s6121_s4 + $0x160] sm:$0xff]  ;;  %v3193_v9 = vld [vmem:[%s6121_s4 + $0x318] sm:$0xff]  ;;  %v3163_v15 = vld [vmem:[%s6121_s4 + $0x228] sm:$0xff] }
 0x408   :  { %v3740_v18 = vpack.c.bf16 %v3193_v9, %v3192_v37  ;;  %v3194_v13 = vld [vmem:[%s6121_s4 + $0x320] sm:$0xff]  ;;  %v3195_v16 = vld [vmem:[%s6121_s4 + $0x328] sm:$0xff]  ;;  %v3180_v12 = vld [vmem:[%s6121_s4 + $0x2b0] sm:$0xff] }
 0x409   :  { %3647 = vmatpush3.bf16.msra.mxu0 %v3646_v11  ;;  %v3139_v11 = vld [vmem:[%s6121_s4 + $0x168] sm:$0xff]  ;;  %v3028_v31 = vmul.f32 %v2991_v22, %v5220_v36  ;;  %v3049_v36 = vrot.slane %v5687_v5, %v2998_v10  ;;  %v3196_v22 = vld [vmem:[%s6121_s4 + $0x330] sm:$0xff]  ;;  %v3213_v37 = vld [vmem:[%s6121_s4 + $0x3b8] sm:$0xff] }
 0x40a   :  { %3679 = vmatpush3.bf16.msra.mxu1 %v3678_v25  ;;  %3649 = vmatprep.subr.bf16.mxu0 %v3648_v54  ;;  %v3124_v25 = vld [vmem:[%s6121_s4 + $0xf0] sm:$0xff]  ;;  %v3125_v54 = vld [vmem:[%s6121_s4 + $0xf8] sm:$0xff]  ;;  %v3698_v19 = vpack.c.bf16 %v3139_v11, %v3138_v24  ;;  %v3182_v24 = vld [vmem:[%s6121_s4 + $0x2c0] sm:$0xff] }
 0x40b   :  { %3681 = vmatprep.subr.bf16.mxu1 %v3680_v30  ;;  %v3666_v30 = vpack.c.bf16 %v3107_v33, %v3106_v23  ;;  %v3668_v32 = vpack.c.bf16 %v3125_v54, %v3124_v25  ;;  %v3078_v51 = vadd.f32 %v3041_v43, %v3028_v31  ;;  %v3165_v23 = vld [vmem:[%s6121_s4 + $0x238] sm:$0xff]  ;;  %v3198_v25 = vld [vmem:[%s6121_s4 + $0x340] sm:$0xff]  ;;  %v3199_v43 = vld [vmem:[%s6121_s4 + $0x348] sm:$0xff] }
 0x40c   :  { %v3197_v33 = vld [vmem:[%s6121_s4 + $0x338] sm:$0xff]  ;;  %v3186_v9 = vld [vmem:[%s6121_s4 + $0x2e0] sm:$0xff] }
 0x40d   :  { %3651 = vmatpush3.bf16.msra.mxu0 %v3650_v40  ;;  %v3140_v40 = vld [vmem:[%s6121_s4 + $0x170] sm:$0xff]  ;;  %v3086_v0 = vmax.f32 %v3078_v51, 0.0  ;;  %v3746_v11 = vpack.c.bf16 %v3197_v33, %v3196_v22  ;;  %v3185_v31 = vld [vmem:[%s6121_s4 + $0x2d8] sm:$0xff]  ;;  %v3899_v22 = vmov 0.0   ;;  %v3010_v33 = vsub.s32 5, %v3981_v38 }
 0x40e   :  { %3683 = vmatpush3.bf16.msra.mxu1 %v3682_v46  ;;  %3653 = vmatprep.subr.bf16.mxu0 %v3652_v44  ;;  %v3030_v46 = vmul.f32 %v2999_v26, %v5222_v55  ;;  %v3700_v44 = vpack.c.bf16 %v3157_v49, %v3156_v29  ;;  %v3702_v55 = vpack.c.bf16 %v3141_v45, %v3140_v40  ;;  %v3183_v26 = vld [vmem:[%s6121_s4 + $0x2c8] sm:$0xff]  ;;  %v3166_v29 = vld [vmem:[%s6121_s4 + $0x240] sm:$0xff]  ;;  %v3169_v40 = vld [vmem:[%s6121_s4 + $0x258] sm:$0xff] }
 0x40f   :  { %3685 = vmatprep.subr.bf16.mxu1 %v3684_v48  ;;  %v3670_v48 = vpack.c.bf16 %v3109_v62, %v3108_v35  ;;  %v3720_v54 = vpack.c.bf16 %v3183_v26, %v3182_v24  ;;  %v3167_v49 = vld [vmem:[%s6121_s4 + $0x248] sm:$0xff]  ;;  %v3168_v62 = vld [vmem:[%s6121_s4 + $0x250] sm:$0xff]  ;;  %v3018_v24 = vsub.s32 7, %v3981_v38 }
 0x410   :  { %v3204_v51 = vld [vmem:[%s6121_s4 + $0x370] sm:$0xff] }
 0x411   :  { %3655 = vmatpush3.bf16.msra.mxu0 %v3654_v2  ;;  %v3080_v2 = vadd.f32 %v3049_v36, %v3030_v46  ;;  %v3200_v46 = vld [vmem:[%s6121_s4 + $0x350] sm:$0xff]  ;;  %v3201_v36 = vld [vmem:[%s6121_s4 + $0x358] sm:$0xff] }
 0x412   :  { %3687 = vmatpush3.bf16.msra.mxu1 %v3686_v58  ;;  %3657 = vmatprep.subr.bf16.mxu0 %v3656_v61  ;;  %v3191_v58 = vld [vmem:[%s6121_s4 + $0x308] sm:$0xff]  ;;  %v3176_v61 = vld [vmem:[%s6121_s4 + $0x290] sm:$0xff]  ;;  %v3752_v45 = vpack.c.bf16 %v3201_v36, %v3200_v46 }
 0x413   :  { %3689 = vmatprep.subr.bf16.mxu1 %v3688_v50  ;;  %v3737_v50 = vpack.c.bf16 %v3191_v58, %v3190_v52  ;;  %v3708_v6 = vpack.c.bf16 %v3177_v59, %v3176_v61  ;;  %v3088_v7 = vmax.f32 %v3080_v2, 0.0  ;;  %v3208_v2 = vld [vmem:[%s6121_s4 + $0x390] sm:$0xff]  ;;  %v3209_v58 = vld [vmem:[%s6121_s4 + $0x398] sm:$0xff]  ;;  %v3210_v59 = vld [vmem:[%s6121_s4 + $0x3a0] sm:$0xff] }
 0x414   :  { %v3764_v61 = vpack.c.bf16 %v3209_v58, %v3208_v2 }
 0x415   :  { %3659 = vmatpush3.bf16.msra.mxu0 %v3658_v8  ;;  %v3898_v8 = vmov 0.0|0.0  }
 0x416   :  { %3691 = vmatpush3.bf16.msra.mxu1 %v3690_v39  ;;  %3661 = vmatprep.subr.bf16.mxu0 %v3660_v42  ;;  %v3178_v39 = vld [vmem:[%s6121_s4 + $0x2a0] sm:$0xff]  ;;  %v3179_v42 = vld [vmem:[%s6121_s4 + $0x2a8] sm:$0xff] }
 0x417   :  { %3693 = vmatprep.subr.bf16.mxu1 %v3692_v20  ;;  %v3712_v10 = vpack.c.bf16 %v3179_v42, %v3178_v39  ;;  %v3162_v20 = vld [vmem:[%s6121_s4 + $0x220] sm:$0xff]  ;;  %v3187_v39 = vld [vmem:[%s6121_s4 + $0x2e8] sm:$0xff] }
 0x418   :  { %v3714_v21 = vpack.c.bf16 %v3163_v15, %v3162_v20  ;;  %v3728_v42 = vpack.c.bf16 %v3187_v39, %v3186_v9  ;;  %v3217_v20 = vld [vmem:[%s6121_s4 + $0x3d8] sm:$0xff]  ;;  %v3534_v39 = vld [vmem:[%s6123_s6] ss:$0 sm:$0xff] }
 0x419   :  { %3663 = vmatpush3.bf16.msra.mxu0 %v3662_v17  ;;  %v3743_v17 = vpack.c.bf16 %v3195_v16, %v3194_v13  ;;  %v3188_v16 = vld [vmem:[%s6121_s4 + $0x2f0] sm:$0xff] }
 0x41a   :  { %3695 = vmatpush3.bf16.msra.mxu1 %v3694_v28  ;;  %3665 = vmatprep.subr.bf16.mxu0 %v3664_v1  ;;  %v3716_v28 = vpack.c.bf16 %v3181_v60, %v3180_v12  ;;  %v3164_v1 = vld [vmem:[%s6121_s4 + $0x230] sm:$0xff]  ;;  %v3189_v12 = vld [vmem:[%s6121_s4 + $0x2f8] sm:$0xff] }
 0x41b   :  { %3697 = vmatprep.subr.bf16.mxu1 %v3696_v27  ;;  %v3718_v27 = vpack.c.bf16 %v3165_v23, %v3164_v1  ;;  %v3732_v60 = vpack.c.bf16 %v3189_v12, %v3188_v16  ;;  %v3006_v1 = vsub.s32 4, %v3981_v38  ;;  %v3014_v23 = vsub.s32 6, %v3981_v38 }
 0x41d   :  { %3667 = vmatpush3.bf16.msra.mxu0 %v3666_v30  ;;  %v3184_v30 = vld [vmem:[%s6121_s4 + $0x2d0] sm:$0xff]  ;;  %v3007_v26 = vrot.slane %v5674_v34, %v3006_v1 }
 0x41e   :  { %3699 = vmatpush3.bf16.msra.mxu1 %v3698_v19  ;;  %3669 = vmatprep.subr.bf16.mxu0 %v3668_v32  ;;  %v3722_v19 = vpack.c.bf16 %v3167_v49, %v3166_v29  ;;  %v3749_v32 = vpack.c.bf16 %v3199_v43, %v3198_v25  ;;  %v3724_v35 = vpack.c.bf16 %v3185_v31, %v3184_v30 }
 0x41f   :  { %3701 = vmatprep.subr.bf16.mxu1 %v3700_v44  ;;  %v3726_v44 = vpack.c.bf16 %v3169_v40, %v3168_v62  ;;  %v3019_v25 = vrot.slane %v5674_v34, %v3018_v24  ;;  %v3065_v29 = vrot.slane %v5687_v5, %v3014_v23  ;;  %v3061_v30 = vrot.slane %v5687_v5, %v3010_v33 }
 0x420   :  { %v3069_v31 = vrot.slane %v5687_v5, %v3018_v24 }
 0x421   :  { %3671 = vmatpush3.bf16.msra.mxu0 %v3670_v48  ;;  %v3755_v48 = vpack.c.bf16 %v3203_v47, %v3202_v41 }
 0x422   :  { %3703 = vmatpush3.bf16.msra.mxu1 %v3702_v55  ;;  %3705 = vmatprep.subr.bf16.mxu0 %v3704_v53  ;;  %v3205_v55 = vld [vmem:[%s6121_s4 + $0x378] sm:$0xff]  ;;  %v3206_v53 = vld [vmem:[%s6121_s4 + $0x380] sm:$0xff] }
 0x423   :  { %3736 = vmatprep.subr.bf16.mxu1 %v3898_v8  ;;  %v3758_v52 = vpack.c.bf16 %v3205_v55, %v3204_v51  ;;  %v3761_v57 = vpack.c.bf16 %v3207_v56, %v3206_v53 }
 0x424   :  { %3295 = vmatmul.mubr.f32.vlgmr.msra.gmra.mrb[8].mxu0 %v3086_v0 }
 0x425   :  { %3365 = vmatmul.mubr.f32.vlgmr.msra.gmra.mrb[8].mxu1 %v3088_v7  ;;  %3707 = vmatpush3.bf16.msra.mxu0 %v3706_v63  ;;  %v3211_v63 = vld [vmem:[%s6121_s4 + $0x3a8] sm:$0xff]  ;;  %v3773_v7 = vpack.c.bf16 %v3215_v4, %v3214_v3 }
 0x426   :  { %3738 = vmatpush1.bf16.msra.mxu1 %v3737_v50  ;;  %3709 = vmatprep.subr.bf16.mxu0 %v3708_v6  ;;  %v3767_v0 = vpack.c.bf16 %v3211_v63, %v3210_v59  ;;  %v3212_v50 = vld [vmem:[%s6121_s4 + $0x3b0] sm:$0xff] }
 0x427   :  { %3739 = vmatprep.subr.bf16.mxu1 %v3898_v8  ;;  %v3770_v6 = vpack.c.bf16 %v3213_v37, %v3212_v50 }
 0x429   :  { %3711 = vmatpush3.bf16.msra.mxu0 %v3710_v14  ;;  %v3170_v14 = vld [vmem:[%s6121_s4 + $0x260] sm:$0xff] }
 0x42a   :  { %3741 = vmatpush1.bf16.msra.mxu1 %v3740_v18  ;;  %3713 = vmatprep.subr.bf16.mxu0 %v3712_v10  ;;  %v3171_v18 = vld [vmem:[%s6121_s4 + $0x268] sm:$0xff]  ;;  %v3216_v10 = vld [vmem:[%s6121_s4 + $0x3d0] sm:$0xff] }
 0x42b   :  { %3742 = vmatprep.subr.bf16.mxu1 %v3898_v8  ;;  %v3730_v13 = vpack.c.bf16 %v3171_v18, %v3170_v14  ;;  %v3776_v15 = vpack.c.bf16 %v3217_v20, %v3216_v10 }
 0x42d   :  { %3715 = vmatpush3.bf16.msra.mxu0 %v3714_v21  ;;  %v3173_v21 = vld [vmem:[%s6121_s4 + $0x278] sm:$0xff] }
 0x42e   :  { %3744 = vmatpush1.bf16.msra.mxu1 %v3743_v17  ;;  %3717 = vmatprep.subr.bf16.mxu0 %v3716_v28  ;;  %v3218_v28 = vld [vmem:[%s6121_s4 + $0x3e0] sm:$0xff] }
 0x42f   :  { %3745 = vmatprep.subr.bf16.mxu1 %v3898_v8 }
 0x431   :  { %3719 = vmatpush3.bf16.msra.mxu0 %v3718_v27  ;;  %v3015_v27 = vrot.slane %v5674_v34, %v3014_v23 }
 0x432   :  { %3747 = vmatpush1.bf16.msra.mxu1 %v3746_v11  ;;  %3721 = vmatprep.subr.bf16.mxu0 %v3720_v54  ;;  %v3011_v11 = vrot.slane %v5674_v34, %v3010_v33  ;;  %v3057_v54 = vrot.slane %v5687_v5, %v3006_v1 }
 0x433   :  { %3748 = vmatprep.subr.bf16.mxu1 %v3898_v8 }
 0x435   :  { %3723 = vmatpush3.bf16.msra.mxu0 %v3722_v19 }
 0x436   :  { %3750 = vmatpush1.bf16.msra.mxu1 %v3749_v32  ;;  %3725 = vmatprep.subr.bf16.mxu0 %v3724_v35 }
 0x437   :  { %3751 = vmatprep.subr.bf16.mxu1 %v3898_v8 }
 0x439   :  { %3727 = vmatpush3.bf16.msra.mxu0 %v3726_v44 }
 0x43a   :  { %3753 = vmatpush1.bf16.msra.mxu1 %v3752_v45  ;;  %3729 = vmatprep.subr.bf16.mxu0 %v3728_v42 }
 0x43b   :  { %3754 = vmatprep.subr.bf16.mxu1 %v3898_v8 }
 0x43d   :  { %3731 = vmatpush3.bf16.msra.mxu0 %v3730_v13  ;;  %v3524_v13 = vstv %s6124_s7 }
 0x43e   :  { %3756 = vmatpush1.bf16.msra.mxu1 %v3755_v48  ;;  %3733 = vmatprep.subr.bf16.mxu0 %v3732_v60 }
 0x43f   :  { %3757 = vmatprep.subr.bf16.mxu1 %v3898_v8 }
 0x442   :  { %3759 = vmatpush1.bf16.msra.mxu1 %v3758_v52 }
 0x443   :  { %3760 = vmatprep.subr.bf16.mxu1 %v3898_v8 }
 0x446   :  { %3762 = vmatpush1.bf16.msra.mxu1 %v3761_v57  ;;  %v3532_v57 = vld [vmem:[%s6122_s5] ss:$0 sm:$0xff] }
 0x447   :  { %3763 = vmatprep.subr.bf16.mxu1 %v3898_v8 }
 0x44a   :  { %3765 = vmatpush1.bf16.msra.mxu1 %v3764_v61 }
 0x44b   :  { %3766 = vmatprep.subr.bf16.mxu1 %v3898_v8 }
 0x44e   :  { %3768 = vmatpush1.bf16.msra.mxu1 %v3767_v0 }
 0x44f   :  { %3769 = vmatprep.subr.bf16.mxu1 %v3898_v8 }
 0x452   :  { %3771 = vmatpush1.bf16.msra.mxu1 %v3770_v6 }
 0x453   :  { %3772 = vmatprep.subr.bf16.mxu1 %v3898_v8 }
 0x456   :  { %3774 = vmatpush1.bf16.msra.mxu1 %v3773_v7 }
 0x457   :  { %3775 = vmatprep.subr.bf16.mxu1 %v3898_v8  ;;  %v3172_v8 = vld [vmem:[%s6121_s4 + $0x270] sm:$0xff] }
 0x458   :  { %v3734_v17 = vpack.c.bf16 %v3173_v21, %v3172_v8 }
 0x45a   :  { %3777 = vmatpush1.bf16.msra.mxu1 %v3776_v15  ;;  %3735 = vmatpush3.bf16.msra.mxu0 %v3734_v17 }
 0x45b   :  { %3496 = vmatprep.subr.mxu1 %v3899_v22 }
 0x45e   :  { %3497 = vmatpush1.msra.mxu1 %v3218_v28 }
 0x4d7   :  { %v2651_v49 = vpop.f32.mrb[4].mxu0  ;;  %v2979_v43 = vpop.f32.mrb[4].mxu1 }
 0x4d8   :  { %v3032_v19 = vmul.f32 %v3007_v26, %v2651_v49  ;;  %v3034_v38 = vmul.f32 %v3015_v27, %v2979_v43  ;;  %v2653_v32 = vpop.f32.mrb[5].mxu0  ;;  %v2981_v35 = vpop.f32.mrb[5].mxu1 }
 0x4d9   :  { %v3033_v62 = vmul.f32 %v3011_v11, %v2653_v32  ;;  %v3035_v40 = vmul.f32 %v3019_v25, %v2981_v35  ;;  %v2655_v46 = vpop.f32.mrb[6].mxu0  ;;  %v2983_v36 = vpop.f32.mrb[6].mxu1 }
 0x4da   :  { %v3082_v44 = vadd.f32 %v3057_v54, %v3032_v19  ;;  %v3084_v34 = vadd.f32 %v3065_v29, %v3034_v38  ;;  %v2656_v45 = vpop.f32.mrb[7].mxu0  ;;  %v2984_v41 = vpop.f32.mrb[7].mxu1 }
 0x4db   :  { %v3083_v47 = vadd.f32 %v3061_v30, %v3033_v62  ;;  %v3085_v48 = vadd.f32 %v3069_v31, %v3035_v40 }
 0x4dc   :  { %v3090_v52 = vmax.f32 %v3082_v44, 0.0  ;;  %v3092_v53 = vmax.f32 %v3084_v34, 0.0 }
 0x4dd   :  { %v3091_v51 = vmax.f32 %v3083_v47, 0.0  ;;  %v3093_v55 = vmax.f32 %v3085_v48, 0.0 }
 0x4df   :  { %3434 = vmatprep.mubr.f32.mxu0 %v3091_v51  ;;  %3533 = vmatprep.mubr.msk.f32.mxu1 %vm3226_vm0, %v3093_v55 }
 0x4e0   :  { %3435 = vmatmul.mubr.f32.vlgmr.msra.gmra.mrb[10].mxu0 %v3090_v52  ;;  %3505 = vmatmul.mubr.f32.vlgmr.msra.gmra.mrb[10].mxu1 %v3092_v53 }
 0x4f7   :  { %v3567_v5 = vpop.f32.mrb[8].mxu0 }
 0x4f8   :  { %v3602_v56 = vpop.f32.mrb[8].mxu1  ;;  %v3568_v2 = vpop.f32.mrb[9].mxu0 }
 0x4f9   :  { %v3569_v58 = vadd.f32 %v3568_v2, %v3567_v5  ;;  %v3603_v61 = vpop.f32.mrb[9].mxu1 }
 0x4fa   :  { %v3604_v59 = vadd.f32 %v3603_v61, %v3602_v56 }
 0x4fb   :  { %v3297_v63 = vadd.f32 %v3569_v58, %v3532_v57 }
 0x4fd   :  { %v3367_v0 = vadd.f32 %v3604_v59, %v3297_v63 }
 0x5b3   :  { %v3637_v50 = vpop.f32.mrb[10].mxu0  ;;  %v3506_v37 = vpop.f32.mrb[10].mxu1 }
 0x5b4   :  { %v3638_v6 = vpop.f32.mrb[11].mxu0  ;;  %v3508_v3 = vpop.f32.mrb[11].mxu1 }
 0x5b5   :  { %v3639_v4 = vadd.f32 %v3638_v6, %v3637_v50 }
 0x5b7   :  { %v3437_v7 = vadd.f32 %v3639_v4, %v3367_v0 }
 0x5b9   :  { %v3507_v9 = vadd.f32 %v3506_v37, %v3437_v7 }
 0x5bb   :  { %v3510_v42 = vmax.f32 %v3507_v9, 0.0 }
 0x5bd   :  { %v3518_v14 = vmul.f32 %v3534_v39, %v3510_v42 }
 0x5bf   :  { %v3520_v18 = vsel %vm3519_vm1, %v3518_v14, 0.0 }
 0x5c0   :  { %3521 = vadd.xlane.f32.xlu0 %v3520_v18 }
 0x64d   :  { %v3522_v10 = vpop.xlane.xlu0 %3521 }
 0x64e   :  { %v3525_v20 = vadd.f32 %v3524_v13, %v3522_v10 }
 0x650   :  { %3527 = vst.msk [vmem:[%s6125_s8] sm:$0x3] %vm3526_vm2, %v3525_v20 }

</bundles_post_ra>
